<compile_context>
chip_gen: v6e
topology: v6e:2x2x1
jax: 0.10.0
libtpu: 0.0.40
codegen_flags: <defaults>
</compile_context>

<pallas_src>
import numpy as np
import jax
import jax.numpy as jnp
from jax.experimental import pallas as pl
from jax.experimental.pallas import tpu as pltpu

# ----------------------------------------------------------------------------
# Hyper-parameters (small, consistent with the module's forward pass)
# ----------------------------------------------------------------------------
BATCH = 2
MEL_DIM = 8            # mel/cepstrum channels (mel_dim)
T_FRAMES = 16          # number of frames
N_SPEAKER = 10
SPEAKER_EMB_DIM = 4
SPK_PAD = 8            # speaker-embedding rows padded to a sublane multiple
ENC_HID = 16
ENC_BOT_OUT = 16       # encoder_configs['bot']['output_dim']
TOP_EMB = 8            # quantize_configs['top']['emb_dim']
BOT_EMB = 8            # quantize_configs['bot']['emb_dim']
N_EMB_TOP = 16
N_EMB_BOT = 16
DEC_TOP_OUT = 16       # decoder_configs['top']['output_dim']
DEC_HID = 32
F0_CH = 16             # f0 encoder channels (ConvNorm(1, 16, ...))

SLAB_WIDTH = 32        # max Cin among packed weights

assert BATCH == 2, "batch-fused halo layout below is written for B=2"
assert N_EMB_TOP == N_EMB_BOT


# ----------------------------------------------------------------------------
# In-kernel helpers (operate on traced values, channel-major, batch-fused)
# ----------------------------------------------------------------------------
def _conv(parts, w_stacks, bias, *, k, pad, t_in, cout, relu=False, stride_sel=None):
    """1-D conv (PyTorch NCW semantics) on batch-fused (Cin_i, B*t_in) inputs.

    parts    : list of (Cin_i, B*t_in) activations (conceptually channel-concat)
    w_stacks : list of (K*cout, Cin_i) tap-stacked weights
               (row k*cout + o  <->  torch weight w[o, c, k])
    bias     : (cout, 1)
    One MXU matmul per part; taps are combined by lane-shifted slices + adds.
    Stride-2 is applied with a precomputed 0/1 selector matmul (stride_sel);
    stride-1 outputs are compacted back to the dense (cout, B*t_in) layout.
    """
    blk = t_in + 2 * pad
    wout = BATCH * blk - k + 1
    acc = None
    for xd, ws in zip(parts, w_stacks):
        cin = xd.shape[0]
        zp = jnp.zeros((cin, pad), jnp.float32)
        zpp = jnp.zeros((cin, 2 * pad), jnp.float32)
        # per-example zero halos so taps never mix the two examples
        xp = jnp.concatenate([zp, xd[:, :t_in], zpp, xd[:, t_in:], zp], axis=1)
        if cin == 1:
            r = ws * xp                                               # outer product
        else:
            r = jnp.dot(ws, xp, preferred_element_type=jnp.float32)   # (K*cout, B*blk)
        a = r[0:cout, 0:wout]
        for kk in range(1, k):
            a = a + r[kk * cout:(kk + 1) * cout, kk:kk + wout]
        acc = a if acc is None else acc + a
    y = acc + bias
    if stride_sel is None:
        # stride 1, "same" conv: keep each example's first t_in columns
        y = jnp.concatenate([y[:, 0:t_in], y[:, blk:blk + t_in]], axis=1)
    else:
        # stride 2: one hoisted 0/1 selector matmul picks the valid columns
        y = jnp.dot(y, stride_sel, preferred_element_type=jnp.float32)
    if relu:
        y = jnp.maximum(y, 0.0)
    return y


def _vq(h, cb, cb_t, kidx):
    """Nearest-codeword VQ, channel-major, batch-fused.

    h: (D, N)  cb: (Kc, D)  cb_t: (D, Kc)  kidx: (Kc, 1) int32 iota.
    |h|^2 is omitted from the distance (constant per column -> same argmin).
    """
    kc = cb.shape[0]
    n = h.shape[1]
    dots = jnp.dot(cb, h, preferred_element_type=jnp.float32)          # (Kc, N)
    cbsq = jnp.sum(cb * cb, axis=1, keepdims=True)                     # (Kc, 1)
    dist = cbsq - 2.0 * dots
    mind = jnp.min(dist, axis=0, keepdims=True)                        # (1, N)
    ids = jnp.min(jnp.where(dist <= mind, kidx, kc), axis=0, keepdims=True)
    onehot = (kidx == ids).astype(jnp.float32)                         # (Kc, N)
    z = jnp.dot(cb_t, onehot, preferred_element_type=jnp.float32)      # (D, N)
    probs = jnp.sum(onehot, axis=1, keepdims=True) * (1.0 / n)         # (Kc, 1)
    return z, probs


def _mean_sq(a, b):
    d = a - b
    return jnp.sum(d * d, keepdims=True) * (1.0 / d.size)              # (1, 1)


# ----------------------------------------------------------------------------
# The fused forward kernel (built as a closure over static slab offsets)
# ----------------------------------------------------------------------------
def _build_kernel(entries):
    C, T = MEL_DIM, T_FRAMES
    Th, Tq = T // 2, T // 4

    def kernel(x_ref, sid_ref, slab_ref, out_ref):
        def W(name):
            off, r, c = entries[name]
            return slab_ref[off:off + r, 0:c]

        # ---- inputs -> batch-fused channel-major layout -------------------
        x0 = x_ref[0]                                                  # (C+1, T)
        x1 = x_ref[1]
        mcc = jnp.concatenate([x0[:C, :], x1[:C, :]], axis=1)          # (C, 2T)
        f0 = jnp.concatenate([x0[C:C + 1, :], x1[C:C + 1, :]], axis=1)  # (1, 2T)
        # TODO(synk): normalize/denormalize path skipped (norm=False default);
        #             jitter regularization skipped (jitter=False default).

        # speaker embedding (Linear, bias=False), rows >= SPEAKER_EMB_DIM are 0
        s_cols = jnp.dot(W('spk_w'), sid_ref[...],
                         preferred_element_type=jnp.float32)           # (8, B)

        # ---- F0 encoders ---------------------------------------------------
        f0_bot = _conv([f0], [W('f0b_w')], W('f0b_b'),
                       k=5, pad=2, t_in=T, cout=F0_CH)                 # (16, 2T)
        f0_top = _conv([f0_bot], [W('f0t_w')], W('f0t_b'),
                       k=8, pad=3, t_in=T, cout=F0_CH,
                       stride_sel=W('sel_f0t'))                        # (16, 2*Th)

        # ---- encoder_bot / encoder_top / quantize_conv_bot ------------------
        h1 = _conv([mcc], [W('eb1_w')], W('eb1_b'),
                   k=4, pad=1, t_in=T, cout=ENC_HID,
                   relu=True, stride_sel=W('sel_eb1'))                 # (16, 2*Th)
        h_bot = _conv([h1], [W('eb2_w')], W('eb2_b'),
                      k=3, pad=1, t_in=Th, cout=ENC_BOT_OUT)           # (16, 2*Th)
        h2 = _conv([h_bot], [W('et1_w')], W('et1_b'),
                   k=4, pad=1, t_in=Th, cout=ENC_HID,
                   relu=True, stride_sel=W('sel_et1'))                 # (16, 2*Tq)
        h_top = _conv([h2], [W('et2_w')], W('et2_b'),
                      k=3, pad=1, t_in=Tq, cout=TOP_EMB)               # (8, 2*Tq)
        h_bot_q = _conv([h_bot], [W('qb_w')], W('qb_b'),
                        k=3, pad=1, t_in=Th, cout=BOT_EMB)             # (8, 2*Th)

        # ---- vector quantization (batch-fused along lanes) ------------------
        kidx = jax.lax.broadcasted_iota(jnp.int32, (N_EMB_TOP, 1), 0)
        z_top, p_top = _vq(h_top, W('cb_top'), W('cb_top_t'), kidx)
        z_bot, p_bot = _vq(h_bot_q, W('cb_bot'), W('cb_bot_t'), kidx)

        # vq / commitment losses: forward values coincide (stop_gradient only
        # changes backward).  Straight-through z_st equals z in value.
        # TODO(synk): straight-through / stop-gradient backward not represented
        #             (forward-only fused kernel; pallas_call has no VJP here).
        vq_loss = _mean_sq(h_top, z_top) + _mean_sq(h_bot_q, z_bot)
        commit_loss = vq_loss

        perp_top = jnp.exp(-jnp.sum(p_top * jnp.log(p_top + 1e-10), keepdims=True))
        perp_bot = jnp.exp(-jnp.sum(p_bot * jnp.log(p_bot + 1e-10), keepdims=True))

        # ---- decoder_top -----------------------------------------------------
        ups_half = W('ups_half')                                       # (B*Tq, B*Th)
        ups_full = W('ups_full')                                       # (B*Th, B*T)
        up_top = jnp.dot(z_top, ups_half, preferred_element_type=jnp.float32)
        s_half = jnp.concatenate(
            [jnp.broadcast_to(s_cols[:, 0:1], (SPK_PAD, Th)),
             jnp.broadcast_to(s_cols[:, 1:2], (SPK_PAD, Th))], axis=1)  # (8, 2*Th)
        d1 = _conv([up_top, s_half, f0_top],
                   [W('dt1_wz'), W('dt1_ws'), W('dt1_wf')], W('dt1_b'),
                   k=3, pad=1, t_in=Th, cout=DEC_HID, relu=True)       # (32, 2*Th)
        z_top_dec = _conv([d1], [W('dt2_w')], W('dt2_b'),
                          k=3, pad=1, t_in=Th, cout=DEC_TOP_OUT)       # (16, 2*Th)

        # ---- decoder_bot -----------------------------------------------------
        up_zb = jnp.dot(z_bot, ups_full, preferred_element_type=jnp.float32)
        up_zd = jnp.dot(z_top_dec, ups_full, preferred_element_type=jnp.float32)
        s_full = jnp.concatenate(
            [jnp.broadcast_to(s_cols[:, 0:1], (SPK_PAD, T)),
             jnp.broadcast_to(s_cols[:, 1:2], (SPK_PAD, T))], axis=1)   # (8, 2T)
        d2 = _conv([up_zb, up_zd, s_full, f0_bot],
                   [W('db1_wzb'), W('db1_wzd'), W('db1_ws'), W('db1_wf')],
                   W('db1_b'), k=3, pad=1, t_in=T, cout=DEC_HID, relu=True)
        mcc_hat = _conv([d2], [W('db2_w')], W('db2_b'),
                        k=3, pad=1, t_in=T, cout=MEL_DIM)              # (C, 2T)

        # ---- losses (use_c0=True, denormalize is identity for norm=False) ----
        rc_loss = _mean_sq(mcc, mcc_hat)
        m2m = W('mcc2mel')                                             # (C, C)
        mel_src = jnp.dot(m2m, mcc, preferred_element_type=jnp.float32)
        mel_hat = jnp.dot(m2m, mcc_hat, preferred_element_type=jnp.float32)
        mel_loss = _mean_sq(mel_src, mel_hat)

        loss = rc_loss + vq_loss + 0.25 * commit_loss + 0.1 * mel_loss

        out_ref[...] = jnp.concatenate(
            [loss, rc_loss, mel_loss, vq_loss, commit_loss,
             perp_top, perp_bot, jnp.zeros((1, 1), jnp.float32)], axis=1)

    return kernel


# ----------------------------------------------------------------------------
# Host-side parameter construction & slab packing (done once at init)
# ----------------------------------------------------------------------------
def _stacked(w):
    """torch (Cout, Cin, K) conv weight -> tap-stacked (K*Cout, Cin)."""
    cout, cin, k = w.shape
    return np.transpose(w, (2, 0, 1)).reshape(k * cout, cin)


def _np_stride2_selector(t_in, pad, k):
    """0/1 selector mapping batch-fused full-conv columns -> stride-2 columns."""
    blk = t_in + 2 * pad
    wout = BATCH * blk - k + 1
    tout = (t_in + 2 * pad - k) // 2 + 1
    sel = np.zeros((wout, BATCH * tout), np.float32)
    for e in range(BATCH):
        for j in range(tout):
            sel[e * blk + 2 * j, e * tout + j] = 1.0
    return sel


def _np_upsample2_selector(n_in):
    """Nearest-x2 upsample selector for the dense batch-fused layout."""
    sel = np.zeros((n_in, 2 * n_in), np.float32)
    for i in range(n_in):
        sel[i, 2 * i] = 1.0
        sel[i, 2 * i + 1] = 1.0
    return sel


def make_mcc2mel_matrix(c):
    """Linear map equal to the reference mcc2mel (mirror-extend, double c0,
    real part of rfft):  mel[f] = sum_k w[k] * cos(2*pi*f*k/N) * mcc[k],
    with w[0]=2 (explicit doubling), w[1..C-2]=2 (mirror), w[C-1]=1 (Nyquist)."""
    n = 2 * (c - 1)
    f = np.arange(c)[:, None].astype(np.float64)
    k = np.arange(c)[None, :].astype(np.float64)
    w = np.full((1, c), 2.0)
    w[0, c - 1] = 1.0
    return (w * np.cos(2.0 * np.pi * f * k / n)).astype(np.float32)


class _WeightSlab:
    """Packs many tiny (rows, cols<=width) f32 arrays into one slab; each
    block starts at a sublane-aligned (multiple-of-8) row offset."""

    def __init__(self, width):
        self.width = width
        self.entries = {}
        self.chunks = []
        self.rows = 0

    def add(self, name, arr):
        arr = np.asarray(arr, np.float32)
        if arr.ndim == 1:
            arr = arr[:, None]
        r, c = arr.shape
        assert c <= self.width, (name, arr.shape)
        self.entries[name] = (int(self.rows), int(r), int(c))
        self.chunks.append((self.rows, arr))
        self.rows += -(-r // 8) * 8

    def build(self):
        slab = np.zeros((max(self.rows, 8), self.width), np.float32)
        for off, arr in self.chunks:
            slab[off:off + arr.shape[0], :arr.shape[1]] = arr
        return jnp.asarray(slab)


def init_raw_params(key):
    keys = jax.random.split(key, 14)

    def conv(k, cout, cin, ksz):
        kw, kb = jax.random.split(k)
        w = 0.1 * jax.random.normal(kw, (cout, cin, ksz), jnp.float32)
        b = 0.01 * jax.random.normal(kb, (cout,), jnp.float32)
        return np.asarray(w), np.asarray(b)

    raw = {}
    raw['f0_bot'] = conv(keys[0], F0_CH, 1, 5)
    raw['f0_top'] = conv(keys[1], F0_CH, F0_CH, 8)
    raw['eb1'] = conv(keys[2], ENC_HID, MEL_DIM, 4)
    raw['eb2'] = conv(keys[3], ENC_BOT_OUT, ENC_HID, 3)
    raw['et1'] = conv(keys[4], ENC_HID, ENC_BOT_OUT, 4)
    raw['et2'] = conv(keys[5], TOP_EMB, ENC_HID, 3)
    raw['qb'] = conv(keys[6], BOT_EMB, ENC_BOT_OUT, 3)
    raw['dt1'] = conv(keys[7], DEC_HID, TOP_EMB + SPEAKER_EMB_DIM + F0_CH, 3)
    raw['dt2'] = conv(keys[8], DEC_TOP_OUT, DEC_HID, 3)
    raw['db1'] = conv(keys[9], DEC_HID,
                      BOT_EMB + DEC_TOP_OUT + SPEAKER_EMB_DIM + F0_CH, 3)
    raw['db2'] = conv(keys[10], MEL_DIM, DEC_HID, 3)
    raw['cb_top'] = np.asarray(
        0.1 * jax.random.normal(keys[11], (N_EMB_TOP, TOP_EMB), jnp.float32))
    raw['cb_bot'] = np.asarray(
        0.1 * jax.random.normal(keys[12], (N_EMB_BOT, BOT_EMB), jnp.float32))
    raw['spk_w'] = np.asarray(
        0.1 * jax.random.normal(keys[13], (SPEAKER_EMB_DIM, N_SPEAKER), jnp.float32))
    return raw


def pack_params(raw):
    sl = _WeightSlab(SLAB_WIDTH)

    def add_conv(name, key):
        w, b = raw[key]
        sl.add(name + '_w', _stacked(w))
        sl.add(name + '_b', b)

    add_conv('f0b', 'f0_bot')
    add_conv('f0t', 'f0_top')
    add_conv('eb1', 'eb1')
    add_conv('eb2', 'eb2')
    add_conv('et1', 'et1')
    add_conv('et2', 'et2')
    add_conv('qb', 'qb')

    # decoder_top conv1: split along Cin per input part (z, speaker, f0);
    # speaker part's Cin is zero-padded to 8 to match the padded s activation.
    w, b = raw['dt1']
    sl.add('dt1_wz', _stacked(w[:, 0:TOP_EMB, :]))
    ws = _stacked(w[:, TOP_EMB:TOP_EMB + SPEAKER_EMB_DIM, :])
    sl.add('dt1_ws', np.pad(ws, ((0, 0), (0, SPK_PAD - SPEAKER_EMB_DIM))))
    sl.add('dt1_wf', _stacked(w[:, TOP_EMB + SPEAKER_EMB_DIM:, :]))
    sl.add('dt1_b', b)
    add_conv('dt2', 'dt2')

    # decoder_bot conv1: parts (z_bot, z_top_dec, speaker, f0)
    w, b = raw['db1']
    o = 0
    sl.add('db1_wzb', _stacked(w[:, o:o + BOT_EMB, :])); o += BOT_EMB
    sl.add('db1_wzd', _stacked(w[:, o:o + DEC_TOP_OUT, :])); o += DEC_TOP_OUT
    ws = _stacked(w[:, o:o + SPEAKER_EMB_DIM, :]); o += SPEAKER_EMB_DIM
    sl.add('db1_ws', np.pad(ws, ((0, 0), (0, SPK_PAD - SPEAKER_EMB_DIM))))
    sl.add('db1_wf', _stacked(w[:, o:, :]))
    sl.add('db1_b', b)
    add_conv('db2', 'db2')

    # speaker embedding (Linear, no bias): pad rows 4..7 with zeros so the
    # padded speaker activation matches the padded decoder weight columns.
    sl.add('spk_w', np.pad(raw['spk_w'], ((0, SPK_PAD - SPEAKER_EMB_DIM), (0, 0))))

    # codebooks (+ transposes, precomputed host-side)
    sl.add('cb_top', raw['cb_top'])
    sl.add('cb_top_t', raw['cb_top'].T)
    sl.add('cb_bot', raw['cb_bot'])
    sl.add('cb_bot_t', raw['cb_bot'].T)

    # mcc -> mel cosine matrix
    sl.add('mcc2mel', make_mcc2mel_matrix(MEL_DIM))

    # precomputed 0/1 selectors (hoisted out of the kernel entirely)
    sl.add('sel_eb1', _np_stride2_selector(T_FRAMES, 1, 4))
    sl.add('sel_et1', _np_stride2_selector(T_FRAMES // 2, 1, 4))
    sl.add('sel_f0t', _np_stride2_selector(T_FRAMES, 3, 8))
    sl.add('ups_half', _np_upsample2_selector(BATCH * T_FRAMES // 4))
    sl.add('ups_full', _np_upsample2_selector(BATCH * T_FRAMES // 2))

    return sl.build(), sl.entries


# ----------------------------------------------------------------------------
# VQVAE2Stage.forward wrapper: a single fused, gridless, VMEM-resident call
# ----------------------------------------------------------------------------
def make_forward(entries):
    kernel = _build_kernel(entries)

    @jax.jit
    def forward(slab, x, speaker_id):
        """Returns (loss, (rc, mel, vq, commitment, (perp_top, perp_bot)))."""
        sid_t = jnp.transpose(speaker_id.astype(jnp.float32))   # (n_speaker, B)
        out = pl.pallas_call(
            kernel,
            out_shape=jax.ShapeDtypeStruct((1, 8), jnp.float32),
            in_specs=[pl.BlockSpec(memory_space=pltpu.MemorySpace.VMEM)] * 3,
            out_specs=pl.BlockSpec(memory_space=pltpu.MemorySpace.VMEM),
        )(x.astype(jnp.float32), sid_t, slab)
        loss = out[0, 0]
        rc, mel, vq, commit = out[0, 1], out[0, 2], out[0, 3], out[0, 4]
        perp_top, perp_bot = out[0, 5], out[0, 6]
        return loss, (rc, mel, vq, commit, (perp_top, perp_bot))

    return forward


# ----------------------------------------------------------------------------
if __name__ == "__main__":
    key = jax.random.PRNGKey(0)
    kx, ks, kp = jax.random.split(key, 3)

    raw = init_raw_params(kp)
    slab, entries = pack_params(raw)
    forward = make_forward(entries)

    x = jax.random.normal(kx, (BATCH, MEL_DIM + 1, T_FRAMES), jnp.float32)
    spk_idx = jax.random.randint(ks, (BATCH,), 0, N_SPEAKER)
    speaker_id = jax.nn.one_hot(spk_idx, N_SPEAKER, dtype=jnp.float32)

    loss, aux = forward(slab, x, speaker_id)
    jax.block_until_ready(loss)
    rc, mel, vq, commit, (pt, pb) = aux
    assert np.isfinite(float(loss))
    print("KERNEL_OK")
</pallas_src>

<mosaic_0001>
module attributes {stable_mosaic.version = 11 : i64} {
  func.func @kernel(%arg0: memref<2x9x16xf32, #tpu.memory_space<vmem>>, %arg1: memref<10x2xf32, #tpu.memory_space<vmem>>, %arg2: memref<1552x32xf32, #tpu.memory_space<vmem>>, %arg3: memref<1x8xf32, #tpu.memory_space<vmem>>) attributes {dimension_semantics = [], scalar_prefetch = 0 : i64, scratch_operands = 0 : i64, tpu.core_type = #tpu.core_type<tc>} {
    %c0 = arith.constant 0 : index
    %c0_0 = arith.constant 0 : index
    %c0_1 = arith.constant 0 : index
    %0 = vector.load %arg0[%c0, %c0_0, %c0_1] : memref<2x9x16xf32, #tpu.memory_space<vmem>>, vector<1x9x16xf32>
    %1 = vector.shape_cast %0 : vector<1x9x16xf32> to vector<9x16xf32>
    %c1 = arith.constant 1 : index
    %c0_2 = arith.constant 0 : index
    %c0_3 = arith.constant 0 : index
    %2 = vector.load %arg0[%c1, %c0_2, %c0_3] : memref<2x9x16xf32, #tpu.memory_space<vmem>>, vector<1x9x16xf32>
    %3 = vector.shape_cast %2 : vector<1x9x16xf32> to vector<9x16xf32>
    %4 = vector.extract_strided_slice %1 {offsets = [0, 0], sizes = [8, 16], strides = [1, 1]} : vector<9x16xf32> to vector<8x16xf32>
    %5 = vector.extract_strided_slice %3 {offsets = [0, 0], sizes = [8, 16], strides = [1, 1]} : vector<9x16xf32> to vector<8x16xf32>
    %6 = tpu.concatenate %4, %5 in 1 : vector<8x16xf32>, vector<8x16xf32> -> vector<8x32xf32>
    %7 = vector.extract_strided_slice %1 {offsets = [8, 0], sizes = [1, 16], strides = [1, 1]} : vector<9x16xf32> to vector<1x16xf32>
    %8 = vector.extract_strided_slice %3 {offsets = [8, 0], sizes = [1, 16], strides = [1, 1]} : vector<9x16xf32> to vector<1x16xf32>
    %9 = tpu.concatenate %7, %8 in 1 : vector<1x16xf32>, vector<1x16xf32> -> vector<1x32xf32>
    %c1360 = arith.constant 1360 : index
    %c0_4 = arith.constant 0 : index
    %10 = vector.load %arg2[%c1360, %c0_4] : memref<1552x32xf32, #tpu.memory_space<vmem>>, vector<8x10xf32>
    %c0_5 = arith.constant 0 : index
    %c0_6 = arith.constant 0 : index
    %11 = vector.load %arg1[%c0_5, %c0_6] : memref<10x2xf32, #tpu.memory_space<vmem>>, vector<10x2xf32>
    %cst = arith.constant dense<0.000000e+00> : vector<8x2xf32>
    %12 = tpu.matmul %10, %11, %cst {dimension_numbers = #tpu.dot_dimension_numbers<[1], [0], [0], [1], [0, 0, 1, 1], [], []>} : vector<8x10xf32>, vector<10x2xf32>, vector<8x2xf32> -> vector<8x2xf32>
    %c0_7 = arith.constant 0 : index
    %c0_8 = arith.constant 0 : index
    %13 = vector.load %arg2[%c0_7, %c0_8] : memref<1552x32xf32, #tpu.memory_space<vmem>>, vector<80x1xf32>
    %c80 = arith.constant 80 : index
    %c0_9 = arith.constant 0 : index
    %14 = vector.load %arg2[%c80, %c0_9] : memref<1552x32xf32, #tpu.memory_space<vmem>>, vector<16x1xf32>
    %cst_10 = arith.constant 0.000000e+00 : f32
    %15 = vector.broadcast %cst_10 : f32 to vector<1x2xf32>
    %cst_11 = arith.constant 0.000000e+00 : f32
    %16 = vector.broadcast %cst_11 : f32 to vector<1x4xf32>
    %17 = vector.extract_strided_slice %9 {offsets = [0, 0], sizes = [1, 16], strides = [1, 1]} : vector<1x32xf32> to vector<1x16xf32>
    %18 = vector.extract_strided_slice %9 {offsets = [0, 16], sizes = [1, 16], strides = [1, 1]} : vector<1x32xf32> to vector<1x16xf32>
    %19 = tpu.concatenate %15, %17, %16, %18, %15 in 1 : vector<1x2xf32>, vector<1x16xf32>, vector<1x4xf32>, vector<1x16xf32>, vector<1x2xf32> -> vector<1x40xf32>
    %20 = vector.broadcast %13 : vector<80x1xf32> to vector<80x40xf32>
    %21 = vector.broadcast %19 : vector<1x40xf32> to vector<80x40xf32>
    %22 = arith.mulf %20, %21 : vector<80x40xf32>
    %23 = vector.extract_strided_slice %22 {offsets = [0, 0], sizes = [16, 36], strides = [1, 1]} : vector<80x40xf32> to vector<16x36xf32>
    %24 = vector.extract_strided_slice %22 {offsets = [16, 1], sizes = [16, 36], strides = [1, 1]} : vector<80x40xf32> to vector<16x36xf32>
    %25 = arith.addf %23, %24 : vector<16x36xf32>
    %26 = vector.extract_strided_slice %22 {offsets = [32, 2], sizes = [16, 36], strides = [1, 1]} : vector<80x40xf32> to vector<16x36xf32>
    %27 = arith.addf %25, %26 : vector<16x36xf32>
    %28 = vector.extract_strided_slice %22 {offsets = [48, 3], sizes = [16, 36], strides = [1, 1]} : vector<80x40xf32> to vector<16x36xf32>
    %29 = arith.addf %27, %28 : vector<16x36xf32>
    %30 = vector.extract_strided_slice %22 {offsets = [64, 4], sizes = [16, 36], strides = [1, 1]} : vector<80x40xf32> to vector<16x36xf32>
    %31 = arith.addf %29, %30 : vector<16x36xf32>
    %32 = vector.broadcast %14 : vector<16x1xf32> to vector<16x36xf32>
    %33 = arith.addf %31, %32 : vector<16x36xf32>
    %34 = vector.extract_strided_slice %33 {offsets = [0, 0], sizes = [16, 16], strides = [1, 1]} : vector<16x36xf32> to vector<16x16xf32>
    %35 = vector.extract_strided_slice %33 {offsets = [0, 20], sizes = [16, 16], strides = [1, 1]} : vector<16x36xf32> to vector<16x16xf32>
    %36 = tpu.concatenate %34, %35 in 1 : vector<16x16xf32>, vector<16x16xf32> -> vector<16x32xf32>
    %c96 = arith.constant 96 : index
    %c0_12 = arith.constant 0 : index
    %37 = vector.load %arg2[%c96, %c0_12] : memref<1552x32xf32, #tpu.memory_space<vmem>>, vector<128x16xf32>
    %c224 = arith.constant 224 : index
    %c0_13 = arith.constant 0 : index
    %38 = vector.load %arg2[%c224, %c0_13] : memref<1552x32xf32, #tpu.memory_space<vmem>>, vector<16x1xf32>
    %c1488 = arith.constant 1488 : index
    %c0_14 = arith.constant 0 : index
    %39 = vector.load %arg2[%c1488, %c0_14] : memref<1552x32xf32, #tpu.memory_space<vmem>>, vector<37x16xf32>
    %cst_15 = arith.constant 0.000000e+00 : f32
    %40 = vector.broadcast %cst_15 : f32 to vector<16x3xf32>
    %cst_16 = arith.constant 0.000000e+00 : f32
    %41 = vector.broadcast %cst_16 : f32 to vector<16x6xf32>
    %42 = vector.extract_strided_slice %36 {offsets = [0, 0], sizes = [16, 16], strides = [1, 1]} : vector<16x32xf32> to vector<16x16xf32>
    %43 = vector.extract_strided_slice %36 {offsets = [0, 16], sizes = [16, 16], strides = [1, 1]} : vector<16x32xf32> to vector<16x16xf32>
    %44 = tpu.concatenate %40, %42, %41, %43, %40 in 1 : vector<16x3xf32>, vector<16x16xf32>, vector<16x6xf32>, vector<16x16xf32>, vector<16x3xf32> -> vector<16x44xf32>
    %cst_17 = arith.constant dense<0.000000e+00> : vector<128x44xf32>
    %45 = tpu.matmul %37, %44, %cst_17 {dimension_numbers = #tpu.dot_dimension_numbers<[1], [0], [0], [1], [0, 0, 1, 1], [], []>} : vector<128x16xf32>, vector<16x44xf32>, vector<128x44xf32> -> vector<128x44xf32>
    %46 = vector.extract_strided_slice %45 {offsets = [0, 0], sizes = [16, 37], strides = [1, 1]} : vector<128x44xf32> to vector<16x37xf32>
    %47 = vector.extract_strided_slice %45 {offsets = [16, 1], sizes = [16, 37], strides = [1, 1]} : vector<128x44xf32> to vector<16x37xf32>
    %48 = arith.addf %46, %47 : vector<16x37xf32>
    %49 = vector.extract_strided_slice %45 {offsets = [32, 2], sizes = [16, 37], strides = [1, 1]} : vector<128x44xf32> to vector<16x37xf32>
    %50 = arith.addf %48, %49 : vector<16x37xf32>
    %51 = vector.extract_strided_slice %45 {offsets = [48, 3], sizes = [16, 37], strides = [1, 1]} : vector<128x44xf32> to vector<16x37xf32>
    %52 = arith.addf %50, %51 : vector<16x37xf32>
    %53 = vector.extract_strided_slice %45 {offsets = [64, 4], sizes = [16, 37], strides = [1, 1]} : vector<128x44xf32> to vector<16x37xf32>
    %54 = arith.addf %52, %53 : vector<16x37xf32>
    %55 = vector.extract_strided_slice %45 {offsets = [80, 5], sizes = [16, 37], strides = [1, 1]} : vector<128x44xf32> to vector<16x37xf32>
    %56 = arith.addf %54, %55 : vector<16x37xf32>
    %57 = vector.extract_strided_slice %45 {offsets = [96, 6], sizes = [16, 37], strides = [1, 1]} : vector<128x44xf32> to vector<16x37xf32>
    %58 = arith.addf %56, %57 : vector<16x37xf32>
    %59 = vector.extract_strided_slice %45 {offsets = [112, 7], sizes = [16, 37], strides = [1, 1]} : vector<128x44xf32> to vector<16x37xf32>
    %60 = arith.addf %58, %59 : vector<16x37xf32>
    %61 = vector.broadcast %38 : vector<16x1xf32> to vector<16x37xf32>
    %62 = arith.addf %60, %61 : vector<16x37xf32>
    %cst_18 = arith.constant dense<0.000000e+00> : vector<16x16xf32>
    %63 = tpu.matmul %62, %39, %cst_18 {dimension_numbers = #tpu.dot_dimension_numbers<[1], [0], [0], [1], [0, 0, 1, 1], [], []>} : vector<16x37xf32>, vector<37x16xf32>, vector<16x16xf32> -> vector<16x16xf32>
    %c240 = arith.constant 240 : index
    %c0_19 = arith.constant 0 : index
    %64 = vector.load %arg2[%c240, %c0_19] : memref<1552x32xf32, #tpu.memory_space<vmem>>, vector<64x8xf32>
    %c304 = arith.constant 304 : index
    %c0_20 = arith.constant 0 : index
    %65 = vector.load %arg2[%c304, %c0_20] : memref<1552x32xf32, #tpu.memory_space<vmem>>, vector<16x1xf32>
    %c1424 = arith.constant 1424 : index
    %c0_21 = arith.constant 0 : index
    %66 = vector.load %arg2[%c1424, %c0_21] : memref<1552x32xf32, #tpu.memory_space<vmem>>, vector<33x16xf32>
    %cst_22 = arith.constant 0.000000e+00 : f32
    %67 = vector.broadcast %cst_22 : f32 to vector<8x1xf32>
    %cst_23 = arith.constant 0.000000e+00 : f32
    %68 = vector.broadcast %cst_23 : f32 to vector<8x2xf32>
    %69 = vector.extract_strided_slice %6 {offsets = [0, 0], sizes = [8, 16], strides = [1, 1]} : vector<8x32xf32> to vector<8x16xf32>
    %70 = vector.extract_strided_slice %6 {offsets = [0, 16], sizes = [8, 16], strides = [1, 1]} : vector<8x32xf32> to vector<8x16xf32>
    %71 = tpu.concatenate %67, %69, %68, %70, %67 in 1 : vector<8x1xf32>, vector<8x16xf32>, vector<8x2xf32>, vector<8x16xf32>, vector<8x1xf32> -> vector<8x36xf32>
    %cst_24 = arith.constant dense<0.000000e+00> : vector<64x36xf32>
    %72 = tpu.matmul %64, %71, %cst_24 {dimension_numbers = #tpu.dot_dimension_numbers<[1], [0], [0], [1], [0, 0, 1, 1], [], []>} : vector<64x8xf32>, vector<8x36xf32>, vector<64x36xf32> -> vector<64x36xf32>
    %73 = vector.extract_strided_slice %72 {offsets = [0, 0], sizes = [16, 33], strides = [1, 1]} : vector<64x36xf32> to vector<16x33xf32>
    %74 = vector.extract_strided_slice %72 {offsets = [16, 1], sizes = [16, 33], strides = [1, 1]} : vector<64x36xf32> to vector<16x33xf32>
    %75 = arith.addf %73, %74 : vector<16x33xf32>
    %76 = vector.extract_strided_slice %72 {offsets = [32, 2], sizes = [16, 33], strides = [1, 1]} : vector<64x36xf32> to vector<16x33xf32>
    %77 = arith.addf %75, %76 : vector<16x33xf32>
    %78 = vector.extract_strided_slice %72 {offsets = [48, 3], sizes = [16, 33], strides = [1, 1]} : vector<64x36xf32> to vector<16x33xf32>
    %79 = arith.addf %77, %78 : vector<16x33xf32>
    %80 = vector.broadcast %65 : vector<16x1xf32> to vector<16x33xf32>
    %81 = arith.addf %79, %80 : vector<16x33xf32>
    %cst_25 = arith.constant dense<0.000000e+00> : vector<16x16xf32>
    %82 = tpu.matmul %81, %66, %cst_25 {dimension_numbers = #tpu.dot_dimension_numbers<[1], [0], [0], [1], [0, 0, 1, 1], [], []>} : vector<16x33xf32>, vector<33x16xf32>, vector<16x16xf32> -> vector<16x16xf32>
    %cst_26 = arith.constant 0.000000e+00 : f32
    %83 = vector.broadcast %cst_26 : f32 to vector<16x16xf32>
    %84 = arith.maximumf %82, %83 : vector<16x16xf32>
    %c320 = arith.constant 320 : index
    %c0_27 = arith.constant 0 : index
    %85 = vector.load %arg2[%c320, %c0_27] : memref<1552x32xf32, #tpu.memory_space<vmem>>, vector<48x16xf32>
    %c368 = arith.constant 368 : index
    %c0_28 = arith.constant 0 : index
    %86 = vector.load %arg2[%c368, %c0_28] : memref<1552x32xf32, #tpu.memory_space<vmem>>, vector<16x1xf32>
    %cst_29 = arith.constant 0.000000e+00 : f32
    %87 = vector.broadcast %cst_29 : f32 to vector<16x1xf32>
    %cst_30 = arith.constant 0.000000e+00 : f32
    %88 = vector.broadcast %cst_30 : f32 to vector<16x2xf32>
    %89 = vector.extract_strided_slice %84 {offsets = [0, 0], sizes = [16, 8], strides = [1, 1]} : vector<16x16xf32> to vector<16x8xf32>
    %90 = vector.extract_strided_slice %84 {offsets = [0, 8], sizes = [16, 8], strides = [1, 1]} : vector<16x16xf32> to vector<16x8xf32>
    %91 = tpu.concatenate %87, %89, %88, %90, %87 in 1 : vector<16x1xf32>, vector<16x8xf32>, vector<16x2xf32>, vector<16x8xf32>, vector<16x1xf32> -> vector<16x20xf32>
    %cst_31 = arith.constant dense<0.000000e+00> : vector<48x20xf32>
    %92 = tpu.matmul %85, %91, %cst_31 {dimension_numbers = #tpu.dot_dimension_numbers<[1], [0], [0], [1], [0, 0, 1, 1], [], []>} : vector<48x16xf32>, vector<16x20xf32>, vector<48x20xf32> -> vector<48x20xf32>
    %93 = vector.extract_strided_slice %92 {offsets = [0, 0], sizes = [16, 18], strides = [1, 1]} : vector<48x20xf32> to vector<16x18xf32>
    %94 = vector.extract_strided_slice %92 {offsets = [16, 1], sizes = [16, 18], strides = [1, 1]} : vector<48x20xf32> to vector<16x18xf32>
    %95 = arith.addf %93, %94 : vector<16x18xf32>
    %96 = vector.extract_strided_slice %92 {offsets = [32, 2], sizes = [16, 18], strides = [1, 1]} : vector<48x20xf32> to vector<16x18xf32>
    %97 = arith.addf %95, %96 : vector<16x18xf32>
    %98 = vector.broadcast %86 : vector<16x1xf32> to vector<16x18xf32>
    %99 = arith.addf %97, %98 : vector<16x18xf32>
    %100 = vector.extract_strided_slice %99 {offsets = [0, 0], sizes = [16, 8], strides = [1, 1]} : vector<16x18xf32> to vector<16x8xf32>
    %101 = vector.extract_strided_slice %99 {offsets = [0, 10], sizes = [16, 8], strides = [1, 1]} : vector<16x18xf32> to vector<16x8xf32>
    %102 = tpu.concatenate %100, %101 in 1 : vector<16x8xf32>, vector<16x8xf32> -> vector<16x16xf32>
    %c384 = arith.constant 384 : index
    %c0_32 = arith.constant 0 : index
    %103 = vector.load %arg2[%c384, %c0_32] : memref<1552x32xf32, #tpu.memory_space<vmem>>, vector<64x16xf32>
    %c448 = arith.constant 448 : index
    %c0_33 = arith.constant 0 : index
    %104 = vector.load %arg2[%c448, %c0_33] : memref<1552x32xf32, #tpu.memory_space<vmem>>, vector<16x1xf32>
    %c1464 = arith.constant 1464 : index
    %c0_34 = arith.constant 0 : index
    %105 = vector.load %arg2[%c1464, %c0_34] : memref<1552x32xf32, #tpu.memory_space<vmem>>, vector<17x8xf32>
    %cst_35 = arith.constant 0.000000e+00 : f32
    %106 = vector.broadcast %cst_35 : f32 to vector<16x1xf32>
    %cst_36 = arith.constant 0.000000e+00 : f32
    %107 = vector.broadcast %cst_36 : f32 to vector<16x2xf32>
    %108 = vector.extract_strided_slice %102 {offsets = [0, 0], sizes = [16, 8], strides = [1, 1]} : vector<16x16xf32> to vector<16x8xf32>
    %109 = vector.extract_strided_slice %102 {offsets = [0, 8], sizes = [16, 8], strides = [1, 1]} : vector<16x16xf32> to vector<16x8xf32>
    %110 = tpu.concatenate %106, %108, %107, %109, %106 in 1 : vector<16x1xf32>, vector<16x8xf32>, vector<16x2xf32>, vector<16x8xf32>, vector<16x1xf32> -> vector<16x20xf32>
    %cst_37 = arith.constant dense<0.000000e+00> : vector<64x20xf32>
    %111 = tpu.matmul %103, %110, %cst_37 {dimension_numbers = #tpu.dot_dimension_numbers<[1], [0], [0], [1], [0, 0, 1, 1], [], []>} : vector<64x16xf32>, vector<16x20xf32>, vector<64x20xf32> -> vector<64x20xf32>
    %112 = vector.extract_strided_slice %111 {offsets = [0, 0], sizes = [16, 17], strides = [1, 1]} : vector<64x20xf32> to vector<16x17xf32>
    %113 = vector.extract_strided_slice %111 {offsets = [16, 1], sizes = [16, 17], strides = [1, 1]} : vector<64x20xf32> to vector<16x17xf32>
    %114 = arith.addf %112, %113 : vector<16x17xf32>
    %115 = vector.extract_strided_slice %111 {offsets = [32, 2], sizes = [16, 17], strides = [1, 1]} : vector<64x20xf32> to vector<16x17xf32>
    %116 = arith.addf %114, %115 : vector<16x17xf32>
    %117 = vector.extract_strided_slice %111 {offsets = [48, 3], sizes = [16, 17], strides = [1, 1]} : vector<64x20xf32> to vector<16x17xf32>
    %118 = arith.addf %116, %117 : vector<16x17xf32>
    %119 = vector.broadcast %104 : vector<16x1xf32> to vector<16x17xf32>
    %120 = arith.addf %118, %119 : vector<16x17xf32>
    %cst_38 = arith.constant dense<0.000000e+00> : vector<16x8xf32>
    %121 = tpu.matmul %120, %105, %cst_38 {dimension_numbers = #tpu.dot_dimension_numbers<[1], [0], [0], [1], [0, 0, 1, 1], [], []>} : vector<16x17xf32>, vector<17x8xf32>, vector<16x8xf32> -> vector<16x8xf32>
    %cst_39 = arith.constant 0.000000e+00 : f32
    %122 = vector.broadcast %cst_39 : f32 to vector<16x8xf32>
    %123 = arith.maximumf %121, %122 : vector<16x8xf32>
    %c464 = arith.constant 464 : index
    %c0_40 = arith.constant 0 : index
    %124 = vector.load %arg2[%c464, %c0_40] : memref<1552x32xf32, #tpu.memory_space<vmem>>, vector<24x16xf32>
    %c488 = arith.constant 488 : index
    %c0_41 = arith.constant 0 : index
    %125 = vector.load %arg2[%c488, %c0_41] : memref<1552x32xf32, #tpu.memory_space<vmem>>, vector<8x1xf32>
    %cst_42 = arith.constant 0.000000e+00 : f32
    %126 = vector.broadcast %cst_42 : f32 to vector<16x1xf32>
    %cst_43 = arith.constant 0.000000e+00 : f32
    %127 = vector.broadcast %cst_43 : f32 to vector<16x2xf32>
    %128 = vector.extract_strided_slice %123 {offsets = [0, 0], sizes = [16, 4], strides = [1, 1]} : vector<16x8xf32> to vector<16x4xf32>
    %129 = vector.extract_strided_slice %123 {offsets = [0, 4], sizes = [16, 4], strides = [1, 1]} : vector<16x8xf32> to vector<16x4xf32>
    %130 = tpu.concatenate %126, %128, %127, %129, %126 in 1 : vector<16x1xf32>, vector<16x4xf32>, vector<16x2xf32>, vector<16x4xf32>, vector<16x1xf32> -> vector<16x12xf32>
    %cst_44 = arith.constant dense<0.000000e+00> : vector<24x12xf32>
    %131 = tpu.matmul %124, %130, %cst_44 {dimension_numbers = #tpu.dot_dimension_numbers<[1], [0], [0], [1], [0, 0, 1, 1], [], []>} : vector<24x16xf32>, vector<16x12xf32>, vector<24x12xf32> -> vector<24x12xf32>
    %132 = vector.extract_strided_slice %131 {offsets = [0, 0], sizes = [8, 10], strides = [1, 1]} : vector<24x12xf32> to vector<8x10xf32>
    %133 = vector.extract_strided_slice %131 {offsets = [8, 1], sizes = [8, 10], strides = [1, 1]} : vector<24x12xf32> to vector<8x10xf32>
    %134 = arith.addf %132, %133 : vector<8x10xf32>
    %135 = vector.extract_strided_slice %131 {offsets = [16, 2], sizes = [8, 10], strides = [1, 1]} : vector<24x12xf32> to vector<8x10xf32>
    %136 = arith.addf %134, %135 : vector<8x10xf32>
    %137 = vector.broadcast %125 : vector<8x1xf32> to vector<8x10xf32>
    %138 = arith.addf %136, %137 : vector<8x10xf32>
    %139 = vector.extract_strided_slice %138 {offsets = [0, 0], sizes = [8, 4], strides = [1, 1]} : vector<8x10xf32> to vector<8x4xf32>
    %140 = vector.extract_strided_slice %138 {offsets = [0, 6], sizes = [8, 4], strides = [1, 1]} : vector<8x10xf32> to vector<8x4xf32>
    %141 = tpu.concatenate %139, %140 in 1 : vector<8x4xf32>, vector<8x4xf32> -> vector<8x8xf32>
    %c496 = arith.constant 496 : index
    %c0_45 = arith.constant 0 : index
    %142 = vector.load %arg2[%c496, %c0_45] : memref<1552x32xf32, #tpu.memory_space<vmem>>, vector<24x16xf32>
    %c520 = arith.constant 520 : index
    %c0_46 = arith.constant 0 : index
    %143 = vector.load %arg2[%c520, %c0_46] : memref<1552x32xf32, #tpu.memory_space<vmem>>, vector<8x1xf32>
    %cst_47 = arith.constant 0.000000e+00 : f32
    %144 = vector.broadcast %cst_47 : f32 to vector<16x1xf32>
    %cst_48 = arith.constant 0.000000e+00 : f32
    %145 = vector.broadcast %cst_48 : f32 to vector<16x2xf32>
    %146 = vector.extract_strided_slice %102 {offsets = [0, 0], sizes = [16, 8], strides = [1, 1]} : vector<16x16xf32> to vector<16x8xf32>
    %147 = vector.extract_strided_slice %102 {offsets = [0, 8], sizes = [16, 8], strides = [1, 1]} : vector<16x16xf32> to vector<16x8xf32>
    %148 = tpu.concatenate %144, %146, %145, %147, %144 in 1 : vector<16x1xf32>, vector<16x8xf32>, vector<16x2xf32>, vector<16x8xf32>, vector<16x1xf32> -> vector<16x20xf32>
    %cst_49 = arith.constant dense<0.000000e+00> : vector<24x20xf32>
    %149 = tpu.matmul %142, %148, %cst_49 {dimension_numbers = #tpu.dot_dimension_numbers<[1], [0], [0], [1], [0, 0, 1, 1], [], []>} : vector<24x16xf32>, vector<16x20xf32>, vector<24x20xf32> -> vector<24x20xf32>
    %150 = vector.extract_strided_slice %149 {offsets = [0, 0], sizes = [8, 18], strides = [1, 1]} : vector<24x20xf32> to vector<8x18xf32>
    %151 = vector.extract_strided_slice %149 {offsets = [8, 1], sizes = [8, 18], strides = [1, 1]} : vector<24x20xf32> to vector<8x18xf32>
    %152 = arith.addf %150, %151 : vector<8x18xf32>
    %153 = vector.extract_strided_slice %149 {offsets = [16, 2], sizes = [8, 18], strides = [1, 1]} : vector<24x20xf32> to vector<8x18xf32>
    %154 = arith.addf %152, %153 : vector<8x18xf32>
    %155 = vector.broadcast %143 : vector<8x1xf32> to vector<8x18xf32>
    %156 = arith.addf %154, %155 : vector<8x18xf32>
    %157 = vector.extract_strided_slice %156 {offsets = [0, 0], sizes = [8, 8], strides = [1, 1]} : vector<8x18xf32> to vector<8x8xf32>
    %158 = vector.extract_strided_slice %156 {offsets = [0, 10], sizes = [8, 8], strides = [1, 1]} : vector<8x18xf32> to vector<8x8xf32>
    %159 = tpu.concatenate %157, %158 in 1 : vector<8x8xf32>, vector<8x8xf32> -> vector<8x16xf32>
    %160 = tpu.iota {dimensions = array<i32: 0>} : vector<16x1xi32>
    %c1368 = arith.constant 1368 : index
    %c0_50 = arith.constant 0 : index
    %161 = vector.load %arg2[%c1368, %c0_50] : memref<1552x32xf32, #tpu.memory_space<vmem>>, vector<16x8xf32>
    %c1384 = arith.constant 1384 : index
    %c0_51 = arith.constant 0 : index
    %162 = vector.load %arg2[%c1384, %c0_51] : memref<1552x32xf32, #tpu.memory_space<vmem>>, vector<8x16xf32>
    %cst_52 = arith.constant dense<0.000000e+00> : vector<16x8xf32>
    %163 = tpu.matmul %161, %141, %cst_52 {dimension_numbers = #tpu.dot_dimension_numbers<[1], [0], [0], [1], [0, 0, 1, 1], [], []>} : vector<16x8xf32>, vector<8x8xf32>, vector<16x8xf32> -> vector<16x8xf32>
    %164 = arith.mulf %161, %161 : vector<16x8xf32>
    %cst_53 = arith.constant dense<0.000000e+00> : vector<16xf32>
    %165 = vector.multi_reduction <add>, %164, %cst_53 [1] : vector<16x8xf32> to vector<16xf32>
    %166 = vector.shape_cast %165 : vector<16xf32> to vector<16x1xf32>
    %cst_54 = arith.constant 2.000000e+00 : f32
    %167 = vector.broadcast %cst_54 : f32 to vector<16x8xf32>
    %168 = arith.mulf %167, %163 : vector<16x8xf32>
    %169 = vector.broadcast %166 : vector<16x1xf32> to vector<16x8xf32>
    %170 = arith.subf %169, %168 : vector<16x8xf32>
    %cst_55 = arith.constant dense<0x7F800000> : vector<8xf32>
    %171 = vector.multi_reduction <minimumf>, %170, %cst_55 [0] : vector<16x8xf32> to vector<8xf32>
    %172 = vector.shape_cast %171 : vector<8xf32> to vector<1x8xf32>
    %173 = vector.broadcast %172 : vector<1x8xf32> to vector<16x8xf32>
    %174 = arith.cmpf ole, %170, %173 : vector<16x8xf32>
    %c16_i32 = arith.constant 16 : i32
    %175 = vector.shape_cast %160 : vector<16x1xi32> to vector<16x1xi32>
    %176 = vector.broadcast %175 : vector<16x1xi32> to vector<16x8xi32>
    %177 = vector.broadcast %c16_i32 : i32 to vector<16x8xi32>
    %178 = arith.select %174, %176, %177 : vector<16x8xi1>, vector<16x8xi32>
    %cst_56 = arith.constant dense<2147483647> : vector<8xi32>
    %179 = vector.multi_reduction <minsi>, %178, %cst_56 [0] : vector<16x8xi32> to vector<8xi32>
    %180 = vector.shape_cast %179 : vector<8xi32> to vector<1x8xi32>
    %181 = vector.broadcast %160 : vector<16x1xi32> to vector<16x8xi32>
    %182 = vector.broadcast %180 : vector<1x8xi32> to vector<16x8xi32>
    %183 = arith.cmpi eq, %181, %182 : vector<16x8xi32>
    %184 = arith.extui %183 : vector<16x8xi1> to vector<16x8xi32>
    %185 = arith.sitofp %184 : vector<16x8xi32> to vector<16x8xf32>
    %cst_57 = arith.constant dense<0.000000e+00> : vector<8x8xf32>
    %186 = tpu.matmul %162, %185, %cst_57 {dimension_numbers = #tpu.dot_dimension_numbers<[1], [0], [0], [1], [0, 0, 1, 1], [], []>} : vector<8x16xf32>, vector<16x8xf32>, vector<8x8xf32> -> vector<8x8xf32>
    %cst_58 = arith.constant dense<0.000000e+00> : vector<16xf32>
    %187 = vector.multi_reduction <add>, %185, %cst_58 [1] : vector<16x8xf32> to vector<16xf32>
    %188 = vector.shape_cast %187 : vector<16xf32> to vector<16x1xf32>
    %cst_59 = arith.constant 1.250000e-01 : f32
    %189 = vector.broadcast %cst_59 : f32 to vector<16x1xf32>
    %190 = arith.mulf %188, %189 : vector<16x1xf32>
    %c1392 = arith.constant 1392 : index
    %c0_60 = arith.constant 0 : index
    %191 = vector.load %arg2[%c1392, %c0_60] : memref<1552x32xf32, #tpu.memory_space<vmem>>, vector<16x8xf32>
    %c1408 = arith.constant 1408 : index
    %c0_61 = arith.constant 0 : index
    %192 = vector.load %arg2[%c1408, %c0_61] : memref<1552x32xf32, #tpu.memory_space<vmem>>, vector<8x16xf32>
    %cst_62 = arith.constant dense<0.000000e+00> : vector<16x16xf32>
    %193 = tpu.matmul %191, %159, %cst_62 {dimension_numbers = #tpu.dot_dimension_numbers<[1], [0], [0], [1], [0, 0, 1, 1], [], []>} : vector<16x8xf32>, vector<8x16xf32>, vector<16x16xf32> -> vector<16x16xf32>
    %194 = arith.mulf %191, %191 : vector<16x8xf32>
    %cst_63 = arith.constant dense<0.000000e+00> : vector<16xf32>
    %195 = vector.multi_reduction <add>, %194, %cst_63 [1] : vector<16x8xf32> to vector<16xf32>
    %196 = vector.shape_cast %195 : vector<16xf32> to vector<16x1xf32>
    %cst_64 = arith.constant 2.000000e+00 : f32
    %197 = vector.broadcast %cst_64 : f32 to vector<16x16xf32>
    %198 = arith.mulf %197, %193 : vector<16x16xf32>
    %199 = vector.broadcast %196 : vector<16x1xf32> to vector<16x16xf32>
    %200 = arith.subf %199, %198 : vector<16x16xf32>
    %cst_65 = arith.constant dense<0x7F800000> : vector<16xf32>
    %201 = vector.multi_reduction <minimumf>, %200, %cst_65 [0] : vector<16x16xf32> to vector<16xf32>
    %202 = vector.shape_cast %201 : vector<16xf32> to vector<1x16xf32>
    %203 = vector.broadcast %202 : vector<1x16xf32> to vector<16x16xf32>
    %204 = arith.cmpf ole, %200, %203 : vector<16x16xf32>
    %c16_i32_66 = arith.constant 16 : i32
    %205 = vector.shape_cast %160 : vector<16x1xi32> to vector<16x1xi32>
    %206 = vector.broadcast %205 : vector<16x1xi32> to vector<16x16xi32>
    %207 = vector.broadcast %c16_i32_66 : i32 to vector<16x16xi32>
    %208 = arith.select %204, %206, %207 : vector<16x16xi1>, vector<16x16xi32>
    %cst_67 = arith.constant dense<2147483647> : vector<16xi32>
    %209 = vector.multi_reduction <minsi>, %208, %cst_67 [0] : vector<16x16xi32> to vector<16xi32>
    %210 = vector.shape_cast %209 : vector<16xi32> to vector<1x16xi32>
    %211 = vector.broadcast %160 : vector<16x1xi32> to vector<16x16xi32>
    %212 = vector.broadcast %210 : vector<1x16xi32> to vector<16x16xi32>
    %213 = arith.cmpi eq, %211, %212 : vector<16x16xi32>
    %214 = arith.extui %213 : vector<16x16xi1> to vector<16x16xi32>
    %215 = arith.sitofp %214 : vector<16x16xi32> to vector<16x16xf32>
    %cst_68 = arith.constant dense<0.000000e+00> : vector<8x16xf32>
    %216 = tpu.matmul %192, %215, %cst_68 {dimension_numbers = #tpu.dot_dimension_numbers<[1], [0], [0], [1], [0, 0, 1, 1], [], []>} : vector<8x16xf32>, vector<16x16xf32>, vector<8x16xf32> -> vector<8x16xf32>
    %cst_69 = arith.constant dense<0.000000e+00> : vector<16xf32>
    %217 = vector.multi_reduction <add>, %215, %cst_69 [1] : vector<16x16xf32> to vector<16xf32>
    %218 = vector.shape_cast %217 : vector<16xf32> to vector<16x1xf32>
    %cst_70 = arith.constant 6.250000e-02 : f32
    %219 = vector.broadcast %cst_70 : f32 to vector<16x1xf32>
    %220 = arith.mulf %218, %219 : vector<16x1xf32>
    %221 = arith.subf %141, %186 : vector<8x8xf32>
    %222 = arith.mulf %221, %221 : vector<8x8xf32>
    %223 = vector.shape_cast %222 : vector<8x8xf32> to vector<1x8x8xf32>
    %cst_71 = arith.constant dense<0.000000e+00> : vector<1xf32>
    %224 = vector.multi_reduction <add>, %223, %cst_71 [1, 2] : vector<1x8x8xf32> to vector<1xf32>
    %225 = vector.shape_cast %224 : vector<1xf32> to vector<1x1x1xf32>
    %226 = vector.extract %225[0, 0, 0] : f32 from vector<1x1x1xf32>
    %227 = vector.broadcast %226 : f32 to vector<1x1xf32>
    %cst_72 = arith.constant 1.562500e-02 : f32
    %228 = vector.broadcast %cst_72 : f32 to vector<1x1xf32>
    %229 = arith.mulf %227, %228 : vector<1x1xf32>
    %230 = arith.subf %159, %216 : vector<8x16xf32>
    %231 = arith.mulf %230, %230 : vector<8x16xf32>
    %232 = vector.shape_cast %231 : vector<8x16xf32> to vector<1x8x16xf32>
    %cst_73 = arith.constant dense<0.000000e+00> : vector<1xf32>
    %233 = vector.multi_reduction <add>, %232, %cst_73 [1, 2] : vector<1x8x16xf32> to vector<1xf32>
    %234 = vector.shape_cast %233 : vector<1xf32> to vector<1x1x1xf32>
    %235 = vector.extract %234[0, 0, 0] : f32 from vector<1x1x1xf32>
    %236 = vector.broadcast %235 : f32 to vector<1x1xf32>
    %cst_74 = arith.constant 7.812500e-03 : f32
    %237 = vector.broadcast %cst_74 : f32 to vector<1x1xf32>
    %238 = arith.mulf %236, %237 : vector<1x1xf32>
    %239 = arith.addf %229, %238 : vector<1x1xf32>
    %cst_75 = arith.constant 1.000000e-10 : f32
    %240 = vector.broadcast %cst_75 : f32 to vector<16x1xf32>
    %241 = arith.addf %190, %240 : vector<16x1xf32>
    %242 = math.log %241 : vector<16x1xf32>
    %243 = arith.mulf %190, %242 : vector<16x1xf32>
    %244 = vector.shape_cast %243 : vector<16x1xf32> to vector<1x16x1xf32>
    %cst_76 = arith.constant dense<0.000000e+00> : vector<1xf32>
    %245 = vector.multi_reduction <add>, %244, %cst_76 [1, 2] : vector<1x16x1xf32> to vector<1xf32>
    %246 = vector.shape_cast %245 : vector<1xf32> to vector<1x1x1xf32>
    %247 = vector.extract %246[0, 0, 0] : f32 from vector<1x1x1xf32>
    %248 = vector.broadcast %247 : f32 to vector<1x1xf32>
    %cst_77 = arith.constant 0.000000e+00 : f32
    %249 = vector.broadcast %cst_77 : f32 to vector<1x1xf32>
    %250 = arith.subf %249, %248 : vector<1x1xf32>
    %251 = math.exp %250 : vector<1x1xf32>
    %cst_78 = arith.constant 1.000000e-10 : f32
    %252 = vector.broadcast %cst_78 : f32 to vector<16x1xf32>
    %253 = arith.addf %220, %252 : vector<16x1xf32>
    %254 = math.log %253 : vector<16x1xf32>
    %255 = arith.mulf %220, %254 : vector<16x1xf32>
    %256 = vector.shape_cast %255 : vector<16x1xf32> to vector<1x16x1xf32>
    %cst_79 = arith.constant dense<0.000000e+00> : vector<1xf32>
    %257 = vector.multi_reduction <add>, %256, %cst_79 [1, 2] : vector<1x16x1xf32> to vector<1xf32>
    %258 = vector.shape_cast %257 : vector<1xf32> to vector<1x1x1xf32>
    %259 = vector.extract %258[0, 0, 0] : f32 from vector<1x1x1xf32>
    %260 = vector.broadcast %259 : f32 to vector<1x1xf32>
    %cst_80 = arith.constant 0.000000e+00 : f32
    %261 = vector.broadcast %cst_80 : f32 to vector<1x1xf32>
    %262 = arith.subf %261, %260 : vector<1x1xf32>
    %263 = math.exp %262 : vector<1x1xf32>
    %c1528 = arith.constant 1528 : index
    %c0_81 = arith.constant 0 : index
    %264 = vector.load %arg2[%c1528, %c0_81] : memref<1552x32xf32, #tpu.memory_space<vmem>>, vector<8x16xf32>
    %c1536 = arith.constant 1536 : index
    %c0_82 = arith.constant 0 : index
    %265 = vector.load %arg2[%c1536, %c0_82] : memref<1552x32xf32, #tpu.memory_space<vmem>>, vector<16x32xf32>
    %cst_83 = arith.constant dense<0.000000e+00> : vector<8x16xf32>
    %266 = tpu.matmul %186, %264, %cst_83 {dimension_numbers = #tpu.dot_dimension_numbers<[1], [0], [0], [1], [0, 0, 1, 1], [], []>} : vector<8x8xf32>, vector<8x16xf32>, vector<8x16xf32> -> vector<8x16xf32>
    %267 = vector.extract_strided_slice %12 {offsets = [0, 0], sizes = [8, 1], strides = [1, 1]} : vector<8x2xf32> to vector<8x1xf32>
    %268 = vector.shape_cast %267 : vector<8x1xf32> to vector<8x1xf32>
    %269 = vector.broadcast %268 : vector<8x1xf32> to vector<8x8xf32>
    %270 = vector.extract_strided_slice %12 {offsets = [0, 1], sizes = [8, 1], strides = [1, 1]} : vector<8x2xf32> to vector<8x1xf32>
    %271 = vector.shape_cast %270 : vector<8x1xf32> to vector<8x1xf32>
    %272 = vector.broadcast %271 : vector<8x1xf32> to vector<8x8xf32>
    %273 = tpu.concatenate %269, %272 in 1 : vector<8x8xf32>, vector<8x8xf32> -> vector<8x16xf32>
    %c528 = arith.constant 528 : index
    %c0_84 = arith.constant 0 : index
    %274 = vector.load %arg2[%c528, %c0_84] : memref<1552x32xf32, #tpu.memory_space<vmem>>, vector<96x8xf32>
    %c624 = arith.constant 624 : index
    %c0_85 = arith.constant 0 : index
    %275 = vector.load %arg2[%c624, %c0_85] : memref<1552x32xf32, #tpu.memory_space<vmem>>, vector<96x8xf32>
    %c720 = arith.constant 720 : index
    %c0_86 = arith.constant 0 : index
    %276 = vector.load %arg2[%c720, %c0_86] : memref<1552x32xf32, #tpu.memory_space<vmem>>, vector<96x16xf32>
    %c816 = arith.constant 816 : index
    %c0_87 = arith.constant 0 : index
    %277 = vector.load %arg2[%c816, %c0_87] : memref<1552x32xf32, #tpu.memory_space<vmem>>, vector<32x1xf32>
    %cst_88 = arith.constant 0.000000e+00 : f32
    %278 = vector.broadcast %cst_88 : f32 to vector<8x1xf32>
    %cst_89 = arith.constant 0.000000e+00 : f32
    %279 = vector.broadcast %cst_89 : f32 to vector<8x2xf32>
    %280 = vector.extract_strided_slice %266 {offsets = [0, 0], sizes = [8, 8], strides = [1, 1]} : vector<8x16xf32> to vector<8x8xf32>
    %281 = vector.extract_strided_slice %266 {offsets = [0, 8], sizes = [8, 8], strides = [1, 1]} : vector<8x16xf32> to vector<8x8xf32>
    %282 = tpu.concatenate %278, %280, %279, %281, %278 in 1 : vector<8x1xf32>, vector<8x8xf32>, vector<8x2xf32>, vector<8x8xf32>, vector<8x1xf32> -> vector<8x20xf32>
    %cst_90 = arith.constant dense<0.000000e+00> : vector<96x20xf32>
    %283 = tpu.matmul %274, %282, %cst_90 {dimension_numbers = #tpu.dot_dimension_numbers<[1], [0], [0], [1], [0, 0, 1, 1], [], []>} : vector<96x8xf32>, vector<8x20xf32>, vector<96x20xf32> -> vector<96x20xf32>
    %284 = vector.extract_strided_slice %283 {offsets = [0, 0], sizes = [32, 18], strides = [1, 1]} : vector<96x20xf32> to vector<32x18xf32>
    %285 = vector.extract_strided_slice %283 {offsets = [32, 1], sizes = [32, 18], strides = [1, 1]} : vector<96x20xf32> to vector<32x18xf32>
    %286 = arith.addf %284, %285 : vector<32x18xf32>
    %287 = vector.extract_strided_slice %283 {offsets = [64, 2], sizes = [32, 18], strides = [1, 1]} : vector<96x20xf32> to vector<32x18xf32>
    %288 = arith.addf %286, %287 : vector<32x18xf32>
    %cst_91 = arith.constant 0.000000e+00 : f32
    %289 = vector.broadcast %cst_91 : f32 to vector<8x1xf32>
    %cst_92 = arith.constant 0.000000e+00 : f32
    %290 = vector.broadcast %cst_92 : f32 to vector<8x2xf32>
    %291 = vector.extract_strided_slice %273 {offsets = [0, 0], sizes = [8, 8], strides = [1, 1]} : vector<8x16xf32> to vector<8x8xf32>
    %292 = vector.extract_strided_slice %273 {offsets = [0, 8], sizes = [8, 8], strides = [1, 1]} : vector<8x16xf32> to vector<8x8xf32>
    %293 = tpu.concatenate %289, %291, %290, %292, %289 in 1 : vector<8x1xf32>, vector<8x8xf32>, vector<8x2xf32>, vector<8x8xf32>, vector<8x1xf32> -> vector<8x20xf32>
    %cst_93 = arith.constant dense<0.000000e+00> : vector<96x20xf32>
    %294 = tpu.matmul %275, %293, %cst_93 {dimension_numbers = #tpu.dot_dimension_numbers<[1], [0], [0], [1], [0, 0, 1, 1], [], []>} : vector<96x8xf32>, vector<8x20xf32>, vector<96x20xf32> -> vector<96x20xf32>
    %295 = vector.extract_strided_slice %294 {offsets = [0, 0], sizes = [32, 18], strides = [1, 1]} : vector<96x20xf32> to vector<32x18xf32>
    %296 = vector.extract_strided_slice %294 {offsets = [32, 1], sizes = [32, 18], strides = [1, 1]} : vector<96x20xf32> to vector<32x18xf32>
    %297 = arith.addf %295, %296 : vector<32x18xf32>
    %298 = vector.extract_strided_slice %294 {offsets = [64, 2], sizes = [32, 18], strides = [1, 1]} : vector<96x20xf32> to vector<32x18xf32>
    %299 = arith.addf %297, %298 : vector<32x18xf32>
    %300 = arith.addf %288, %299 : vector<32x18xf32>
    %cst_94 = arith.constant 0.000000e+00 : f32
    %301 = vector.broadcast %cst_94 : f32 to vector<16x1xf32>
    %cst_95 = arith.constant 0.000000e+00 : f32
    %302 = vector.broadcast %cst_95 : f32 to vector<16x2xf32>
    %303 = vector.extract_strided_slice %63 {offsets = [0, 0], sizes = [16, 8], strides = [1, 1]} : vector<16x16xf32> to vector<16x8xf32>
    %304 = vector.extract_strided_slice %63 {offsets = [0, 8], sizes = [16, 8], strides = [1, 1]} : vector<16x16xf32> to vector<16x8xf32>
    %305 = tpu.concatenate %301, %303, %302, %304, %301 in 1 : vector<16x1xf32>, vector<16x8xf32>, vector<16x2xf32>, vector<16x8xf32>, vector<16x1xf32> -> vector<16x20xf32>
    %cst_96 = arith.constant dense<0.000000e+00> : vector<96x20xf32>
    %306 = tpu.matmul %276, %305, %cst_96 {dimension_numbers = #tpu.dot_dimension_numbers<[1], [0], [0], [1], [0, 0, 1, 1], [], []>} : vector<96x16xf32>, vector<16x20xf32>, vector<96x20xf32> -> vector<96x20xf32>
    %307 = vector.extract_strided_slice %306 {offsets = [0, 0], sizes = [32, 18], strides = [1, 1]} : vector<96x20xf32> to vector<32x18xf32>
    %308 = vector.extract_strided_slice %306 {offsets = [32, 1], sizes = [32, 18], strides = [1, 1]} : vector<96x20xf32> to vector<32x18xf32>
    %309 = arith.addf %307, %308 : vector<32x18xf32>
    %310 = vector.extract_strided_slice %306 {offsets = [64, 2], sizes = [32, 18], strides = [1, 1]} : vector<96x20xf32> to vector<32x18xf32>
    %311 = arith.addf %309, %310 : vector<32x18xf32>
    %312 = arith.addf %300, %311 : vector<32x18xf32>
    %313 = vector.broadcast %277 : vector<32x1xf32> to vector<32x18xf32>
    %314 = arith.addf %312, %313 : vector<32x18xf32>
    %315 = vector.extract_strided_slice %314 {offsets = [0, 0], sizes = [32, 8], strides = [1, 1]} : vector<32x18xf32> to vector<32x8xf32>
    %316 = vector.extract_strided_slice %314 {offsets = [0, 10], sizes = [32, 8], strides = [1, 1]} : vector<32x18xf32> to vector<32x8xf32>
    %317 = tpu.concatenate %315, %316 in 1 : vector<32x8xf32>, vector<32x8xf32> -> vector<32x16xf32>
    %cst_97 = arith.constant 0.000000e+00 : f32
    %318 = vector.broadcast %cst_97 : f32 to vector<32x16xf32>
    %319 = arith.maximumf %317, %318 : vector<32x16xf32>
    %c848 = arith.constant 848 : index
    %c0_98 = arith.constant 0 : index
    %320 = vector.load %arg2[%c848, %c0_98] : memref<1552x32xf32, #tpu.memory_space<vmem>>, vector<48x32xf32>
    %c896 = arith.constant 896 : index
    %c0_99 = arith.constant 0 : index
    %321 = vector.load %arg2[%c896, %c0_99] : memref<1552x32xf32, #tpu.memory_space<vmem>>, vector<16x1xf32>
    %cst_100 = arith.constant 0.000000e+00 : f32
    %322 = vector.broadcast %cst_100 : f32 to vector<32x1xf32>
    %cst_101 = arith.constant 0.000000e+00 : f32
    %323 = vector.broadcast %cst_101 : f32 to vector<32x2xf32>
    %324 = vector.extract_strided_slice %319 {offsets = [0, 0], sizes = [32, 8], strides = [1, 1]} : vector<32x16xf32> to vector<32x8xf32>
    %325 = vector.extract_strided_slice %319 {offsets = [0, 8], sizes = [32, 8], strides = [1, 1]} : vector<32x16xf32> to vector<32x8xf32>
    %326 = tpu.concatenate %322, %324, %323, %325, %322 in 1 : vector<32x1xf32>, vector<32x8xf32>, vector<32x2xf32>, vector<32x8xf32>, vector<32x1xf32> -> vector<32x20xf32>
    %cst_102 = arith.constant dense<0.000000e+00> : vector<48x20xf32>
    %327 = tpu.matmul %320, %326, %cst_102 {dimension_numbers = #tpu.dot_dimension_numbers<[1], [0], [0], [1], [0, 0, 1, 1], [], []>} : vector<48x32xf32>, vector<32x20xf32>, vector<48x20xf32> -> vector<48x20xf32>
    %328 = vector.extract_strided_slice %327 {offsets = [0, 0], sizes = [16, 18], strides = [1, 1]} : vector<48x20xf32> to vector<16x18xf32>
    %329 = vector.extract_strided_slice %327 {offsets = [16, 1], sizes = [16, 18], strides = [1, 1]} : vector<48x20xf32> to vector<16x18xf32>
    %330 = arith.addf %328, %329 : vector<16x18xf32>
    %331 = vector.extract_strided_slice %327 {offsets = [32, 2], sizes = [16, 18], strides = [1, 1]} : vector<48x20xf32> to vector<16x18xf32>
    %332 = arith.addf %330, %331 : vector<16x18xf32>
    %333 = vector.broadcast %321 : vector<16x1xf32> to vector<16x18xf32>
    %334 = arith.addf %332, %333 : vector<16x18xf32>
    %335 = vector.extract_strided_slice %334 {offsets = [0, 0], sizes = [16, 8], strides = [1, 1]} : vector<16x18xf32> to vector<16x8xf32>
    %336 = vector.extract_strided_slice %334 {offsets = [0, 10], sizes = [16, 8], strides = [1, 1]} : vector<16x18xf32> to vector<16x8xf32>
    %337 = tpu.concatenate %335, %336 in 1 : vector<16x8xf32>, vector<16x8xf32> -> vector<16x16xf32>
    %cst_103 = arith.constant dense<0.000000e+00> : vector<8x32xf32>
    %338 = tpu.matmul %216, %265, %cst_103 {dimension_numbers = #tpu.dot_dimension_numbers<[1], [0], [0], [1], [0, 0, 1, 1], [], []>} : vector<8x16xf32>, vector<16x32xf32>, vector<8x32xf32> -> vector<8x32xf32>
    %cst_104 = arith.constant dense<0.000000e+00> : vector<16x32xf32>
    %339 = tpu.matmul %337, %265, %cst_104 {dimension_numbers = #tpu.dot_dimension_numbers<[1], [0], [0], [1], [0, 0, 1, 1], [], []>} : vector<16x16xf32>, vector<16x32xf32>, vector<16x32xf32> -> vector<16x32xf32>
    %340 = vector.extract_strided_slice %12 {offsets = [0, 0], sizes = [8, 1], strides = [1, 1]} : vector<8x2xf32> to vector<8x1xf32>
    %341 = vector.shape_cast %340 : vector<8x1xf32> to vector<8x1xf32>
    %342 = vector.broadcast %341 : vector<8x1xf32> to vector<8x16xf32>
    %343 = vector.extract_strided_slice %12 {offsets = [0, 1], sizes = [8, 1], strides = [1, 1]} : vector<8x2xf32> to vector<8x1xf32>
    %344 = vector.shape_cast %343 : vector<8x1xf32> to vector<8x1xf32>
    %345 = vector.broadcast %344 : vector<8x1xf32> to vector<8x16xf32>
    %346 = tpu.concatenate %342, %345 in 1 : vector<8x16xf32>, vector<8x16xf32> -> vector<8x32xf32>
    %c912 = arith.constant 912 : index
    %c0_105 = arith.constant 0 : index
    %347 = vector.load %arg2[%c912, %c0_105] : memref<1552x32xf32, #tpu.memory_space<vmem>>, vector<96x8xf32>
    %c1008 = arith.constant 1008 : index
    %c0_106 = arith.constant 0 : index
    %348 = vector.load %arg2[%c1008, %c0_106] : memref<1552x32xf32, #tpu.memory_space<vmem>>, vector<96x16xf32>
    %c1104 = arith.constant 1104 : index
    %c0_107 = arith.constant 0 : index
    %349 = vector.load %arg2[%c1104, %c0_107] : memref<1552x32xf32, #tpu.memory_space<vmem>>, vector<96x8xf32>
    %c1200 = arith.constant 1200 : index
    %c0_108 = arith.constant 0 : index
    %350 = vector.load %arg2[%c1200, %c0_108] : memref<1552x32xf32, #tpu.memory_space<vmem>>, vector<96x16xf32>
    %c1296 = arith.constant 1296 : index
    %c0_109 = arith.constant 0 : index
    %351 = vector.load %arg2[%c1296, %c0_109] : memref<1552x32xf32, #tpu.memory_space<vmem>>, vector<32x1xf32>
    %cst_110 = arith.constant 0.000000e+00 : f32
    %352 = vector.broadcast %cst_110 : f32 to vector<8x1xf32>
    %cst_111 = arith.constant 0.000000e+00 : f32
    %353 = vector.broadcast %cst_111 : f32 to vector<8x2xf32>
    %354 = vector.extract_strided_slice %338 {offsets = [0, 0], sizes = [8, 16], strides = [1, 1]} : vector<8x32xf32> to vector<8x16xf32>
    %355 = vector.extract_strided_slice %338 {offsets = [0, 16], sizes = [8, 16], strides = [1, 1]} : vector<8x32xf32> to vector<8x16xf32>
    %356 = tpu.concatenate %352, %354, %353, %355, %352 in 1 : vector<8x1xf32>, vector<8x16xf32>, vector<8x2xf32>, vector<8x16xf32>, vector<8x1xf32> -> vector<8x36xf32>
    %cst_112 = arith.constant dense<0.000000e+00> : vector<96x36xf32>
    %357 = tpu.matmul %347, %356, %cst_112 {dimension_numbers = #tpu.dot_dimension_numbers<[1], [0], [0], [1], [0, 0, 1, 1], [], []>} : vector<96x8xf32>, vector<8x36xf32>, vector<96x36xf32> -> vector<96x36xf32>
    %358 = vector.extract_strided_slice %357 {offsets = [0, 0], sizes = [32, 34], strides = [1, 1]} : vector<96x36xf32> to vector<32x34xf32>
    %359 = vector.extract_strided_slice %357 {offsets = [32, 1], sizes = [32, 34], strides = [1, 1]} : vector<96x36xf32> to vector<32x34xf32>
    %360 = arith.addf %358, %359 : vector<32x34xf32>
    %361 = vector.extract_strided_slice %357 {offsets = [64, 2], sizes = [32, 34], strides = [1, 1]} : vector<96x36xf32> to vector<32x34xf32>
    %362 = arith.addf %360, %361 : vector<32x34xf32>
    %cst_113 = arith.constant 0.000000e+00 : f32
    %363 = vector.broadcast %cst_113 : f32 to vector<16x1xf32>
    %cst_114 = arith.constant 0.000000e+00 : f32
    %364 = vector.broadcast %cst_114 : f32 to vector<16x2xf32>
    %365 = vector.extract_strided_slice %339 {offsets = [0, 0], sizes = [16, 16], strides = [1, 1]} : vector<16x32xf32> to vector<16x16xf32>
    %366 = vector.extract_strided_slice %339 {offsets = [0, 16], sizes = [16, 16], strides = [1, 1]} : vector<16x32xf32> to vector<16x16xf32>
    %367 = tpu.concatenate %363, %365, %364, %366, %363 in 1 : vector<16x1xf32>, vector<16x16xf32>, vector<16x2xf32>, vector<16x16xf32>, vector<16x1xf32> -> vector<16x36xf32>
    %cst_115 = arith.constant dense<0.000000e+00> : vector<96x36xf32>
    %368 = tpu.matmul %348, %367, %cst_115 {dimension_numbers = #tpu.dot_dimension_numbers<[1], [0], [0], [1], [0, 0, 1, 1], [], []>} : vector<96x16xf32>, vector<16x36xf32>, vector<96x36xf32> -> vector<96x36xf32>
    %369 = vector.extract_strided_slice %368 {offsets = [0, 0], sizes = [32, 34], strides = [1, 1]} : vector<96x36xf32> to vector<32x34xf32>
    %370 = vector.extract_strided_slice %368 {offsets = [32, 1], sizes = [32, 34], strides = [1, 1]} : vector<96x36xf32> to vector<32x34xf32>
    %371 = arith.addf %369, %370 : vector<32x34xf32>
    %372 = vector.extract_strided_slice %368 {offsets = [64, 2], sizes = [32, 34], strides = [1, 1]} : vector<96x36xf32> to vector<32x34xf32>
    %373 = arith.addf %371, %372 : vector<32x34xf32>
    %374 = arith.addf %362, %373 : vector<32x34xf32>
    %cst_116 = arith.constant 0.000000e+00 : f32
    %375 = vector.broadcast %cst_116 : f32 to vector<8x1xf32>
    %cst_117 = arith.constant 0.000000e+00 : f32
    %376 = vector.broadcast %cst_117 : f32 to vector<8x2xf32>
    %377 = vector.extract_strided_slice %346 {offsets = [0, 0], sizes = [8, 16], strides = [1, 1]} : vector<8x32xf32> to vector<8x16xf32>
    %378 = vector.extract_strided_slice %346 {offsets = [0, 16], sizes = [8, 16], strides = [1, 1]} : vector<8x32xf32> to vector<8x16xf32>
    %379 = tpu.concatenate %375, %377, %376, %378, %375 in 1 : vector<8x1xf32>, vector<8x16xf32>, vector<8x2xf32>, vector<8x16xf32>, vector<8x1xf32> -> vector<8x36xf32>
    %cst_118 = arith.constant dense<0.000000e+00> : vector<96x36xf32>
    %380 = tpu.matmul %349, %379, %cst_118 {dimension_numbers = #tpu.dot_dimension_numbers<[1], [0], [0], [1], [0, 0, 1, 1], [], []>} : vector<96x8xf32>, vector<8x36xf32>, vector<96x36xf32> -> vector<96x36xf32>
    %381 = vector.extract_strided_slice %380 {offsets = [0, 0], sizes = [32, 34], strides = [1, 1]} : vector<96x36xf32> to vector<32x34xf32>
    %382 = vector.extract_strided_slice %380 {offsets = [32, 1], sizes = [32, 34], strides = [1, 1]} : vector<96x36xf32> to vector<32x34xf32>
    %383 = arith.addf %381, %382 : vector<32x34xf32>
    %384 = vector.extract_strided_slice %380 {offsets = [64, 2], sizes = [32, 34], strides = [1, 1]} : vector<96x36xf32> to vector<32x34xf32>
    %385 = arith.addf %383, %384 : vector<32x34xf32>
    %386 = arith.addf %374, %385 : vector<32x34xf32>
    %cst_119 = arith.constant 0.000000e+00 : f32
    %387 = vector.broadcast %cst_119 : f32 to vector<16x1xf32>
    %cst_120 = arith.constant 0.000000e+00 : f32
    %388 = vector.broadcast %cst_120 : f32 to vector<16x2xf32>
    %389 = vector.extract_strided_slice %36 {offsets = [0, 0], sizes = [16, 16], strides = [1, 1]} : vector<16x32xf32> to vector<16x16xf32>
    %390 = vector.extract_strided_slice %36 {offsets = [0, 16], sizes = [16, 16], strides = [1, 1]} : vector<16x32xf32> to vector<16x16xf32>
    %391 = tpu.concatenate %387, %389, %388, %390, %387 in 1 : vector<16x1xf32>, vector<16x16xf32>, vector<16x2xf32>, vector<16x16xf32>, vector<16x1xf32> -> vector<16x36xf32>
    %cst_121 = arith.constant dense<0.000000e+00> : vector<96x36xf32>
    %392 = tpu.matmul %350, %391, %cst_121 {dimension_numbers = #tpu.dot_dimension_numbers<[1], [0], [0], [1], [0, 0, 1, 1], [], []>} : vector<96x16xf32>, vector<16x36xf32>, vector<96x36xf32> -> vector<96x36xf32>
    %393 = vector.extract_strided_slice %392 {offsets = [0, 0], sizes = [32, 34], strides = [1, 1]} : vector<96x36xf32> to vector<32x34xf32>
    %394 = vector.extract_strided_slice %392 {offsets = [32, 1], sizes = [32, 34], strides = [1, 1]} : vector<96x36xf32> to vector<32x34xf32>
    %395 = arith.addf %393, %394 : vector<32x34xf32>
    %396 = vector.extract_strided_slice %392 {offsets = [64, 2], sizes = [32, 34], strides = [1, 1]} : vector<96x36xf32> to vector<32x34xf32>
    %397 = arith.addf %395, %396 : vector<32x34xf32>
    %398 = arith.addf %386, %397 : vector<32x34xf32>
    %399 = vector.broadcast %351 : vector<32x1xf32> to vector<32x34xf32>
    %400 = arith.addf %398, %399 : vector<32x34xf32>
    %401 = vector.extract_strided_slice %400 {offsets = [0, 0], sizes = [32, 16], strides = [1, 1]} : vector<32x34xf32> to vector<32x16xf32>
    %402 = vector.extract_strided_slice %400 {offsets = [0, 18], sizes = [32, 16], strides = [1, 1]} : vector<32x34xf32> to vector<32x16xf32>
    %403 = tpu.concatenate %401, %402 in 1 : vector<32x16xf32>, vector<32x16xf32> -> vector<32x32xf32>
    %cst_122 = arith.constant 0.000000e+00 : f32
    %404 = vector.broadcast %cst_122 : f32 to vector<32x32xf32>
    %405 = arith.maximumf %403, %404 : vector<32x32xf32>
    %c1328 = arith.constant 1328 : index
    %c0_123 = arith.constant 0 : index
    %406 = vector.load %arg2[%c1328, %c0_123] : memref<1552x32xf32, #tpu.memory_space<vmem>>, vector<24x32xf32>
    %c1352 = arith.constant 1352 : index
    %c0_124 = arith.constant 0 : index
    %407 = vector.load %arg2[%c1352, %c0_124] : memref<1552x32xf32, #tpu.memory_space<vmem>>, vector<8x1xf32>
    %cst_125 = arith.constant 0.000000e+00 : f32
    %408 = vector.broadcast %cst_125 : f32 to vector<32x1xf32>
    %cst_126 = arith.constant 0.000000e+00 : f32
    %409 = vector.broadcast %cst_126 : f32 to vector<32x2xf32>
    %410 = vector.extract_strided_slice %405 {offsets = [0, 0], sizes = [32, 16], strides = [1, 1]} : vector<32x32xf32> to vector<32x16xf32>
    %411 = vector.extract_strided_slice %405 {offsets = [0, 16], sizes = [32, 16], strides = [1, 1]} : vector<32x32xf32> to vector<32x16xf32>
    %412 = tpu.concatenate %408, %410, %409, %411, %408 in 1 : vector<32x1xf32>, vector<32x16xf32>, vector<32x2xf32>, vector<32x16xf32>, vector<32x1xf32> -> vector<32x36xf32>
    %cst_127 = arith.constant dense<0.000000e+00> : vector<24x36xf32>
    %413 = tpu.matmul %406, %412, %cst_127 {dimension_numbers = #tpu.dot_dimension_numbers<[1], [0], [0], [1], [0, 0, 1, 1], [], []>} : vector<24x32xf32>, vector<32x36xf32>, vector<24x36xf32> -> vector<24x36xf32>
    %414 = vector.extract_strided_slice %413 {offsets = [0, 0], sizes = [8, 34], strides = [1, 1]} : vector<24x36xf32> to vector<8x34xf32>
    %415 = vector.extract_strided_slice %413 {offsets = [8, 1], sizes = [8, 34], strides = [1, 1]} : vector<24x36xf32> to vector<8x34xf32>
    %416 = arith.addf %414, %415 : vector<8x34xf32>
    %417 = vector.extract_strided_slice %413 {offsets = [16, 2], sizes = [8, 34], strides = [1, 1]} : vector<24x36xf32> to vector<8x34xf32>
    %418 = arith.addf %416, %417 : vector<8x34xf32>
    %419 = vector.broadcast %407 : vector<8x1xf32> to vector<8x34xf32>
    %420 = arith.addf %418, %419 : vector<8x34xf32>
    %421 = vector.extract_strided_slice %420 {offsets = [0, 0], sizes = [8, 16], strides = [1, 1]} : vector<8x34xf32> to vector<8x16xf32>
    %422 = vector.extract_strided_slice %420 {offsets = [0, 18], sizes = [8, 16], strides = [1, 1]} : vector<8x34xf32> to vector<8x16xf32>
    %423 = tpu.concatenate %421, %422 in 1 : vector<8x16xf32>, vector<8x16xf32> -> vector<8x32xf32>
    %424 = arith.subf %6, %423 : vector<8x32xf32>
    %425 = arith.mulf %424, %424 : vector<8x32xf32>
    %426 = vector.shape_cast %425 : vector<8x32xf32> to vector<1x8x32xf32>
    %cst_128 = arith.constant dense<0.000000e+00> : vector<1xf32>
    %427 = vector.multi_reduction <add>, %426, %cst_128 [1, 2] : vector<1x8x32xf32> to vector<1xf32>
    %428 = vector.shape_cast %427 : vector<1xf32> to vector<1x1x1xf32>
    %429 = vector.extract %428[0, 0, 0] : f32 from vector<1x1x1xf32>
    %430 = vector.broadcast %429 : f32 to vector<1x1xf32>
    %cst_129 = arith.constant 3.906250e-03 : f32
    %431 = vector.broadcast %cst_129 : f32 to vector<1x1xf32>
    %432 = arith.mulf %430, %431 : vector<1x1xf32>
    %c1416 = arith.constant 1416 : index
    %c0_130 = arith.constant 0 : index
    %433 = vector.load %arg2[%c1416, %c0_130] : memref<1552x32xf32, #tpu.memory_space<vmem>>, vector<8x8xf32>
    %cst_131 = arith.constant dense<0.000000e+00> : vector<8x32xf32>
    %434 = tpu.matmul %433, %6, %cst_131 {dimension_numbers = #tpu.dot_dimension_numbers<[1], [0], [0], [1], [0, 0, 1, 1], [], []>} : vector<8x8xf32>, vector<8x32xf32>, vector<8x32xf32> -> vector<8x32xf32>
    %cst_132 = arith.constant dense<0.000000e+00> : vector<8x32xf32>
    %435 = tpu.matmul %433, %423, %cst_132 {dimension_numbers = #tpu.dot_dimension_numbers<[1], [0], [0], [1], [0, 0, 1, 1], [], []>} : vector<8x8xf32>, vector<8x32xf32>, vector<8x32xf32> -> vector<8x32xf32>
    %436 = arith.subf %434, %435 : vector<8x32xf32>
    %437 = arith.mulf %436, %436 : vector<8x32xf32>
    %438 = vector.shape_cast %437 : vector<8x32xf32> to vector<1x8x32xf32>
    %cst_133 = arith.constant dense<0.000000e+00> : vector<1xf32>
    %439 = vector.multi_reduction <add>, %438, %cst_133 [1, 2] : vector<1x8x32xf32> to vector<1xf32>
    %440 = vector.shape_cast %439 : vector<1xf32> to vector<1x1x1xf32>
    %441 = vector.extract %440[0, 0, 0] : f32 from vector<1x1x1xf32>
    %442 = vector.broadcast %441 : f32 to vector<1x1xf32>
    %cst_134 = arith.constant 3.906250e-03 : f32
    %443 = vector.broadcast %cst_134 : f32 to vector<1x1xf32>
    %444 = arith.mulf %442, %443 : vector<1x1xf32>
    %445 = arith.addf %432, %239 : vector<1x1xf32>
    %cst_135 = arith.constant 2.500000e-01 : f32
    %446 = vector.broadcast %cst_135 : f32 to vector<1x1xf32>
    %447 = arith.mulf %446, %239 : vector<1x1xf32>
    %448 = arith.addf %445, %447 : vector<1x1xf32>
    %cst_136 = arith.constant 1.000000e-01 : f32
    %449 = vector.broadcast %cst_136 : f32 to vector<1x1xf32>
    %450 = arith.mulf %449, %444 : vector<1x1xf32>
    %451 = arith.addf %448, %450 : vector<1x1xf32>
    %cst_137 = arith.constant 0.000000e+00 : f32
    %452 = vector.broadcast %cst_137 : f32 to vector<1x1xf32>
    %453 = tpu.concatenate %451, %432, %444, %239, %239, %251, %263, %452 in 1 : vector<1x1xf32>, vector<1x1xf32>, vector<1x1xf32>, vector<1x1xf32>, vector<1x1xf32>, vector<1x1xf32>, vector<1x1xf32>, vector<1x1xf32> -> vector<1x8xf32>
    %c0_138 = arith.constant 0 : index
    %c0_139 = arith.constant 0 : index
    %454 = vector.load %arg3[%c0_138, %c0_139] : memref<1x8xf32, #tpu.memory_space<vmem>>, vector<1x8xf32>
    tpu.vector_store %arg3[%c0_138, %c0_139], %453 {strides = array<i32>} : memref<1x8xf32, #tpu.memory_space<vmem>>, vector<1x8xf32>,
    return
  }
}

</mosaic_0001>

<bundles_post_ra>
// kernel: forward.1
= control target key start
LH: loop header
LB: loop body
LE: loop exit
PB: predicated region body
PF: predicated region fallthrough
CT: control target
= control target key end

     0   :  { %v5538_v1 = vmov 0   ;;  %s5539_s16 = smov 16   ;;  %vm23_vm0 = vcmask 130048   ;;  %s5540_s25 = smov 6   ;;  %v188_v19 = vlaneseq  ;;  %vm6945_vm1 = vcmask 15360   ;;  %s6937_s0 = inlined_call_operand.vmem [shape: f32[2,9,16], index: 0, kind: input, shape index: {}]   ;;  %s6938_s2 = inlined_call_operand.vmem [shape: f32[1552,32], index: 2, kind: input, shape index: {}]   ;;  %s6939_s1 = inlined_call_operand.vmem [shape: f32[10,2], index: 1, kind: input, shape index: {}]   ;;  %s6940_s3 = inlined_call_operand.vmem [shape: f32[1,8], index: 3, kind: output, shape index: {}]  }
   0x1   :  { %v4709_v0 = vld [vmem:[%s6937_s0 + $0x18] sm:$0x1]  ;;  %5522 = vset.pattern.permute.xlu1 %v5538_v1  ;;  %5523 = vset.pattern.permute.xlu0 %v5538_v1  ;;  %v116_v3 = vld [vmem:[%s6938_s2 + $0x28] sm:$0xff]  ;;  %v113_v4 = vld [vmem:[%s6938_s2 + $0x10] sm:$0xff]  ;;  %s5541_s26 = smov 2   ;;  %vm132_vm2 = vcmask 146432  }
   0x2   :  { %v114_v2 = vld [vmem:[%s6938_s2 + $0x18] sm:$0xff]  ;;  %26 = vrot.lane.b32.xlu0 %v4709_v0, %s5539_s16  ;;  %v115_v5 = vld [vmem:[%s6938_s2 + $0x20] sm:$0xff]  ;;  %v15_v6 = vld [vmem:[%s6937_s0 + $0x8] sm:$0x1]  ;;  %v5622_v21 = vshrl.u32 %v188_v19, 7  ;;  %vm134_vm3 = vcmask 179200  }
   0x3   :  { %155 = vperm.xlu1 %5522, %v114_v2   ;;  %v117_v9 = vld [vmem:[%s6938_s2 + $0x30] sm:$0xff]  ;;  %v118_v10 = vld [vmem:[%s6938_s2 + $0x38] sm:$0xff]  ;;  %v119_v11 = vld [vmem:[%s6938_s2 + $0x40] sm:$0xff]  ;;  %vm136_vm4 = vcmask 310272   ;;  %s5542_s17 = smov 127   ;;  %s5543_s18 = smov 126  }
   0x4   :  { %v120_v12 = vld [vmem:[%s6938_s2 + $0x48] sm:$0xff]  ;;  %v111_v13 = vld [vmem:[%s6938_s2] sm:$0xff]  ;;  %v122_v15 = vld [vmem:[%s6938_s2 + $0x58] sm:$0xff]  ;;  %v190_v24 = vsub.s32 0, %v5622_v21  ;;  %s5544_s19 = smov 125   ;;  %s5545_s20 = smov 124  }
   0x5   :  { %v112_v14 = vld [vmem:[%s6938_s2 + $0x8] sm:$0xff]  ;;  %v121_v16 = vld [vmem:[%s6938_s2 + $0x50] sm:$0xff]  ;;  %s5546_s23 = smov 3   ;;  %s5547_s24 = smov 9   ;;  %vm6944_vm5 = vcmask 23552   ;;  %vm304_vm6 = vcmask 154624  }
   0x6   :  { %150 = vperm.xlu0 %5523, %v113_v4   ;;  %v264_v4 = vld [vmem:[%s6938_s2 + $0x60] sm:$0xff]  ;;  %vm307_vm7 = vcmask 203776   ;;  %vm310_vm8 = vcmask 334848   ;;  %vm37_vm9 = vcmask 1041408   ;;  %vm5549_vm10 = vmmov 0   ;;  %s5550_s30 = smov 123  }
   0x7   :  { %165 = vperm.xlu1 %5522, %v116_v3   ;;  %5131 = vmatprep.mubr.msk.f32.mxu1 %vm23_vm0, %v264_v4  ;;  %vm33_vm11 = vcmask 80896   ;;  %vm595_vm12 = vcmask 1044480   ;;  %s5552_s7 = smov 121   ;;  %s5553_s8 = smov 1   ;;  %v683_v4 = vld [vmem:[%s6938_s2 + $0x138] sm:$0xff]  ;;  %vm696_vm13 = vcmask 7168  }
   0x8   :  { %vm588_vm14 = vcmask 302080   ;;  %vm698_vm15 = vcmask 138240  }
   0xb   :  { %160 = vperm.xlu1 %5522, %v115_v5  }
  0x74   :  { %v27_v7 = vpop.permute.xlu0 %26 }
  0x75   :  { %v29_v8 = vsel %vm23_vm0, %v15_v6, %v27_v7 }
  0x76   :  { %127 = vrot.lane.b32.xlu1 %v29_v8, %s5540_s25  ;;  %124 = vrot.lane.b32.xlu0 %v29_v8, %s5541_s26 }
  0x7a   :  { %170 = vperm.xlu1 %5522, %v117_v9   ;;  %175 = vperm.xlu0 %5523, %v118_v10   ;;  %v280_v9 = vld [vmem:[%s6938_s2 + $0xe0] sm:$0xff]  ;;  %v281_v10 = vld [vmem:[%s6938_s2 + $0xe8] sm:$0xff] }
  0x7e   :  { %180 = vperm.xlu1 %5522, %v119_v11   ;;  %185 = vperm.xlu0 %5523, %v120_v12   ;;  %v156_v17 = vpop.permute.xlu1 %155  ;;  %v4708_v11 = vld [vmem:[%s6937_s0 + $0x10] sm:$0xff] }
  0x81   :  { %v151_v20 = vpop.permute.xlu0 %150 }
  0x82   :  { %140 = vperm.xlu1 %5522, %v111_v13   ;;  %145 = vperm.xlu0 %5523, %v112_v14   ;;  %v166_v18 = vpop.permute.xlu1 %165 }
  0x86   :  { %249 = vperm.xlu1 %5522, %v122_v15   ;;  %244 = vperm.xlu0 %5523, %v121_v16   ;;  %v161_v22 = vpop.permute.xlu1 %160 }
  0xe8   :  { %v125_v23 = vpop.permute.xlu0 %124  ;;  %v128_v26 = vpop.permute.xlu1 %127 }
  0xe9   :  { %v131_v25 = vsel %vm6945_vm1, 0.0, %v125_v23  ;;  %v265_v23 = vld [vmem:[%s6938_s2 + $0x68] sm:$0xff] }
  0xea   :  { %v133_v27 = vsel %vm132_vm2, %v131_v25, 0.0  ;;  %v267_v25 = vld [vmem:[%s6938_s2 + $0x78] sm:$0xff]  ;;  %vm701_vm2 = vcmask 285696  }
  0xeb   :  { %v135_v28 = vsel %vm134_vm3, %v133_v27, %v128_v26  ;;  %v268_v26 = vld [vmem:[%s6938_s2 + $0x80] sm:$0xff]  ;;  %v269_v27 = vld [vmem:[%s6938_s2 + $0x88] sm:$0xff]  ;;  %vm703_vm3 = vcmask 64512  }
  0xec   :  { %v137_v29 = vsel %vm136_vm4, %v135_v28, 0.0  ;;  %v270_v28 = vld [vmem:[%s6938_s2 + $0x90] sm:$0xff]  ;;  %vm882_vm4 = vcmask 1040384  }
  0xed   :  { %v191_v30 = vrot.slane %v137_v29, %v190_v24  ;;  %v266_v24 = vld [vmem:[%s6938_s2 + $0x70] sm:$0xff]  ;;  %v271_v29 = vld [vmem:[%s6938_s2 + $0x98] sm:$0xff] }
  0xef   :  { %v195_v31 = vmul.f32 %v191_v30, %v156_v17  ;;  %v194_v32 = vmul.f32 %v191_v30, %v151_v20  ;;  %v197_v33 = vmul.f32 %v191_v30, %v166_v18  ;;  %v196_v37 = vmul.f32 %v191_v30, %v161_v22 }
  0xf1   :  { %206 = vrot.lane.b32.xlu0 %v195_v31, %s5542_s17  ;;  %204 = vrot.lane.b32.xlu1 %v194_v32, %s5542_s17  ;;  %v273_v31 = vld [vmem:[%s6938_s2 + $0xa8] sm:$0xff]  ;;  %v274_v32 = vld [vmem:[%s6938_s2 + $0xb0] sm:$0xff] }
  0xf5   :  { %v171_v34 = vpop.permute.xlu1 %170  ;;  %216 = vrot.lane.b32.xlu0 %v197_v33, %s5543_s18  ;;  %v176_v35 = vpop.permute.xlu0 %175  ;;  %v275_v33 = vld [vmem:[%s6938_s2 + $0xb8] sm:$0xff] }
  0xf6   :  { %v199_v36 = vmul.f32 %v191_v30, %v176_v35  ;;  %v198_v39 = vmul.f32 %v191_v30, %v171_v34  ;;  %v276_v34 = vld [vmem:[%s6938_s2 + $0xc0] sm:$0xff]  ;;  %v277_v35 = vld [vmem:[%s6938_s2 + $0xc8] sm:$0xff] }
  0xf8   :  { %226 = vrot.lane.b32.xlu1 %v199_v36, %s5544_s19  ;;  %v278_v36 = vld [vmem:[%s6938_s2 + $0xd0] sm:$0xff] }
  0xf9   :  { %214 = vrot.lane.b32.xlu0 %v196_v37, %s5543_s18  ;;  %v186_v38 = vpop.permute.xlu0 %185  ;;  %v181_v41 = vpop.permute.xlu1 %180  ;;  %v279_v37 = vld [vmem:[%s6938_s2 + $0xd8] sm:$0xff] }
  0xfa   :  { %v201_v40 = vmul.f32 %v191_v30, %v186_v38  ;;  %v200_v42 = vmul.f32 %v191_v30, %v181_v41 }
  0xfc   :  { %224 = vrot.lane.b32.xlu1 %v198_v39, %s5544_s19 }
  0xfd   :  { %236 = vrot.lane.b32.xlu0 %v201_v40, %s5545_s20  ;;  %v146_v43 = vpop.permute.xlu0 %145  ;;  %v141_v44 = vpop.permute.xlu1 %140 }
  0xfe   :  { %v193_v48 = vmul.f32 %v191_v30, %v146_v43  ;;  %v192_v52 = vmul.f32 %v191_v30, %v141_v44  ;;  %v272_v30 = vld [vmem:[%s6938_s2 + $0xa0] sm:$0xff]  ;;  %v6947_v43 = vmov 0.0   ;;  %v32_v44 = vld [vmem:[%s6939_s1 + $0x8] sm:$0x3] }
  0xff   :  { %5120 = vmatprep.subr.mxu0 %v6947_v43  ;;  %5124 = vmatprep.mubr.msk.f32.mxu0 %vm5549_vm10, %v6947_v43 }
 0x100   :  { %234 = vrot.lane.b32.xlu1 %v200_v42, %s5545_s20  ;;  %5121 = vmatpush3.msk.msra.mxu0 %vm37_vm9, %v32_v44  ;;  %vm990_vm9 = vcmask 89088  }
 0x101   :  { %v245_v45 = vpop.permute.xlu0 %244  ;;  %v250_v46 = vpop.permute.xlu1 %249  ;;  %5122 = vmatprep.subr.mxu0 %v6947_v43 }
 0x163   :  { %v207_v47 = vpop.permute.xlu0 %206  ;;  %v205_v49 = vpop.permute.xlu1 %204 }
 0x164   :  { %v211_v51 = vadd.f32 %v207_v47, %v193_v48  ;;  %v210_v55 = vadd.f32 %v205_v49, %v192_v52  ;;  %v30_v48 = vld [vmem:[%s6938_s2 + $0x550] sm:$0xff] }
 0x165   :  { %v286_v49 = vld [vmem:[%s6938_s2 + $0x5f0] sm:$0x1f] }
 0x167   :  { %v217_v50 = vpop.permute.xlu0 %216 }
 0x168   :  { %v221_v53 = vadd.f32 %v217_v50, %v211_v51  ;;  %v285_v51 = vld [vmem:[%s6938_s2 + $0x5e8] sm:$0xff] }
 0x16a   :  { %v227_v54 = vpop.permute.xlu1 %226 }
 0x16b   :  { %v215_v56 = vpop.permute.xlu0 %214  ;;  %v231_v58 = vadd.f32 %v227_v54, %v221_v53  ;;  %v284_v53 = vld [vmem:[%s6938_s2 + $0x5e0] sm:$0xff] }
 0x16c   :  { %v220_v57 = vadd.f32 %v215_v56, %v210_v55  ;;  %v283_v55 = vld [vmem:[%s6938_s2 + $0x5d8] sm:$0xff] }
 0x16e   :  { %v225_v59 = vpop.permute.xlu1 %224 }
 0x16f   :  { %v237_v60 = vpop.permute.xlu0 %236  ;;  %v230_v62 = vadd.f32 %v225_v59, %v220_v57  ;;  %v282_v57 = vld [vmem:[%s6938_s2 + $0x5d0] sm:$0xff] }
 0x170   :  { %v241_v61 = vadd.f32 %v237_v60, %v231_v58 }
 0x172   :  { %v253_v63 = vadd.f32 %v250_v46, %v241_v61  ;;  %v235_v0 = vpop.permute.xlu1 %234  ;;  %v31_v46 = vld [vmem:[%s6939_s1] sm:$0xff] }
 0x173   :  { %v240_v2 = vadd.f32 %v235_v0, %v230_v62  ;;  %5123 = vmatpush3.msra.mxu0 %v31_v46 }
 0x174   :  { %258 = vrot.lane.b32.xlu0 %v253_v63, %s5545_s20  ;;  %5125 = vmatmul.mubr.msk.f32.vlgmr.msra.gmra.mxu0 %vm33_vm11, %v30_v48  ;;  %vm6942_vm11 = vcmask 39936  }
 0x175   :  { %v252_v3 = vadd.f32 %v245_v45, %v240_v2  ;;  %5155 = vmatprep.subr.msk.mxu0 %vm595_vm12, %v286_v49 }
 0x176   :  { %5156 = vmatpush3.msk.msra.mxu0 %vm595_vm12, %v286_v49  ;;  %v675_v49 = vld [vmem:[%s6938_s2 + $0xf8] sm:$0xff]  ;;  %vm6941_vm12 = vcmask 56320  }
 0x177   :  { %256 = vrot.lane.b32.xlu1 %v252_v3, %s5545_s20  ;;  %5157 = vmatprep.subr.mxu0 %v285_v51 }
 0x178   :  { %5158 = vmatpush3.msra.mxu0 %v285_v51  ;;  %v677_v51 = vld [vmem:[%s6938_s2 + $0x108] sm:$0xff] }
 0x179   :  { %5159 = vmatprep.subr.mxu0 %v284_v53 }
 0x17a   :  { %5160 = vmatpush3.msra.mxu0 %v284_v53  ;;  %v679_v53 = vld [vmem:[%s6938_s2 + $0x118] sm:$0xff] }
 0x17b   :  { %5161 = vmatprep.subr.mxu0 %v283_v55 }
 0x17c   :  { %5162 = vmatpush3.msra.mxu0 %v283_v55  ;;  %v681_v55 = vld [vmem:[%s6938_s2 + $0x128] sm:$0xff] }
 0x17d   :  { %5163 = vmatprep.subr.mxu0 %v282_v57 }
 0x17e   :  { %5164 = vmatpush3.msra.mxu0 %v282_v57 }
 0x1e6   :  { %v259_v5 = vpop.permute.xlu0 %258 }
 0x1e7   :  { %v5641_v6 = vsel %vm23_vm0, %v253_v63, %v259_v5  ;;  %v14_v63 = vld [vmem:[%s6937_s0] sm:$0xff] }
 0x1e8   :  { %291 = vrot.lane.b32.xlu0 %v5641_v6, %s5546_s23 }
 0x1e9   :  { %v257_v7 = vpop.permute.xlu1 %256 }
 0x1ea   :  { %v5646_v8 = vsel %vm23_vm0, %v252_v3, %v257_v7  ;;  %v682_v3 = vld [vmem:[%s6938_s2 + $0x130] sm:$0xff] }
 0x1eb   :  { %289 = vrot.lane.b32.xlu1 %v5646_v8, %s5546_s23 }
 0x1ec   :  { %297 = vrot.lane.b32.xlu0 %v5641_v6, %s5547_s24 }
 0x1ef   :  { %295 = vrot.lane.b32.xlu1 %v5646_v8, %s5547_s24 }
 0x1f0   :  { %20 = vrot.lane.b32.xlu0 %v4708_v11, %s5539_s16 }
 0x1f3   :  { %578 = vperm.xlu1 %5522, %v280_v9  }
 0x1f7   :  { %583 = vperm.xlu1 %5522, %v281_v10  }
 0x25a   :  { %v5662_v12 = vpop.permute.xlu0 %291 }
 0x25b   :  { %v303_v13 = vsel %vm6944_vm5, 0.0, %v5662_v12 }
 0x25c   :  { %v306_v17 = vsel %vm304_vm6, %v303_v13, 0.0 }
 0x25d   :  { %v5666_v14 = vpop.permute.xlu1 %289 }
 0x25e   :  { %v302_v15 = vsel %vm6944_vm5, 0.0, %v5666_v14  ;;  %v298_v16 = vpop.permute.xlu0 %297 }
 0x25f   :  { %v309_v18 = vsel %vm307_vm7, %v306_v17, %v298_v16  ;;  %v305_v19 = vsel %vm304_vm6, %v302_v15, 0.0 }
 0x260   :  { %5127 = vmatprep.subr.msk.mxu1 %vm310_vm8, %v309_v18 }
 0x261   :  { %v296_v20 = vpop.permute.xlu1 %295  ;;  %5128 = vmatpush3.msk.msra.mxu1 %vm310_vm8, %v309_v18 }
 0x262   :  { %v308_v22 = vsel %vm307_vm7, %v305_v19, %v296_v20  ;;  %v21_v62 = vpop.permute.xlu0 %20  ;;  %vm875_vm7 = vcmask 269312  }
 0x263   :  { %5129 = vmatprep.subr.msk.mxu1 %vm310_vm8, %v308_v22  ;;  %v5776_v2 = vsel %vm23_vm0, %v14_v63, %v21_v62  ;;  %v686_v63 = vld [vmem:[%s6938_s2 + $0x5a0] sm:$0xff] }
 0x264   :  { %5130 = vmatpush3.msk.msra.mxu1 %vm310_vm8, %v308_v22  ;;  %6950 = vst [vmem:[#allocation2_spill] sm:$0xff] %v5776_v2  ;;  %vm987_vm8 = vcmask 72704  }
 0x265   :  { %5132 = vmatmul.mubr.msk.f32.vlgmr.msra.gmra.mxu1 %vm23_vm0, %v265_v23 }
 0x266   :  { %5134 = vmatprep.mubr.msk.f32.mxu1 %vm23_vm0, %v266_v24 }
 0x269   :  { %5135 = vmatmul.mubr.msk.f32.gmra.mxu1 %vm23_vm0, %v267_v25 }
 0x26a   :  { %5137 = vmatprep.mubr.msk.f32.mxu1 %vm23_vm0, %v268_v26 }
 0x26d   :  { %5138 = vmatmul.mubr.msk.f32.gmra.mxu1 %vm23_vm0, %v269_v27 }
 0x26e   :  { %5140 = vmatprep.mubr.msk.f32.mxu1 %vm23_vm0, %v270_v28  ;;  %v579_v5 = vpop.permute.xlu1 %578 }
 0x271   :  { %5141 = vmatmul.mubr.msk.f32.gmra.mxu1 %vm23_vm0, %v271_v29 }
 0x272   :  { %5143 = vmatprep.mubr.msk.f32.mxu1 %vm23_vm0, %v272_v30  ;;  %v584_v7 = vpop.permute.xlu1 %583 }
 0x275   :  { %5144 = vmatmul.mubr.msk.f32.gmra.mxu1 %vm23_vm0, %v273_v31 }
 0x276   :  { %5146 = vmatprep.mubr.msk.f32.mxu1 %vm23_vm0, %v274_v32 }
 0x279   :  { %5147 = vmatmul.mubr.msk.f32.gmra.mxu1 %vm23_vm0, %v275_v33 }
 0x27a   :  { %5149 = vmatprep.mubr.msk.f32.mxu1 %vm23_vm0, %v276_v34 }
 0x27d   :  { %5150 = vmatmul.mubr.msk.f32.gmra.mxu1 %vm23_vm0, %v277_v35 }
 0x27e   :  { %5152 = vmatprep.mubr.msk.f32.mxu1 %vm23_vm0, %v278_v36 }
 0x281   :  { %5153 = vmatmul.mubr.msk.f32.gmra.mxu1 %vm23_vm0, %v279_v37 }
 0x325   :  { %v5732_v38 = vpop.f32.mrf.mxu1 }
 0x327   :  { %v5734_v39 = vpop.f32.mrf.mxu1 }
 0x329   :  { %v5136_v40 = vpop.f32.mrf.mxu1 }
 0x32a   :  { %510 = vrot.lane.b32.xlu0 %v5136_v40, %s5542_s17 }
 0x32b   :  { %v437_v41 = vpop.f32.mrf.mxu1 }
 0x32c   :  { %508 = vrot.lane.b32.xlu1 %v437_v41, %s5542_s17 }
 0x32d   :  { %v5139_v42 = vpop.f32.mrf.mxu1 }
 0x32e   :  { %520 = vrot.lane.b32.xlu0 %v5139_v42, %s5543_s18 }
 0x32f   :  { %v447_v45 = vpop.f32.mrf.mxu1 }
 0x330   :  { %518 = vrot.lane.b32.xlu1 %v447_v45, %s5543_s18  ;;  %v674_v45 = vld [vmem:[%s6938_s2 + $0xf0] sm:$0xff] }
 0x331   :  { %v5142_v47 = vpop.f32.mrf.mxu1 }
 0x332   :  { %530 = vrot.lane.b32.xlu0 %v5142_v47, %s5544_s19 }
 0x333   :  { %v457_v50 = vpop.f32.mrf.mxu1 }
 0x334   :  { %528 = vrot.lane.b32.xlu1 %v457_v50, %s5544_s19  ;;  %v676_v50 = vld [vmem:[%s6938_s2 + $0x100] sm:$0xff] }
 0x335   :  { %v5145_v52 = vpop.f32.mrf.mxu1 }
 0x336   :  { %540 = vrot.lane.b32.xlu0 %v5145_v52, %s5545_s20  ;;  %v678_v52 = vld [vmem:[%s6938_s2 + $0x110] sm:$0xff] }
 0x337   :  { %v467_v54 = vpop.f32.mrf.mxu1 }
 0x338   :  { %538 = vrot.lane.b32.xlu1 %v467_v54, %s5545_s20  ;;  %s5551_s20 = smov 122   ;;  %v680_v54 = vld [vmem:[%s6938_s2 + $0x120] sm:$0xff] }
 0x339   :  { %v5148_v56 = vpop.f32.mrf.mxu1 }
 0x33a   :  { %550 = vrot.lane.b32.xlu0 %v5148_v56, %s5550_s30  ;;  %v5827_v56 = vpop.f32.mrf.mxu0 }
 0x33b   :  { %v477_v58 = vpop.f32.mrf.mxu1 }
 0x33c   :  { %548 = vrot.lane.b32.xlu1 %v477_v58, %s5550_s30  ;;  %v5126_v57 = vpop.f32.mrf.mxu0 }
 0x33d   :  { %v5151_v59 = vpop.f32.mrf.mxu1 }
 0x33e   :  { %560 = vrot.lane.b32.xlu0 %v5151_v59, %s5551_s20  ;;  %v688_v59 = vld [vmem:[%s6938_s2 + $0x5b0] sm:$0x1] }
 0x33f   :  { %v487_v60 = vpop.f32.mrf.mxu1 }
 0x341   :  { %v5154_v61 = vpop.f32.mrf.mxu1 }
 0x342   :  { %558 = vrot.lane.b32.xlu0 %v487_v60, %s5551_s20 }
 0x343   :  { %v497_v0 = vpop.f32.mrf.mxu1 }
 0x344   :  { %568 = vrot.lane.b32.xlu1 %v497_v0, %s5552_s7 }
 0x346   :  { %570 = vrot.lane.b32.xlu0 %v5154_v61, %s5552_s7  ;;  %v687_v61 = vld [vmem:[%s6938_s2 + $0x5a8] sm:$0xff] }
 0x348   :  { %690 = vrot.lane.b32.xlu1 %v5776_v2, %s5553_s8 }
 0x34a   :  { %693 = vrot.lane.b32.xlu0 %v5776_v2, %s5546_s23 }
 0x34c   :  { %865 = vperm.xlu1 %5522, %v682_v3   ;;  %v685_v3 = vld [vmem:[%s6938_s2 + $0x598] sm:$0xff] }
 0x350   :  { %870 = vperm.xlu1 %5522, %v683_v4  }
 0x39c   :  { %v511_v9 = vpop.permute.xlu0 %510 }
 0x39d   :  { %v515_v22 = vadd.f32 %v5732_v38, %v511_v9 }
 0x39e   :  { %v509_v10 = vpop.permute.xlu1 %508 }
 0x39f   :  { %v514_v19 = vadd.f32 %v509_v10, %v5734_v39 }
 0x3a0   :  { %v521_v11 = vpop.permute.xlu0 %520 }
 0x3a1   :  { %v525_v24 = vadd.f32 %v521_v11, %v515_v22 }
 0x3a2   :  { %v519_v13 = vpop.permute.xlu1 %518 }
 0x3a3   :  { %v524_v23 = vadd.f32 %v519_v13, %v514_v19 }
 0x3a4   :  { %v531_v15 = vpop.permute.xlu0 %530 }
 0x3a5   :  { %v535_v28 = vadd.f32 %v531_v15, %v525_v24 }
 0x3a6   :  { %v529_v16 = vpop.permute.xlu1 %528 }
 0x3a7   :  { %v534_v25 = vadd.f32 %v529_v16, %v524_v23 }
 0x3a8   :  { %v541_v17 = vpop.permute.xlu0 %540 }
 0x3a9   :  { %v545_v30 = vadd.f32 %v541_v17, %v535_v28 }
 0x3aa   :  { %v539_v18 = vpop.permute.xlu1 %538 }
 0x3ab   :  { %v544_v29 = vadd.f32 %v539_v18, %v534_v25 }
 0x3ac   :  { %v551_v20 = vpop.permute.xlu0 %550 }
 0x3ad   :  { %v555_v33 = vadd.f32 %v551_v20, %v545_v30 }
 0x3ae   :  { %v549_v26 = vpop.permute.xlu1 %548 }
 0x3af   :  { %v554_v31 = vadd.f32 %v549_v26, %v544_v29 }
 0x3b0   :  { %v561_v27 = vpop.permute.xlu0 %560 }
 0x3b1   :  { %v565_v36 = vadd.f32 %v561_v27, %v555_v33 }
 0x3b4   :  { %v559_v32 = vpop.permute.xlu0 %558 }
 0x3b5   :  { %v564_v34 = vadd.f32 %v559_v32, %v554_v31  ;;  %v963_v32 = vld [vmem:[%s6938_s2 + $0x140] sm:$0xff] }
 0x3b6   :  { %v569_v35 = vpop.permute.xlu1 %568  ;;  %5199 = vmatprep.mubr.msk.f32.mxu1 %vm23_vm0, %v963_v32 }
 0x3b7   :  { %v574_v37 = vadd.f32 %v569_v35, %v564_v34 }
 0x3b8   :  { %v571_v40 = vpop.permute.xlu0 %570 }
 0x3b9   :  { %v586_v39 = vadd.f32 %v579_v5, %v574_v37  ;;  %v575_v38 = vadd.f32 %v571_v40, %v565_v36  ;;  %v684_v5 = vld [vmem:[%s6938_s2 + $0x590] sm:$0xff]  ;;  %v970_v37 = vld [vmem:[%s6938_s2 + $0x178] sm:$0xff] }
 0x3ba   :  { %v691_v41 = vpop.permute.xlu1 %690  ;;  %v969_v40 = vld [vmem:[%s6938_s2 + $0x170] sm:$0xff] }
 0x3bb   :  { %v587_v42 = vadd.f32 %v584_v7, %v575_v38  ;;  %v697_v44 = vsel %vm696_vm13, 0.0, %v691_v41  ;;  %5165 = vmatprep.mubr.msk.f32.mxu0 %vm588_vm14, %v586_v39 }
 0x3bc   :  { %v699_v46 = vsel %vm698_vm15, %v697_v44, 0.0  ;;  %v694_v47 = vpop.permute.xlu0 %693 }
 0x3bd   :  { %v700_v48 = vsel %vm304_vm6, %v699_v46, %v694_v47  ;;  %5166 = vmatmul.mubr.msk.f32.vlgmr.msra.gmra.mxu0 %vm588_vm14, %v587_v42  ;;  %vm6943_vm14 = vcmask 31744  }
 0x3be   :  { %5168 = vmatprep.subr.msk.mxu0 %vm701_vm2, %v700_v48  ;;  %5170 = vmatprep.mubr.msk.f32.mxu0 %vm703_vm3, %v674_v45 }
 0x3bf   :  { %5169 = vmatpush3.msk.msra.mxu0 %vm701_vm2, %v700_v48 }
 0x3c0   :  { %5182 = vmatprep.subr.msk.mxu0 %vm882_vm4, %v688_v59 }
 0x3c1   :  { %5171 = vmatmul.mubr.msk.f32.vlgmr.msra.gmra.mxu0 %vm703_vm3, %v675_v49 }
 0x3c2   :  { %5173 = vmatprep.mubr.msk.f32.mxu0 %vm703_vm3, %v676_v50  ;;  %5183 = vmatpush3.msk.msra.mxu0 %vm882_vm4, %v688_v59  ;;  %v964_v50 = vld [vmem:[%s6938_s2 + $0x148] sm:$0xff] }
 0x3c3   :  { %5184 = vmatprep.subr.mxu0 %v687_v61 }
 0x3c4   :  { %5185 = vmatpush3.msra.mxu0 %v687_v61 }
 0x3c5   :  { %5174 = vmatmul.mubr.msk.f32.gmra.mxu0 %vm703_vm3, %v677_v51  ;;  %5186 = vmatprep.subr.mxu0 %v686_v63  ;;  %v965_v51 = vld [vmem:[%s6938_s2 + $0x150] sm:$0xff] }
 0x3c6   :  { %5176 = vmatprep.mubr.msk.f32.mxu0 %vm703_vm3, %v678_v52  ;;  %5187 = vmatpush3.msra.mxu0 %v686_v63  ;;  %v966_v52 = vld [vmem:[%s6938_s2 + $0x158] sm:$0xff] }
 0x3c7   :  { %5188 = vmatprep.subr.mxu0 %v685_v3  ;;  %v866_v15 = vpop.permute.xlu1 %865 }
 0x3c8   :  { %5189 = vmatpush3.msra.mxu0 %v685_v3 }
 0x3c9   :  { %5177 = vmatmul.mubr.msk.f32.gmra.mxu0 %vm703_vm3, %v679_v53  ;;  %5190 = vmatprep.subr.mxu0 %v684_v5  ;;  %v967_v53 = vld [vmem:[%s6938_s2 + $0x160] sm:$0xff] }
 0x3ca   :  { %5179 = vmatprep.mubr.msk.f32.mxu0 %vm703_vm3, %v680_v54  ;;  %5191 = vmatpush3.msra.mxu0 %v684_v5  ;;  %v968_v54 = vld [vmem:[%s6938_s2 + $0x168] sm:$0xff] }
 0x3cb   :  { %v871_v16 = vpop.permute.xlu1 %870 }
 0x3cd   :  { %5180 = vmatmul.mubr.msk.f32.gmra.mxu0 %vm703_vm3, %v681_v55 }
 0x47d   :  { %v5829_v58 = vpop.f32.mrf.mxu0 }
 0x47f   :  { %v5835_v60 = vpop.f32.mrf.mxu0 }
 0x481   :  { %v5172_v62 = vpop.f32.mrf.mxu0 }
 0x483   :  { %v794_v0 = vpop.f32.mrf.mxu0 }
 0x485   :  { %v5175_v4 = vpop.f32.mrf.mxu0 }
 0x486   :  { %837 = vrot.lane.b32.xlu0 %v5175_v4, %s5542_s17 }
 0x487   :  { %v804_v7 = vpop.f32.mrf.mxu0 }
 0x488   :  { %835 = vrot.lane.b32.xlu1 %v804_v7, %s5542_s17 }
 0x489   :  { %v5178_v9 = vpop.f32.mrf.mxu0 }
 0x48a   :  { %847 = vrot.lane.b32.xlu0 %v5178_v9, %s5543_s18 }
 0x48b   :  { %v814_v10 = vpop.f32.mrf.mxu0 }
 0x48d   :  { %v5181_v11 = vpop.f32.mrf.mxu0 }
 0x48e   :  { %845 = vrot.lane.b32.xlu0 %v814_v10, %s5543_s18 }
 0x48f   :  { %v824_v13 = vpop.f32.mrf.mxu0 }
 0x490   :  { %855 = vrot.lane.b32.xlu1 %v824_v13, %s5544_s19 }
 0x492   :  { %857 = vrot.lane.b32.xlu0 %v5181_v11, %s5544_s19 }
 0x4f8   :  { %v838_v17 = vpop.permute.xlu0 %837 }
 0x4f9   :  { %v842_v23 = vadd.f32 %v5172_v62, %v838_v17 }
 0x4fa   :  { %v836_v18 = vpop.permute.xlu1 %835 }
 0x4fb   :  { %v841_v20 = vadd.f32 %v836_v18, %v794_v0  ;;  %v1150_v18 = vld [vmem:[%s6938_s2 + $0x180] sm:$0xff] }
 0x4fc   :  { %v848_v19 = vpop.permute.xlu0 %847 }
 0x4fd   :  { %v852_v26 = vadd.f32 %v848_v19, %v842_v23 }
 0x500   :  { %v846_v22 = vpop.permute.xlu0 %845 }
 0x501   :  { %v851_v24 = vadd.f32 %v846_v22, %v841_v20 }
 0x502   :  { %v856_v25 = vpop.permute.xlu1 %855 }
 0x503   :  { %v861_v27 = vadd.f32 %v856_v25, %v851_v24  ;;  %v1158_v24 = vld [vmem:[%s6938_s2 + $0x1c0] sm:$0xff]  ;;  %v1159_v25 = vld [vmem:[%s6938_s2 + $0x1c8] sm:$0xff] }
 0x504   :  { %v858_v28 = vpop.permute.xlu0 %857 }
 0x505   :  { %v873_v29 = vadd.f32 %v866_v15, %v861_v27  ;;  %v862_v30 = vadd.f32 %v858_v28, %v852_v26 }
 0x507   :  { %v874_v31 = vadd.f32 %v871_v16, %v862_v30  ;;  %5192 = vmatprep.mubr.msk.f32.mxu0 %vm875_vm7, %v873_v29 }
 0x509   :  { %5193 = vmatmul.mubr.msk.f32.vlgmr.msra.gmra.mxu0 %vm875_vm7, %v874_v31 }
 0x50a   :  { %5212 = vmatprep.mubr.msk.f32.mxu0 %vm23_vm0, %v1150_v18 }
 0x5c9   :  { %v5194_v33 = vpop.f32.mrf.mxu0 }
 0x5ca   :  { %v962_v34 = vmax.f32 %v5194_v33, 0.0 }
 0x5cb   :  { %v952_v35 = vpop.f32.mrf.mxu0 }
 0x5cc   :  { %v961_v36 = vmax.f32 %v952_v35, 0.0  ;;  %975 = vrot.lane.b32.xlu1 %v962_v34, %s5553_s8 }
 0x5ce   :  { %973 = vrot.lane.b32.xlu0 %v961_v36, %s5553_s8 }
 0x5d0   :  { %981 = vrot.lane.b32.xlu1 %v962_v34, %s5546_s23 }
 0x5d2   :  { %979 = vrot.lane.b32.xlu0 %v961_v36, %s5546_s23  ;;  %v1151_v36 = vld [vmem:[%s6938_s2 + $0x188] sm:$0xff] }
 0x5d4   :  { %1135 = vperm.xlu1 %5522, %v970_v37   ;;  %v1152_v37 = vld [vmem:[%s6938_s2 + $0x190] sm:$0xff] }
 0x5d8   :  { %1130 = vperm.xlu1 %5522, %v969_v40   ;;  %v1153_v40 = vld [vmem:[%s6938_s2 + $0x198] sm:$0xff] }
 0x63e   :  { %v976_v39 = vpop.permute.xlu1 %975 }
 0x63f   :  { %v986_v38 = vsel %vm696_vm13, 0.0, %v976_v39  ;;  %v1154_v39 = vld [vmem:[%s6938_s2 + $0x1a0] sm:$0xff] }
 0x640   :  { %v974_v41 = vpop.permute.xlu0 %973  ;;  %v989_v44 = vsel %vm987_vm8, %v986_v38, 0.0  ;;  %v1155_v38 = vld [vmem:[%s6938_s2 + $0x1a8] sm:$0xff] }
 0x641   :  { %v985_v42 = vsel %vm696_vm13, 0.0, %v974_v41  ;;  %v1156_v41 = vld [vmem:[%s6938_s2 + $0x1b0] sm:$0xff] }
 0x642   :  { %v982_v45 = vpop.permute.xlu1 %981  ;;  %v988_v47 = vsel %vm987_vm8, %v985_v42, 0.0  ;;  %v1157_v42 = vld [vmem:[%s6938_s2 + $0x1b8] sm:$0xff] }
 0x643   :  { %v992_v46 = vsel %vm990_vm9, %v989_v44, %v982_v45  ;;  %v1162_v45 = vld [vmem:[%s6938_s2 + $0x5c8] sm:$0x1] }
 0x644   :  { %5195 = vmatprep.subr.msk.mxu1 %vm304_vm6, %v992_v46  ;;  %v980_v48 = vpop.permute.xlu0 %979 }
 0x645   :  { %v991_v49 = vsel %vm990_vm9, %v988_v47, %v980_v48  ;;  %5196 = vmatpush3.msk.msra.mxu1 %vm304_vm6, %v992_v46  ;;  %v1161_v47 = vld [vmem:[%s6938_s2 + $0x5c0] sm:$0xff] }
 0x646   :  { %5197 = vmatprep.subr.msk.mxu1 %vm304_vm6, %v991_v49 }
 0x647   :  { %5198 = vmatpush3.msk.msra.mxu1 %vm304_vm6, %v991_v49  ;;  %v1160_v49 = vld [vmem:[%s6938_s2 + $0x5b8] sm:$0xff] }
 0x648   :  { %5200 = vmatmul.mubr.msk.f32.vlgmr.msra.gmra.mxu1 %vm23_vm0, %v964_v50  ;;  %5224 = vmatprep.subr.msk.mxu1 %vm882_vm4, %v1162_v45 }
 0x649   :  { %5202 = vmatprep.mubr.msk.f32.mxu1 %vm23_vm0, %v965_v51  ;;  %5225 = vmatpush3.msk.msra.mxu1 %vm882_vm4, %v1162_v45 }
 0x64a   :  { %5226 = vmatprep.subr.mxu1 %v1161_v47 }
 0x64b   :  { %5227 = vmatpush3.msra.mxu1 %v1161_v47 }
 0x64c   :  { %5203 = vmatmul.mubr.msk.f32.gmra.mxu1 %vm23_vm0, %v966_v52  ;;  %5228 = vmatprep.subr.mxu1 %v1160_v49 }
 0x64d   :  { %5205 = vmatprep.mubr.msk.f32.mxu1 %vm23_vm0, %v967_v53  ;;  %5229 = vmatpush3.msra.mxu1 %v1160_v49 }
 0x64e   :  { %5233 = vmatprep.subr.mxu1 %v6947_v43 }
 0x64f   :  { %v1136_v0 = vpop.permute.xlu1 %1135 }
 0x650   :  { %5206 = vmatmul.mubr.msk.f32.gmra.mxu1 %vm23_vm0, %v968_v54 }
 0x653   :  { %v1131_v3 = vpop.permute.xlu1 %1130 }
 0x708   :  { %v5201_v55 = vpop.f32.mrf.mxu1 }
 0x70a   :  { %v1079_v57 = vpop.f32.mrf.mxu1 }
 0x70c   :  { %v5204_v59 = vpop.f32.mrf.mxu1 }
 0x70d   :  { %1112 = vrot.lane.b32.xlu0 %v5204_v59, %s5542_s17 }
 0x70e   :  { %v1089_v61 = vpop.f32.mrf.mxu1 }
 0x710   :  { %v5207_v62 = vpop.f32.mrf.mxu1 }
 0x711   :  { %1110 = vrot.lane.b32.xlu0 %v1089_v61, %s5542_s17  ;;  %1122 = vrot.lane.b32.xlu1 %v5207_v62, %s5543_s18 }
 0x712   :  { %v1099_v63 = vpop.f32.mrf.mxu1 }
 0x715   :  { %1120 = vrot.lane.b32.xlu0 %v1099_v63, %s5543_s18 }
 0x77f   :  { %v1113_v4 = vpop.permute.xlu0 %1112 }
 0x780   :  { %v1117_v5 = vadd.f32 %v5201_v55, %v1113_v4 }
 0x783   :  { %v1111_v7 = vpop.permute.xlu0 %1110  ;;  %v1123_v9 = vpop.permute.xlu1 %1122 }
 0x784   :  { %v1127_v10 = vadd.f32 %v1123_v9, %v1117_v5  ;;  %v1116_v11 = vadd.f32 %v1111_v7, %v1079_v57 }
 0x786   :  { %v1139_v13 = vadd.f32 %v1136_v0, %v1127_v10 }
 0x787   :  { %v1121_v15 = vpop.permute.xlu0 %1120 }
 0x788   :  { %v1126_v16 = vadd.f32 %v1121_v15, %v1116_v11  ;;  %1144 = vrot.lane.b32.xlu1 %v1139_v13, %s5543_s18 }
 0x78a   :  { %v1138_v17 = vadd.f32 %v1131_v3, %v1126_v16 }
 0x78c   :  { %1142 = vrot.lane.b32.xlu0 %v1138_v17, %s5543_s18 }
 0x7fa   :  { %v1145_v19 = vpop.permute.xlu1 %1144 }
 0x7fb   :  { %v1149_v20 = vsel %vm703_vm3, %v1139_v13, %v1145_v19 }
 0x7fc   :  { %1167 = vrot.lane.b32.xlu1 %v1149_v20, %s5553_s8 }
 0x7fe   :  { %v1143_v22 = vpop.permute.xlu0 %1142 }
 0x7ff   :  { %v1148_v23 = vsel %vm703_vm3, %v1138_v17, %v1143_v22  ;;  %v1445_v22 = vld [vmem:[%s6938_s2 + $0x1e8] sm:$0xff] }
 0x800   :  { %1173 = vrot.lane.b32.xlu1 %v1149_v20, %s5546_s23  ;;  %1165 = vrot.lane.b32.xlu0 %v1148_v23, %s5553_s8  ;;  %v1581_v20 = vld [vmem:[%s6938_s2 + $0x1f0] sm:$0xff] }
 0x804   :  { %1346 = vperm.xlu1 %5522, %v1158_v24   ;;  %1171 = vrot.lane.b32.xlu0 %v1148_v23, %s5546_s23  ;;  %v1582_v23 = vld [vmem:[%s6938_s2 + $0x1f8] sm:$0xff]  ;;  %v1583_v24 = vld [vmem:[%s6938_s2 + $0x200] sm:$0xff] }
 0x808   :  { %1351 = vperm.xlu1 %5522, %v1159_v25  }
 0x86e   :  { %v1168_v26 = vpop.permute.xlu1 %1167 }
 0x86f   :  { %v1178_v27 = vsel %vm696_vm13, 0.0, %v1168_v26 }
 0x870   :  { %v1180_v28 = vsel %vm987_vm8, %v1178_v27, 0.0 }
 0x872   :  { %v1174_v29 = vpop.permute.xlu1 %1173  ;;  %v1166_v30 = vpop.permute.xlu0 %1165 }
 0x873   :  { %v1182_v31 = vsel %vm990_vm9, %v1180_v28, %v1174_v29  ;;  %v1177_v32 = vsel %vm696_vm13, 0.0, %v1166_v30 }
 0x874   :  { %5208 = vmatprep.subr.msk.mxu0 %vm304_vm6, %v1182_v31  ;;  %v1179_v33 = vsel %vm987_vm8, %v1177_v32, 0.0 }
 0x875   :  { %5209 = vmatpush3.msk.msra.mxu0 %vm304_vm6, %v1182_v31 }
 0x876   :  { %v1172_v34 = vpop.permute.xlu0 %1171 }
 0x877   :  { %v1181_v35 = vsel %vm990_vm9, %v1179_v33, %v1172_v34  ;;  %v1442_v34 = vld [vmem:[%s6938_s2 + $0x1d0] sm:$0xff] }
 0x878   :  { %5210 = vmatprep.subr.msk.mxu0 %vm304_vm6, %v1181_v35 }
 0x879   :  { %5211 = vmatpush3.msk.msra.mxu0 %vm304_vm6, %v1181_v35 }
 0x87a   :  { %5213 = vmatmul.mubr.msk.f32.vlgmr.msra.gmra.mxu0 %vm23_vm0, %v1151_v36  ;;  %5246 = vmatprep.subr.mxu0 %v6947_v43  ;;  %v1443_v36 = vld [vmem:[%s6938_s2 + $0x1d8] sm:$0xff] }
 0x87b   :  { %5247 = vmatpush3.msk.msra.mxu0 %vm304_vm6, %v1182_v31  ;;  %5215 = vmatprep.mubr.msk.f32.mxu0 %vm23_vm0, %v1152_v37  ;;  %v1444_v37 = vld [vmem:[%s6938_s2 + $0x1e0] sm:$0xff] }
 0x87c   :  { %5248 = vmatprep.subr.mxu0 %v6947_v43 }
 0x87d   :  { %5249 = vmatpush3.msk.msra.mxu0 %vm304_vm6, %v1181_v35 }
 0x87e   :  { %5216 = vmatmul.mubr.msk.f32.gmra.mxu0 %vm23_vm0, %v1153_v40  ;;  %5264 = vmatprep.subr.mxu0 %v6947_v43  ;;  %v1698_v40 = vld [vmem:[%s6938_s2 + $0x558] sm:$0xff] }
 0x87f   :  { %5218 = vmatprep.mubr.msk.f32.mxu0 %vm23_vm0, %v1154_v39  ;;  %v1347_v55 = vpop.permute.xlu1 %1346 }
 0x882   :  { %5219 = vmatmul.mubr.msk.f32.gmra.mxu0 %vm23_vm0, %v1155_v38 }
 0x883   :  { %5221 = vmatprep.mubr.msk.f32.mxu0 %vm23_vm0, %v1156_v41  ;;  %v1352_v57 = vpop.permute.xlu1 %1351 }
 0x886   :  { %5222 = vmatmul.mubr.msk.f32.gmra.mxu0 %vm23_vm0, %v1157_v42 }
 0x887   :  { %5250 = vmatprep.mubr.msk.f32.mxu0 %vm5549_vm10, %v6947_v43 }
 0x88a   :  { %5251 = vmatmul.mubr.msk.f32.vlgmr.msra.gmra.mxu0 %vm23_vm0, %v1581_v20 }
 0x88b   :  { %5253 = vmatprep.mubr.msk.f32.mxu0 %vm5549_vm10, %v6947_v43 }
 0x88e   :  { %5254 = vmatmul.mubr.msk.f32.gmra.mxu0 %vm23_vm0, %v1582_v23  ;;  %v1908_v23 = vld [vmem:[%s6938_s2 + $0x578] sm:$0xff] }
 0x88f   :  { %5256 = vmatprep.mubr.msk.f32.mxu0 %vm5549_vm10, %v6947_v43 }
 0x892   :  { %5257 = vmatmul.mubr.msk.f32.gmra.mxu0 %vm23_vm0, %v1583_v24  ;;  %v1992_v24 = vmul.f32 %v1908_v23, %v1908_v23 }
 0x893   :  { %5268 = vmatprep.mubr.msk.f32.mxu0 %vm5549_vm10, %v6947_v43 }
 0x93a   :  { %v5214_v44 = vpop.f32.mrf.mxu0 }
 0x93c   :  { %v1275_v46 = vpop.f32.mrf.mxu0 }
 0x93e   :  { %v5217_v48 = vpop.f32.mrf.mxu0 }
 0x93f   :  { %1318 = vrot.lane.b32.xlu0 %v5217_v48, %s5542_s17 }
 0x940   :  { %v1285_v50 = vpop.f32.mrf.mxu0 }
 0x941   :  { %1316 = vrot.lane.b32.xlu1 %v1285_v50, %s5542_s17 }
 0x942   :  { %v5220_v51 = vpop.f32.mrf.mxu0 }
 0x943   :  { %1328 = vrot.lane.b32.xlu0 %v5220_v51, %s5543_s18 }
 0x944   :  { %v1295_v52 = vpop.f32.mrf.mxu0 }
 0x946   :  { %v5223_v53 = vpop.f32.mrf.mxu0 }
 0x947   :  { %1326 = vrot.lane.b32.xlu0 %v1295_v52, %s5543_s18 }
 0x948   :  { %v1305_v54 = vpop.f32.mrf.mxu0 }
 0x949   :  { %1336 = vrot.lane.b32.xlu1 %v1305_v54, %s5544_s19 }
 0x94a   :  { %v1660_v39 = vpop.f32.mrf.mxu0 }
 0x94b   :  { %1338 = vrot.lane.b32.xlu0 %v5223_v53, %s5544_s19  ;;  %v1782_v53 = vmul.f32 %v1698_v40, %v1698_v40 }
 0x94c   :  { %v5252_v38 = vpop.f32.mrf.mxu0 }
 0x94d   :  { %v1784_v54 = vsel %vm703_vm3, %v1782_v53, 0.0 }
 0x94e   :  { %v1665_v41 = vpop.f32.mrf.mxu0 }
 0x950   :  { %v5255_v42 = vpop.f32.mrf.mxu0 }
 0x9b1   :  { %v1319_v59 = vpop.permute.xlu0 %1318 }
 0x9b2   :  { %v1323_v3 = vadd.f32 %v5214_v44, %v1319_v59  ;;  %v1670_v44 = vpop.f32.mrf.mxu0 }
 0x9b3   :  { %v1317_v61 = vpop.permute.xlu1 %1316 }
 0x9b4   :  { %v1322_v63 = vadd.f32 %v1317_v61, %v1275_v46  ;;  %v5258_v45 = vpop.f32.mrf.mxu0  ;;  %v5554_v46 = vmov 1  }
 0x9b5   :  { %v1329_v62 = vpop.permute.xlu0 %1328 }
 0x9b6   :  { %v1333_v7 = vadd.f32 %v1329_v62, %v1323_v3 }
 0x9b9   :  { %v1327_v0 = vpop.permute.xlu0 %1326 }
 0x9ba   :  { %v1332_v4 = vadd.f32 %v1327_v0, %v1322_v63 }
 0x9bb   :  { %v1337_v5 = vpop.permute.xlu1 %1336 }
 0x9bc   :  { %v1342_v9 = vadd.f32 %v1337_v5, %v1332_v4  ;;  %v1699_v5 = vld [vmem:[%s6938_s2 + $0x560] sm:$0xff] }
 0x9bd   :  { %v1339_v10 = vpop.permute.xlu0 %1338 }
 0x9be   :  { %v1354_v11 = vadd.f32 %v1347_v55, %v1342_v9  ;;  %v1343_v13 = vadd.f32 %v1339_v10, %v1333_v7  ;;  %v1907_v55 = vld [vmem:[%s6938_s2 + $0x570] sm:$0xff]  ;;  %v1783_v7 = vmul.f32 %v1699_v5, %v1699_v5  ;;  %v1584_v10 = vld [vmem:[%s6938_s2 + $0x208] sm:$0xff] }
 0x9c0   :  { %v1355_v15 = vadd.f32 %v1352_v57, %v1343_v13  ;;  %5230 = vmatprep.mubr.msk.f32.mxu1 %vm698_vm15, %v1354_v11  ;;  %v1991_v57 = vmul.f32 %v1907_v55, %v1907_v55  ;;  %v1787_v9 = vsel %vm703_vm3, %v1783_v7, 0.0 }
 0x9c2   :  { %5231 = vmatmul.mubr.msk.f32.vlgmr.msra.gmra.mxu1 %vm698_vm15, %v1355_v15  ;;  %v1993_v59 = vsel %vm703_vm3, %v1991_v57, 0.0  ;;  %v1700_v57 = vld [vmem:[%s6938_s2 + $0x568] sm:$0xff] }
 0x9c3   :  { %5237 = vmatprep.mubr.msk.f32.mxu1 %vm5549_vm10, %v6947_v43 }
 0xa82   :  { %v5232_v16 = vpop.f32.mrf.mxu1 }
 0xa83   :  { %v1441_v17 = vmax.f32 %v5232_v16, 0.0 }
 0xa84   :  { %v1431_v18 = vpop.f32.mrf.mxu1 }
 0xa85   :  { %v1440_v19 = vmax.f32 %v1431_v18, 0.0  ;;  %1450 = vrot.lane.b32.xlu1 %v1441_v17, %s5553_s8 }
 0xa87   :  { %1448 = vrot.lane.b32.xlu0 %v1440_v19, %s5553_s8 }
 0xa89   :  { %1456 = vrot.lane.b32.xlu1 %v1441_v17, %s5546_s23 }
 0xa8b   :  { %1454 = vrot.lane.b32.xlu0 %v1440_v19, %s5546_s23 }
 0xa8d   :  { %1571 = vperm.xlu1 %5522, %v1445_v22  }
 0xa91   :  { %5524 = vset.pattern.permute.xlu1 %v5554_v46 }
 0xaf7   :  { %v1451_v25 = vpop.permute.xlu1 %1450 }
 0xaf8   :  { %v1461_v26 = vsel %vm696_vm13, 0.0, %v1451_v25  ;;  %v1996_v25 = vsel %vm703_vm3, %v1992_v24, 0.0 }
 0xaf9   :  { %v1449_v27 = vpop.permute.xlu0 %1448  ;;  %v1464_v29 = vsel %vm6942_vm11, %v1461_v26, 0.0 }
 0xafa   :  { %v1460_v28 = vsel %vm696_vm13, 0.0, %v1449_v27 }
 0xafb   :  { %v1457_v30 = vpop.permute.xlu1 %1456  ;;  %v1463_v32 = vsel %vm6942_vm11, %v1460_v28, 0.0 }
 0xafc   :  { %v1467_v31 = vsel %vm6941_vm12, %v1464_v29, %v1457_v30 }
 0xafd   :  { %5234 = vmatpush3.msk.msra.mxu1 %vm990_vm9, %v1467_v31  ;;  %v1455_v33 = vpop.permute.xlu0 %1454 }
 0xafe   :  { %v1466_v35 = vsel %vm6941_vm12, %v1463_v32, %v1455_v33  ;;  %5235 = vmatprep.subr.mxu1 %v6947_v43 }
 0xaff   :  { %5236 = vmatpush3.msk.msra.mxu1 %vm990_vm9, %v1466_v35 }
 0xb00   :  { %5238 = vmatmul.mubr.msk.f32.vlgmr.msra.gmra.mxu1 %vm23_vm0, %v1442_v34 }
 0xb01   :  { %5240 = vmatprep.mubr.msk.f32.mxu1 %vm5549_vm10, %v6947_v43 }
 0xb04   :  { %5241 = vmatmul.mubr.msk.f32.gmra.mxu1 %vm23_vm0, %v1443_v36 }
 0xb05   :  { %5243 = vmatprep.mubr.msk.f32.mxu1 %vm5549_vm10, %v6947_v43 }
 0xb08   :  { %5244 = vmatmul.mubr.msk.f32.gmra.mxu1 %vm23_vm0, %v1444_v37  ;;  %v1572_v61 = vpop.permute.xlu1 %1571 }
 0xb09   :  { %5261 = vmatprep.mubr.msk.f32.mxu1 %vm703_vm3, %v1698_v40 }
 0xbc0   :  { %v1545_v47 = vpop.f32.mrf.mxu1 }
 0xbc2   :  { %v5239_v48 = vpop.f32.mrf.mxu1 }
 0xbc4   :  { %v1550_v49 = vpop.f32.mrf.mxu1 }
 0xbc5   :  { %1560 = vrot.lane.b32.xlu0 %v1550_v49, %s5542_s17 }
 0xbc6   :  { %v5242_v50 = vpop.f32.mrf.mxu1 }
 0xbc8   :  { %v1555_v51 = vpop.f32.mrf.mxu1 }
 0xbc9   :  { %1565 = vrot.lane.b32.xlu1 %v1555_v51, %s5543_s18 }
 0xbca   :  { %v5245_v52 = vpop.f32.mrf.mxu1 }
 0xbed   :  { %1785 = vadd.xlane.f32.xlu1 %v1784_v54 }
 0xbfe   :  { %1675 = vrot.lane.b32.xlu1 %v1665_v41, %s5542_s17  ;;  %v6087_v41 = vadd.s32 8, %v5622_v21 }
 0xc02   :  { %1680 = vrot.lane.b32.xlu1 %v1670_v44, %s5543_s18 }
 0xc26   :  { %1994 = vadd.xlane.f32.xlu1 %v1993_v59  ;;  %v2193_v59 = vld [vmem:[%s6938_s2 + $0x5f8] sm:$0xff] }
 0xc37   :  { %v1561_v62 = vpop.permute.xlu0 %1560  ;;  %2275 = vperm.xlu1 %5524, %v5827_v56  }
 0xc38   :  { %v1563_v63 = vadd.f32 %v1561_v62, %v1545_v47 }
 0xc3b   :  { %v1566_v0 = vpop.permute.xlu1 %1565  ;;  %5525 = vset.pattern.permute.xlu1 %v5538_v1 }
 0xc3c   :  { %v1568_v3 = vadd.f32 %v1566_v0, %v1563_v63 }
 0xc3e   :  { %v1574_v4 = vadd.f32 %v1572_v61, %v1568_v3 }
 0xc40   :  { %1576 = vrot.lane.b32.xlu0 %v1574_v4, %s5543_s18 }
 0xc5f   :  { %1788 = vadd.xlane.f32.xlu0 %v1787_v9 }
 0xc75   :  { %1686 = vperm.xlu0 %5523, %v1584_v10  }
 0xc76   :  { %v1786_v13 = vpop.xlane.xlu1 %1785 }
 0xc7a   :  { %v1676_v15 = vpop.permute.xlu1 %1675 }
 0xc7b   :  { %v1678_v16 = vadd.f32 %v1676_v15, %v1660_v39 }
 0xc7e   :  { %v1681_v18 = vpop.permute.xlu1 %1680 }
 0xc7f   :  { %v1683_v19 = vadd.f32 %v1681_v18, %v1678_v16 }
 0xcb2   :  { %v1577_v11 = vpop.permute.xlu0 %1576 }
 0xcb3   :  { %v6063_v1 = vsel %vm6943_vm14, %v1574_v4, %v1577_v11 }
 0xcb4   :  { %5259 = vmatprep.subr.mxu1 %v6063_v1 }
 0xcb5   :  { %5260 = vmatpush3.msra.mxu1 %v6063_v1 }
 0xcb6   :  { %5262 = vmatmul.mubr.msk.f32.vlgmr.msra.gmra.mxu1 %vm703_vm3, %v1699_v5  ;;  %v1995_v5 = vpop.xlane.xlu1 %1994 }
 0xcb7   :  { %5273 = vmatprep.mubr.msk.f32.mxu1 %vm703_vm3, %v1907_v55  ;;  %v5555_v55 = vmov 1.0  }
 0xce8   :  { %v1789_v17 = vpop.xlane.xlu0 %1788 }
 0xcf0   :  { %v1687_v20 = vpop.permute.xlu0 %1686 }
 0xcf1   :  { %v1689_v22 = vadd.f32 %v1687_v20, %v1683_v19 }
 0xcf3   :  { %1691 = vrot.lane.b32.xlu0 %v1689_v22, %s5543_s18 }
 0xd12   :  { %1997 = vadd.xlane.f32.xlu0 %v1996_v25 }
 0xd28   :  { %2271 = vperm.xlu0 %5523, %v5827_v56  }
 0xd65   :  { %v1692_v26 = vpop.permute.xlu0 %1691 }
 0xd66   :  { %v6076_v27 = vsel %vm703_vm3, %v1689_v22, %v1692_v26 }
 0xd67   :  { %5271 = vmatprep.subr.mxu1 %v6076_v27 }
 0xd68   :  { %5272 = vmatpush3.msra.mxu1 %v6076_v27 }
 0xd69   :  { %5274 = vmatmul.mubr.msk.f32.vlgmr.msra.gmra.mxu1 %vm703_vm3, %v1908_v23  ;;  %5283 = vmatprep.subr.mxu1 %v6947_v43 }
 0xd6a   :  { %5285 = vmatprep.mubr.msk.f32.mxu1 %vm5549_vm10, %v6947_v43  ;;  %5284 = vmatpush3.msra.mxu1 %v2193_v59 }
 0xd76   :  { %v5263_v28 = vpop.f32.mrf.mxu1 }
 0xd77   :  { %v1791_v29 = vmul.f32 2.0, %v5263_v28 }
 0xd78   :  { %v1773_v30 = vpop.f32.mrf.mxu1 }
 0xd79   :  { %v1793_v31 = vsub.f32 %v1789_v17, %v1791_v29  ;;  %v1790_v56 = vmul.f32 2.0, %v1773_v30 }
 0xd7b   :  { %v1792_v32 = vsub.f32 %v1786_v13, %v1790_v56  ;;  %v1795_v33 = vsel %vm703_vm3, %v1793_v31, inf }
 0xd7d   :  { %v1794_v34 = vsel %vm703_vm3, %v1792_v32, inf }
 0xd7e   :  { %v1796_v35 = vmin.f32 %v1794_v34, %v1795_v33 }
 0xd80   :  { %v1797_v36 = vrot.slane %v1796_v35, 4 }
 0xd82   :  { %v1798_v37 = vmin.f32 %v1796_v35, %v1797_v36 }
 0xd84   :  { %v1799_v40 = vrot.slane %v1798_v37, 2 }
 0xd86   :  { %v1800_v39 = vmin.f32 %v1798_v37, %v1799_v40  ;;  %v2291_v37 = vld [vmem:[%s6938_s2 + $0x270] sm:$0xff] }
 0xd87   :  { %v2279_v40 = vld [vmem:[%s6938_s2 + $0x210] sm:$0xff] }
 0xd88   :  { %v1801_v38 = vrot.slane %v1800_v39, 1 }
 0xd8a   :  { %v1802_v42 = vmin.f32 %v1800_v39, %v1801_v38 }
 0xd8c   :  { %vm1803_vm4 = vcmp.le.f32.partialorder %v1792_v32, %v1802_v42  ;;  %vm1804_vm7 = vcmp.le.f32.partialorder %v1793_v31, %v1802_v42  ;;  %v1909_v32 = vld [vmem:[%s6938_s2 + $0x580] sm:$0xff] }
 0xd8d   :  { %v1805_v44 = vsel %vm1803_vm4, %v5622_v21, 16  ;;  %v1806_v45 = vsel %vm1804_vm7, %v6087_v41, 16 }
 0xd8e   :  { %v1807_v46 = vsel %vm703_vm3, %v1805_v44, 2147483647  ;;  %v1808_v47 = vsel %vm703_vm3, %v1806_v45, 2147483647  ;;  %v6157_v44 = vpop.permute.xlu1 %2275 }
 0xd8f   :  { %vm1809_vm12 = vcmp.lt.s32.totalorder %v1807_v46, %v1808_v47 }
 0xd90   :  { %v1810_v48 = vsel %vm1809_vm12, %v1807_v46, %v1808_v47  ;;  %v2318_v46 = vld [vmem:[%s6938_s2 + $0x348] sm:$0xff]  ;;  %v2316_v47 = vld [vmem:[%s6938_s2 + $0x338] sm:$0xff] }
 0xd91   :  { %v1811_v49 = vrot.slane %v1810_v48, 4 }
 0xd93   :  { %vm1812_vm11 = vcmp.lt.s32.totalorder %v1810_v48, %v1811_v49 }
 0xd94   :  { %v1813_v50 = vsel %vm1812_vm11, %v1810_v48, %v1811_v49  ;;  %v2317_v48 = vld [vmem:[%s6938_s2 + $0x340] sm:$0xff] }
 0xd95   :  { %v1814_v51 = vrot.slane %v1813_v50, 2 }
 0xd97   :  { %vm1815_vm14 = vcmp.lt.s32.totalorder %v1813_v50, %v1814_v51 }
 0xd98   :  { %v1816_v52 = vsel %vm1815_vm14, %v1813_v50, %v1814_v51 }
 0xd99   :  { %v1817_v53 = vrot.slane %v1816_v52, 1 }
 0xd9b   :  { %vm1818_vm5 = vcmp.lt.s32.totalorder %v1816_v52, %v1817_v53  ;;  %v1998_v63 = vpop.xlane.xlu0 %1997 }
 0xd9c   :  { %v6093_v54 = vsel %vm1818_vm5, %v1816_v52, %v1817_v53  ;;  %v2280_v52 = vld [vmem:[%s6938_s2 + $0x218] sm:$0xff] }
 0xd9d   :  { %vm6946_vm4 = vcmp.eq.s32.totalorder %v6087_v41, %v6093_v54  ;;  %vm1820_vm11 = vcmp.eq.s32.totalorder %v5622_v21, %v6093_v54 }
 0xd9e   :  { %5265 = vmatpush3.msk.msra.mxu0 %vm6946_vm4, %v5555_v55 }
 0xd9f   :  { %5266 = vmatprep.subr.mxu0 %v6947_v43 }
 0xda0   :  { %5267 = vmatpush3.msk.msra.mxu0 %vm1820_vm11, %v5555_v55 }
 0xda1   :  { %5269 = vmatmul.mubr.msk.f32.vlgmr.msra.gmra.mxu0 %vm23_vm0, %v1700_v57  ;;  %5276 = vmatprep.subr.mxu0 %v6947_v43  ;;  %v2281_v57 = vld [vmem:[%s6938_s2 + $0x220] sm:$0xff] }
 0xda2   :  { %5280 = vmatprep.mubr.msk.f32.mxu0 %vm5549_vm10, %v6947_v43 }
 0xda3   :  { %v6153_v38 = vpop.permute.xlu0 %2271 }
 0xda4   :  { %v2278_v45 = vsel %vm703_vm3, %v6153_v38, %v6157_v44 }
 0xe29   :  { %v5275_v61 = vpop.f32.mrf.mxu1 }
 0xe2a   :  { %v2000_v62 = vmul.f32 2.0, %v5275_v61  ;;  %v2282_v61 = vld [vmem:[%s6938_s2 + $0x228] sm:$0xff] }
 0xe2b   :  { %v1982_v0 = vpop.f32.mrf.mxu1 }
 0xe2c   :  { %v2002_v3 = vsub.f32 %v1998_v63, %v2000_v62  ;;  %v1999_v4 = vmul.f32 2.0, %v1982_v0 }
 0xe2e   :  { %v2004_v7 = vsel %vm23_vm0, %v2002_v3, inf  ;;  %v2001_v9 = vsub.f32 %v1995_v5, %v1999_v4 }
 0xe30   :  { %v2003_v10 = vsel %vm23_vm0, %v2001_v9, inf }
 0xe31   :  { %v2005_v11 = vmin.f32 %v2003_v10, %v2004_v7  ;;  %v2292_v7 = vld [vmem:[%s6938_s2 + $0x278] sm:$0xff] }
 0xe33   :  { %v2006_v13 = vrot.slane %v2005_v11, 4 }
 0xe35   :  { %v2007_v15 = vmin.f32 %v2005_v11, %v2006_v13  ;;  %v2284_v11 = vld [vmem:[%s6938_s2 + $0x238] sm:$0xff] }
 0xe37   :  { %v2008_v16 = vrot.slane %v2007_v15, 2 }
 0xe39   :  { %v2009_v17 = vmin.f32 %v2007_v15, %v2008_v16 }
 0xe3b   :  { %v2010_v18 = vrot.slane %v2009_v17, 1 }
 0xe3d   :  { %v2011_v19 = vmin.f32 %v2009_v17, %v2010_v18  ;;  %v2285_v17 = vld [vmem:[%s6938_s2 + $0x240] sm:$0xff] }
 0xe3f   :  { %vm2012_vm5 = vcmp.le.f32.partialorder %v2001_v9, %v2011_v19  ;;  %vm2013_vm12 = vcmp.le.f32.partialorder %v2002_v3, %v2011_v19  ;;  %v2283_v3 = vld [vmem:[%s6938_s2 + $0x230] sm:$0xff]  ;;  %v2293_v9 = vld [vmem:[%s6938_s2 + $0x280] sm:$0xff]  ;;  %v2294_v19 = vld [vmem:[%s6938_s2 + $0x288] sm:$0xff] }
 0xe40   :  { %v2014_v20 = vsel %vm2012_vm5, %v5622_v21, 16  ;;  %v2015_v22 = vsel %vm2013_vm12, %v6087_v41, 16 }
 0xe41   :  { %v2016_v23 = vsel %vm23_vm0, %v2014_v20, 2147483647  ;;  %v2017_v24 = vsel %vm23_vm0, %v2015_v22, 2147483647  ;;  %v2295_v22 = vld [vmem:[%s6938_s2 + $0x290] sm:$0xff] }
 0xe42   :  { %vm2018_vm14 = vcmp.lt.s32.totalorder %v2016_v23, %v2017_v24 }
 0xe43   :  { %v2019_v25 = vsel %vm2018_vm14, %v2016_v23, %v2017_v24  ;;  %v2286_v24 = vld [vmem:[%s6938_s2 + $0x248] sm:$0xff] }
 0xe44   :  { %v2020_v26 = vrot.slane %v2019_v25, 4 }
 0xe46   :  { %vm2021_vm7 = vcmp.lt.s32.totalorder %v2019_v25, %v2020_v26 }
 0xe47   :  { %v2022_v28 = vsel %vm2021_vm7, %v2019_v25, %v2020_v26  ;;  %v2287_v25 = vld [vmem:[%s6938_s2 + $0x250] sm:$0xff]  ;;  %v2296_v26 = vld [vmem:[%s6938_s2 + $0x298] sm:$0xff] }
 0xe48   :  { %v2023_v29 = vrot.slane %v2022_v28, 2 }
 0xe4a   :  { %vm2024_vm1 = vcmp.lt.s32.totalorder %v2022_v28, %v2023_v29 }
 0xe4b   :  { %v2025_v30 = vsel %vm2024_vm1, %v2022_v28, %v2023_v29  ;;  %v2297_v28 = vld [vmem:[%s6938_s2 + $0x2a0] sm:$0xff]  ;;  %v2288_v29 = vld [vmem:[%s6938_s2 + $0x258] sm:$0xff]  ;;  %vm3074_vm1 = vcmask 261120  }
 0xe4c   :  { %v2026_v31 = vrot.slane %v2025_v30, 1 }
 0xe4e   :  { %vm2027_vm4 = vcmp.lt.s32.totalorder %v2025_v30, %v2026_v31 }
 0xe4f   :  { %v6122_v56 = vsel %vm2027_vm4, %v2025_v30, %v2026_v31  ;;  %v2289_v30 = vld [vmem:[%s6938_s2 + $0x260] sm:$0xff]  ;;  %v2298_v31 = vld [vmem:[%s6938_s2 + $0x2a8] sm:$0xff] }
 0xe50   :  { %vm2030_vm5 = vcmp.eq.s32.totalorder %v6087_v41, %v6122_v56  ;;  %vm2029_vm12 = vcmp.eq.s32.totalorder %v5622_v21, %v6122_v56 }
 0xe51   :  { %5277 = vmatpush3.msk.msra.mxu0 %vm2030_vm5, %v5555_v55 }
 0xe52   :  { %5278 = vmatprep.subr.mxu0 %v6947_v43 }
 0xe53   :  { %5279 = vmatpush3.msk.msra.mxu0 %vm2029_vm12, %v5555_v55 }
 0xe54   :  { %5281 = vmatmul.mubr.msk.f32.vlgmr.msra.gmra.mxu0 %vm23_vm0, %v1909_v32  ;;  %v2299_v32 = vld [vmem:[%s6938_s2 + $0x2b0] sm:$0xff] }
 0xe55   :  { %5290 = vmatprep.mubr.msk.f32.mxu0 %vm703_vm3, %v2279_v40  ;;  %v2301_v40 = vld [vmem:[%s6938_s2 + $0x2c0] sm:$0xff] }
 0xe61   :  { %v6139_v33 = vpop.f32.mrf.mxu0 }
 0xe62   :  { %5286 = vmatmul.mubr.msk.f32.vlgmr.msra.gmra.mxu1 %vm703_vm3, %v6139_v33 }
 0xe63   :  { %v5270_v34 = vpop.f32.mrf.mxu0  ;;  %5310 = vmatprep.mubr.msk.f32.mxu1 %vm703_vm3, %v2291_v37  ;;  %v2300_v37 = vld [vmem:[%s6938_s2 + $0x2b8] sm:$0xff] }
 0xe64   :  { %v2290_v34 = vld [vmem:[%s6938_s2 + $0x268] sm:$0xff] }
 0xf14   :  { %v6143_v35 = vpop.f32.mrf.mxu0 }
 0xf16   :  { %v5282_v36 = vpop.f32.mrf.mxu0 }
 0xf17   :  { %v2303_v36 = vld [vmem:[%s6938_s2 + $0x2d0] sm:$0xff] }
 0xf22   :  { %v2265_v39 = vpop.f32.mrf.mxu1 }
 0xf23   :  { %2323 = vrot.lane.b32.xlu0 %v2265_v39, %s5546_s23  ;;  %2320 = vrot.lane.b32.xlu1 %v2265_v39, %s5553_s8  ;;  %v2304_v39 = vld [vmem:[%s6938_s2 + $0x2d8] sm:$0xff] }
 0xf24   :  { %v5287_v42 = vpop.f32.mrf.mxu1 }
 0xf25   :  { %v2305_v42 = vld [vmem:[%s6938_s2 + $0x2e0] sm:$0xff] }
 0xf27   :  { %2751 = vrot.lane.b32.xlu0 %v5829_v58, %s5553_s8  ;;  %2532 = vrot.lane.b32.xlu1 %v2278_v45, %s5553_s8 }
 0xf2b   :  { %2749 = vrot.lane.b32.xlu0 %v5835_v60, %s5553_s8  ;;  %2535 = vrot.lane.b32.xlu1 %v2278_v45, %s5546_s23  ;;  %v2302_v45 = vld [vmem:[%s6938_s2 + $0x2c8] sm:$0xff] }
 0xf2f   :  { %2755 = vrot.lane.b32.xlu0 %v5835_v60, %s5546_s23  ;;  %2757 = vrot.lane.b32.xlu1 %v5829_v58, %s5546_s23 }
 0xf33   :  { %2991 = vperm.xlu0 %5523, %v2318_v46   ;;  %2986 = vperm.xlu1 %5525, %v2317_v48   ;;  %v2306_v46 = vld [vmem:[%s6938_s2 + $0x2e8] sm:$0xff]  ;;  %v2308_v48 = vld [vmem:[%s6938_s2 + $0x2f8] sm:$0xff] }
 0xf37   :  { %2981 = vperm.xlu0 %5523, %v2316_v47   ;;  %v2307_v47 = vld [vmem:[%s6938_s2 + $0x2f0] sm:$0xff] }
 0xf95   :  { %v2324_v49 = vpop.permute.xlu0 %2323  ;;  %v2321_v60 = vpop.permute.xlu1 %2320 }
 0xf96   :  { %v2326_v50 = vsel %vm696_vm13, 0.0, %v2321_v60  ;;  %v2310_v60 = vld [vmem:[%s6938_s2 + $0x308] sm:$0xff] }
 0xf97   :  { %v2327_v58 = vsel %vm987_vm8, %v2326_v50, 0.0  ;;  %v2311_v50 = vld [vmem:[%s6938_s2 + $0x310] sm:$0xff] }
 0xf98   :  { %v2328_v51 = vsel %vm990_vm9, %v2327_v58, %v2324_v49  ;;  %v2309_v49 = vld [vmem:[%s6938_s2 + $0x300] sm:$0xff]  ;;  %v2312_v58 = vld [vmem:[%s6938_s2 + $0x318] sm:$0xff] }
 0xf99   :  { %v2752_v53 = vpop.permute.xlu0 %2751  ;;  %v2533_v55 = vpop.permute.xlu1 %2532  ;;  %5288 = vmatprep.subr.msk.mxu0 %vm304_vm6, %v2328_v51 }
 0xf9a   :  { %v2538_v59 = vsel %vm696_vm13, 0.0, %v2533_v55  ;;  %5289 = vmatpush3.msk.msra.mxu0 %vm304_vm6, %v2328_v51  ;;  %v2762_v4 = vsel %vm696_vm13, 0.0, %v2752_v53  ;;  %v2313_v51 = vld [vmem:[%s6938_s2 + $0x320] sm:$0xff] }
 0xf9b   :  { %5291 = vmatmul.mubr.msk.f32.vlgmr.msra.gmra.mxu0 %vm703_vm3, %v2280_v52  ;;  %v2539_v62 = vsel %vm987_vm8, %v2538_v59, 0.0  ;;  %v2764_v13 = vsel %vm987_vm8, %v2762_v4, 0.0  ;;  %v2314_v52 = vld [vmem:[%s6938_s2 + $0x328] sm:$0xff] }
 0xf9c   :  { %5293 = vmatprep.mubr.msk.f32.mxu0 %vm703_vm3, %v2281_v57 }
 0xf9d   :  { %v2750_v63 = vpop.permute.xlu0 %2749  ;;  %v2536_v0 = vpop.permute.xlu1 %2535 }
 0xf9e   :  { %v2540_v5 = vsel %vm990_vm9, %v2539_v62, %v2536_v0  ;;  %v2761_v10 = vsel %vm696_vm13, 0.0, %v2750_v63 }
 0xf9f   :  { %5308 = vmatprep.subr.msk.mxu1 %vm304_vm6, %v2540_v5  ;;  %5294 = vmatmul.mubr.msk.f32.gmra.mxu0 %vm703_vm3, %v2282_v61  ;;  %v2763_v20 = vsel %vm987_vm8, %v2761_v10, 0.0 }
 0xfa0   :  { %5309 = vmatpush3.msk.msra.mxu1 %vm304_vm6, %v2540_v5  ;;  %5296 = vmatprep.mubr.msk.f32.mxu0 %vm703_vm3, %v2283_v3 }
 0xfa1   :  { %v2756_v15 = vpop.permute.xlu0 %2755  ;;  %5311 = vmatmul.mubr.msk.f32.vlgmr.msra.gmra.mxu1 %vm703_vm3, %v2292_v7  ;;  %v2758_v16 = vpop.permute.xlu1 %2757 }
 0xfa2   :  { %v2766_v18 = vsel %vm990_vm9, %v2764_v13, %v2758_v16  ;;  %5313 = vmatprep.mubr.msk.f32.mxu1 %vm703_vm3, %v2293_v9  ;;  %v2765_v23 = vsel %vm990_vm9, %v2763_v20, %v2756_v15 }
 0xfa3   :  { %5328 = vmatprep.subr.msk.mxu0 %vm304_vm6, %v2766_v18  ;;  %5297 = vmatmul.mubr.msk.f32.gmra.mxu0 %vm703_vm3, %v2284_v11 }
 0xfa4   :  { %5329 = vmatpush3.msk.msra.mxu0 %vm304_vm6, %v2766_v18  ;;  %5299 = vmatprep.mubr.msk.f32.mxu0 %vm703_vm3, %v2285_v17 }
 0xfa5   :  { %5314 = vmatmul.mubr.msk.f32.gmra.mxu1 %vm703_vm3, %v2294_v19  ;;  %5330 = vmatprep.subr.msk.mxu0 %vm304_vm6, %v2765_v23 }
 0xfa6   :  { %5331 = vmatpush3.msk.msra.mxu0 %vm304_vm6, %v2765_v23  ;;  %5316 = vmatprep.mubr.msk.f32.mxu1 %vm703_vm3, %v2295_v22 }
 0xfa7   :  { %5300 = vmatmul.mubr.msk.f32.gmra.mxu0 %vm703_vm3, %v2286_v24 }
 0xfa8   :  { %5302 = vmatprep.mubr.msk.f32.mxu0 %vm703_vm3, %v2287_v25 }
 0xfa9   :  { %5317 = vmatmul.mubr.msk.f32.gmra.mxu1 %vm703_vm3, %v2296_v26 }
 0xfaa   :  { %5319 = vmatprep.mubr.msk.f32.mxu1 %vm703_vm3, %v2297_v28 }
 0xfab   :  { %5303 = vmatmul.mubr.msk.f32.gmra.mxu0 %vm703_vm3, %v2288_v29 }
 0xfac   :  { %5305 = vmatprep.mubr.msk.f32.mxu0 %vm703_vm3, %v2289_v30 }
 0xfad   :  { %5320 = vmatmul.mubr.msk.f32.gmra.mxu1 %vm703_vm3, %v2298_v31 }
 0xfae   :  { %5322 = vmatprep.mubr.msk.f32.mxu1 %vm703_vm3, %v2299_v32 }
 0xfaf   :  { %5306 = vmatmul.mubr.msk.f32.gmra.mxu0 %vm703_vm3, %v2290_v34 }
 0xfb0   :  { %5332 = vmatprep.mubr.msk.f32.mxu0 %vm23_vm0, %v2303_v36 }
 0xfb1   :  { %5323 = vmatmul.mubr.msk.f32.gmra.mxu1 %vm703_vm3, %v2300_v37 }
 0xfb2   :  { %5325 = vmatprep.mubr.msk.f32.mxu1 %vm703_vm3, %v2301_v40 }
 0xfb3   :  { %5333 = vmatmul.mubr.msk.f32.vlgmr.msra.gmra.mxu0 %vm23_vm0, %v2304_v39  ;;  %v2315_v39 = vld [vmem:[%s6938_s2 + $0x330] sm:$0xff] }
 0xfb4   :  { %5335 = vmatprep.mubr.msk.f32.mxu0 %vm23_vm0, %v2305_v42  ;;  %v2992_v42 = vpop.permute.xlu0 %2991 }
 0xfb5   :  { %5326 = vmatmul.mubr.msk.f32.gmra.mxu1 %vm703_vm3, %v2302_v45  ;;  %v2987_v45 = vpop.permute.xlu1 %2986 }
 0xfb7   :  { %5336 = vmatmul.mubr.msk.f32.gmra.mxu0 %vm23_vm0, %v2306_v46 }
 0xfb8   :  { %5338 = vmatprep.mubr.msk.f32.mxu0 %vm23_vm0, %v2307_v47  ;;  %v2982_v46 = vpop.permute.xlu0 %2981 }
 0xfbb   :  { %5339 = vmatmul.mubr.msk.f32.gmra.mxu0 %vm23_vm0, %v2308_v48 }
 0xfbc   :  { %5341 = vmatprep.mubr.msk.f32.mxu0 %vm23_vm0, %v2309_v49 }
 0xfbf   :  { %5342 = vmatmul.mubr.msk.f32.gmra.mxu0 %vm23_vm0, %v2310_v60 }
 0xfc0   :  { %5344 = vmatprep.mubr.msk.f32.mxu0 %vm23_vm0, %v2311_v50 }
 0xfc3   :  { %5345 = vmatmul.mubr.msk.f32.gmra.mxu0 %vm23_vm0, %v2312_v58 }
 0xfc4   :  { %5347 = vmatprep.mubr.msk.f32.mxu0 %vm23_vm0, %v2313_v51 }
 0xfc7   :  { %5348 = vmatmul.mubr.msk.f32.gmra.mxu0 %vm23_vm0, %v2314_v52 }
0x105b   :  { %v6337_v53 = vpop.f32.mrf.mxu0 }
0x105d   :  { %v6339_v55 = vpop.f32.mrf.mxu0 }
0x105f   :  { %v6341_v57 = vpop.f32.mrf.mxu0 }
0x1061   :  { %v6343_v59 = vpop.f32.mrf.mxu1  ;;  %v6345_v61 = vpop.f32.mrf.mxu0 }
0x1063   :  { %v6347_v62 = vpop.f32.mrf.mxu1  ;;  %v5298_v63 = vpop.f32.mrf.mxu0 }
0x1065   :  { %v6349_v0 = vpop.f32.mrf.mxu1  ;;  %v2452_v3 = vpop.f32.mrf.mxu0 }
0x1067   :  { %v6351_v4 = vpop.f32.mrf.mxu1  ;;  %v5301_v5 = vpop.f32.mrf.mxu0 }
0x1069   :  { %v5318_v7 = vpop.f32.mrf.mxu1  ;;  %v2462_v9 = vpop.f32.mrf.mxu0 }
0x106a   :  { %2709 = vrot.lane.b32.xlu1 %v5318_v7, %s5542_s17 }
0x106b   :  { %v2664_v10 = vpop.f32.mrf.mxu1  ;;  %v5304_v11 = vpop.f32.mrf.mxu0 }
0x106c   :  { %2707 = vrot.lane.b32.xlu0 %v2664_v10, %s5542_s17 }
0x106d   :  { %v5321_v13 = vpop.f32.mrf.mxu1  ;;  %v2472_v15 = vpop.f32.mrf.mxu0 }
0x106f   :  { %v2674_v16 = vpop.f32.mrf.mxu1  ;;  %v5307_v17 = vpop.f32.mrf.mxu0 }
0x1070   :  { %2713 = vrot.lane.b32.xlu0 %v5321_v13, %s5542_s17  ;;  %2711 = vrot.lane.b32.xlu1 %v2674_v16, %s5542_s17 }
0x1071   :  { %v5324_v18 = vpop.f32.mrf.mxu1  ;;  %v2482_v19 = vpop.f32.mrf.mxu0 }
0x1073   :  { %v2684_v20 = vpop.f32.mrf.mxu1  ;;  %v6357_v22 = vpop.f32.mrf.mxu0 }
0x1074   :  { %2729 = vrot.lane.b32.xlu1 %v5324_v18, %s5543_s18  ;;  %2727 = vrot.lane.b32.xlu0 %v2684_v20, %s5543_s18 }
0x1075   :  { %v5327_v23 = vpop.f32.mrf.mxu1  ;;  %v6361_v24 = vpop.f32.mrf.mxu0 }
0x1077   :  { %v5337_v25 = vpop.f32.mrf.mxu0  ;;  %v2694_v26 = vpop.f32.mrf.mxu1 }
0x1078   :  { %2733 = vrot.lane.b32.xlu0 %v5327_v23, %s5543_s18  ;;  %2497 = vrot.lane.b32.xlu1 %v5298_v63, %s5542_s17 }
0x1079   :  { %v6365_v28 = vpop.f32.mrf.mxu0 }
0x107b   :  { %v5340_v29 = vpop.f32.mrf.mxu0 }
0x107c   :  { %2731 = vrot.lane.b32.xlu0 %v2694_v26, %s5543_s18  ;;  %2501 = vrot.lane.b32.xlu1 %v5301_v5, %s5542_s17 }
0x107d   :  { %v2891_v30 = vpop.f32.mrf.mxu0 }
0x107f   :  { %v5343_v31 = vpop.f32.mrf.mxu0 }
0x1080   :  { %2495 = vrot.lane.b32.xlu0 %v2452_v3, %s5542_s17  ;;  %2499 = vrot.lane.b32.xlu1 %v2462_v9, %s5542_s17 }
0x1081   :  { %v2901_v32 = vpop.f32.mrf.mxu0 }
0x1083   :  { %v5346_v34 = vpop.f32.mrf.mxu0 }
0x1084   :  { %2517 = vrot.lane.b32.xlu1 %v5304_v11, %s5543_s18  ;;  %2521 = vrot.lane.b32.xlu0 %v5307_v17, %s5543_s18 }
0x1085   :  { %v2911_v36 = vpop.f32.mrf.mxu0 }
0x1087   :  { %v5349_v37 = vpop.f32.mrf.mxu0 }
0x1088   :  { %2515 = vrot.lane.b32.xlu1 %v2472_v15, %s5543_s18  ;;  %2519 = vrot.lane.b32.xlu0 %v2482_v19, %s5543_s18 }
0x1089   :  { %v2921_v40 = vpop.f32.mrf.mxu0 }
0x108c   :  { %2936 = vrot.lane.b32.xlu0 %v5340_v29, %s5542_s17  ;;  %2934 = vrot.lane.b32.xlu1 %v2891_v30, %s5542_s17 }
0x1090   :  { %2940 = vrot.lane.b32.xlu1 %v5343_v31, %s5542_s17  ;;  %2960 = vrot.lane.b32.xlu0 %v5349_v37, %s5543_s18 }
0x1094   :  { %2938 = vrot.lane.b32.xlu1 %v2901_v32, %s5542_s17  ;;  %2956 = vrot.lane.b32.xlu0 %v5346_v34, %s5543_s18 }
0x1098   :  { %2954 = vrot.lane.b32.xlu0 %v2911_v36, %s5543_s18  ;;  %2958 = vrot.lane.b32.xlu1 %v2921_v40, %s5543_s18 }
0x109c   :  { %2976 = vperm.xlu1 %5525, %v2315_v39  }
0x10dc   :  { %v2710_v47 = vpop.permute.xlu1 %2709 }
0x10dd   :  { %v2720_v23 = vadd.f32 %v6343_v59, %v2710_v47 }
0x10de   :  { %v2708_v48 = vpop.permute.xlu0 %2707 }
0x10e2   :  { %v2714_v49 = vpop.permute.xlu0 %2713  ;;  %v2712_v60 = vpop.permute.xlu1 %2711 }
0x10e3   :  { %v2722_v18 = vadd.f32 %v6349_v0, %v2714_v49 }
0x10e6   :  { %v2730_v50 = vpop.permute.xlu1 %2729  ;;  %v2728_v58 = vpop.permute.xlu0 %2727 }
0x10e7   :  { %v2740_v34 = vadd.f32 %v2730_v50, %v2720_v23  ;;  %v3022_v23 = vld [vmem:[%s6938_s2 + $0x350] sm:$0xff] }
0x10e8   :  { %5358 = vmatprep.mubr.msk.f32.mxu1 %vm3074_vm1, %v3022_v23 }
0x10ea   :  { %v2734_v51 = vpop.permute.xlu0 %2733  ;;  %v2498_v52 = vpop.permute.xlu1 %2497 }
0x10eb   :  { %v2508_v19 = vadd.f32 %v6337_v53, %v2498_v52  ;;  %v2742_v30 = vadd.f32 %v2734_v51, %v2722_v18 }
0x10ee   :  { %v2732_v63 = vpop.permute.xlu0 %2731  ;;  %v2502_v3 = vpop.permute.xlu1 %2501 }
0x10ef   :  { %v2510_v17 = vadd.f32 %v6341_v57, %v2502_v3  ;;  %v2721_v57 = vadd.f32 %v2712_v60, %v6351_v4 }
0x10f1   :  { %v2741_v47 = vadd.f32 %v2732_v63, %v2721_v57 }
0x10f2   :  { %v2496_v5 = vpop.permute.xlu0 %2495  ;;  %v2500_v7 = vpop.permute.xlu1 %2499 }
0x10f3   :  { %v2509_v36 = vadd.f32 %v2500_v7, %v6345_v61  ;;  %v2507_v4 = vadd.f32 %v2496_v5, %v6339_v55 }
0x10f6   :  { %v2518_v9 = vpop.permute.xlu1 %2517  ;;  %v2522_v10 = vpop.permute.xlu0 %2521 }
0x10f7   :  { %v2530_v20 = vadd.f32 %v2522_v10, %v2510_v17  ;;  %v2528_v31 = vadd.f32 %v2518_v9, %v2508_v19 }
0x10f9   :  { %v2746_v37 = vadd.f32 %v2742_v30, %v2530_v20  ;;  %v2744_v53 = vadd.f32 %v2740_v34, %v2528_v31  ;;  %v3028_v31 = vld [vmem:[%s6938_s2 + $0x380] sm:$0xff] }
0x10fa   :  { %v2516_v11 = vpop.permute.xlu1 %2515  ;;  %v2520_v13 = vpop.permute.xlu0 %2519 }
0x10fb   :  { %v2529_v52 = vadd.f32 %v2520_v13, %v2509_v36  ;;  %v2719_v13 = vadd.f32 %v2708_v48, %v6347_v62  ;;  %v2527_v63 = vadd.f32 %v2516_v11, %v2507_v4  ;;  %v3024_v4 = vld [vmem:[%s6938_s2 + $0x360] sm:$0xff] }
0x10fd   :  { %v2745_v9 = vadd.f32 %v2741_v47, %v2529_v52 }
0x10fe   :  { %v2937_v15 = vpop.permute.xlu0 %2936  ;;  %v2935_v16 = vpop.permute.xlu1 %2934 }
0x10ff   :  { %v2947_v40 = vadd.f32 %v6357_v22, %v2937_v15 }
0x1102   :  { %v2941_v26 = vpop.permute.xlu1 %2940  ;;  %v2961_v29 = vpop.permute.xlu0 %2960 }
0x1103   :  { %v2949_v32 = vadd.f32 %v5337_v25, %v2941_v26 }
0x1105   :  { %v2969_v39 = vadd.f32 %v2961_v29, %v2949_v32  ;;  %v3029_v32 = vld [vmem:[%s6938_s2 + $0x388] sm:$0xff] }
0x1106   :  { %v2939_v0 = vpop.permute.xlu1 %2938  ;;  %v2957_v49 = vpop.permute.xlu0 %2956 }
0x1107   :  { %v2973_v3 = vadd.f32 %v2969_v39, %v2746_v37  ;;  %v2967_v59 = vadd.f32 %v2957_v49, %v2947_v40  ;;  %v2948_v51 = vadd.f32 %v2939_v0, %v6365_v28  ;;  %v2739_v28 = vadd.f32 %v2728_v58, %v2719_v13  ;;  %v3025_v13 = vld [vmem:[%s6938_s2 + $0x368] sm:$0xff] }
0x1109   :  { %v2997_v10 = vadd.f32 %v2992_v42, %v2973_v3  ;;  %v2971_v25 = vadd.f32 %v2967_v59, %v2744_v53  ;;  %v2946_v42 = vadd.f32 %v2935_v16, %v6361_v24  ;;  %v2743_v18 = vadd.f32 %v2739_v28, %v2527_v63  ;;  %v3026_v63 = vld [vmem:[%s6938_s2 + $0x370] sm:$0xff] }
0x110a   :  { %v2959_v50 = vpop.permute.xlu1 %2958  ;;  %v2955_v60 = vpop.permute.xlu0 %2954 }
0x110b   :  { %v2968_v61 = vadd.f32 %v2959_v50, %v2948_v51  ;;  %3008 = vrot.lane.b32.xlu1 %v2997_v10, %s5543_s18  ;;  %v2995_v22 = vadd.f32 %v2982_v46, %v2971_v25  ;;  %v2966_v17 = vadd.f32 %v2955_v60, %v2946_v42  ;;  %v2195_v60 = vld [vmem:[%s6938_s2 + $0x608] sm:$0xff]  ;;  %v3027_v42 = vld [vmem:[%s6938_s2 + $0x378] sm:$0xff] }
0x110d   :  { %v2972_v7 = vadd.f32 %v2968_v61, %v2745_v9  ;;  %v2970_v19 = vadd.f32 %v2966_v17, %v2743_v18 }
0x110f   :  { %v2996_v15 = vadd.f32 %v2987_v45, %v2972_v7  ;;  %3004 = vrot.lane.b32.xlu1 %v2995_v22, %s5543_s18  ;;  %v3023_v7 = vld [vmem:[%s6938_s2 + $0x358] sm:$0xff] }
0x1111   :  { %3006 = vrot.lane.b32.xlu0 %v2996_v15, %s5543_s18 }
0x1117   :  { %v2977_v20 = vpop.permute.xlu1 %2976 }
0x1118   :  { %v2994_v46 = vadd.f32 %v2977_v20, %v2970_v19 }
0x111a   :  { %3002 = vrot.lane.b32.xlu0 %v2994_v46, %s5543_s18 }
0x117d   :  { %v3009_v55 = vpop.permute.xlu1 %3008 }
0x117e   :  { %v3017_v45 = vsel %vm703_vm3, %v2997_v10, %v3009_v55 }
0x117f   :  { %v3021_v5 = vmax.f32 %v3017_v45, 0.0 }
0x1181   :  { %3040 = vrot.lane.b32.xlu1 %v3021_v5, %s5553_s8  ;;  %v3005_v62 = vpop.permute.xlu1 %3004 }
0x1182   :  { %v3015_v48 = vsel %vm703_vm3, %v2995_v22, %v3005_v62 }
0x1183   :  { %v3019_v24 = vmax.f32 %v3015_v48, 0.0  ;;  %v3007_v11 = vpop.permute.xlu0 %3006 }
0x1184   :  { %v3016_v58 = vsel %vm703_vm3, %v2996_v15, %v3007_v11  ;;  %v2194_v15 = vld [vmem:[%s6938_s2 + $0x600] sm:$0xff] }
0x1185   :  { %3052 = vrot.lane.b32.xlu1 %v3021_v5, %s5546_s23  ;;  %3036 = vrot.lane.b32.xlu0 %v3019_v24, %s5553_s8  ;;  %v3020_v16 = vmax.f32 %v3016_v58, 0.0 }
0x1189   :  { %3050 = vrot.lane.b32.xlu1 %v3020_v16, %s5546_s23  ;;  %3038 = vrot.lane.b32.xlu0 %v3020_v16, %s5553_s8 }
0x118c   :  { %v3003_v26 = vpop.permute.xlu0 %3002 }
0x118d   :  { %v3014_v29 = vsel %vm703_vm3, %v2994_v46, %v3003_v26  ;;  %3048 = vrot.lane.b32.xlu1 %v3019_v24, %s5546_s23 }
0x118e   :  { %v3018_v30 = vmax.f32 %v3014_v29, 0.0 }
0x1190   :  { %3034 = vrot.lane.b32.xlu0 %v3018_v30, %s5553_s8 }
0x1191   :  { %3210 = vperm.xlu1 %5525, %v3028_v31  }
0x1194   :  { %3046 = vrot.lane.b32.xlu0 %v3018_v30, %s5546_s23 }
0x1195   :  { %3215 = vperm.xlu1 %5525, %v3029_v32  }
0x11f3   :  { %v3041_v34 = vpop.permute.xlu1 %3040 }
0x11f4   :  { %v3061_v36 = vsel %vm696_vm13, 0.0, %v3041_v34 }
0x11f5   :  { %v3065_v37 = vsel %vm987_vm8, %v3061_v36, 0.0 }
0x11f7   :  { %v3037_v40 = vpop.permute.xlu0 %3036  ;;  %v3053_v39 = vpop.permute.xlu1 %3052 }
0x11f8   :  { %v3069_v57 = vsel %vm990_vm9, %v3065_v37, %v3053_v39  ;;  %v3059_v53 = vsel %vm696_vm13, 0.0, %v3037_v40  ;;  %v3385_v37 = vld [vmem:[%s6938_s2 + $0x390] sm:$0xff] }
0x11f9   :  { %5350 = vmatprep.subr.msk.mxu1 %vm304_vm6, %v3069_v57  ;;  %v3063_v47 = vsel %vm987_vm8, %v3059_v53, 0.0 }
0x11fa   :  { %5351 = vmatpush3.msk.msra.mxu1 %vm304_vm6, %v3069_v57 }
0x11fb   :  { %v3039_v0 = vpop.permute.xlu0 %3038  ;;  %v3051_v49 = vpop.permute.xlu1 %3050 }
0x11fc   :  { %v3060_v52 = vsel %vm696_vm13, 0.0, %v3039_v0 }
0x11fd   :  { %v3064_v3 = vsel %vm987_vm8, %v3060_v52, 0.0  ;;  %v3386_v52 = vld [vmem:[%s6938_s2 + $0x398] sm:$0xff] }
0x11fe   :  { %v3068_v59 = vsel %vm990_vm9, %v3064_v3, %v3051_v49  ;;  %v3387_v3 = vld [vmem:[%s6938_s2 + $0x3a0] sm:$0xff] }
0x11ff   :  { %5352 = vmatprep.subr.msk.mxu1 %vm304_vm6, %v3068_v59  ;;  %v3049_v10 = vpop.permute.xlu1 %3048 }
0x1200   :  { %v3067_v51 = vsel %vm990_vm9, %v3063_v47, %v3049_v10  ;;  %5353 = vmatpush3.msk.msra.mxu1 %vm304_vm6, %v3068_v59  ;;  %v3388_v59 = vld [vmem:[%s6938_s2 + $0x3a8] sm:$0xff]  ;;  %v3389_v47 = vld [vmem:[%s6938_s2 + $0x3b0] sm:$0xff]  ;;  %v3390_v10 = vld [vmem:[%s6938_s2 + $0x3b8] sm:$0xff] }
0x1201   :  { %5354 = vmatprep.subr.msk.mxu1 %vm304_vm6, %v3067_v51 }
0x1202   :  { %v3035_v25 = vpop.permute.xlu0 %3034  ;;  %5355 = vmatpush3.msk.msra.mxu1 %vm304_vm6, %v3067_v51  ;;  %v3391_v51 = vld [vmem:[%s6938_s2 + $0x3c0] sm:$0xff] }
0x1203   :  { %v3058_v50 = vsel %vm696_vm13, 0.0, %v3035_v25  ;;  %v3392_v25 = vld [vmem:[%s6938_s2 + $0x3c8] sm:$0xff] }
0x1204   :  { %v3062_v9 = vsel %vm987_vm8, %v3058_v50, 0.0  ;;  %v3393_v50 = vld [vmem:[%s6938_s2 + $0x3d0] sm:$0xff]  ;;  %vm4702_vm8 = vcmask 57344  }
0x1206   :  { %v3047_v61 = vpop.permute.xlu0 %3046 }
0x1207   :  { %v3066_v22 = vsel %vm990_vm9, %v3062_v9, %v3047_v61  ;;  %v3394_v9 = vld [vmem:[%s6938_s2 + $0x3d8] sm:$0xff]  ;;  %v3395_v61 = vld [vmem:[%s6938_s2 + $0x3e0] sm:$0xff]  ;;  %vm6958_vm9 = vcmask 56320  }
0x1208   :  { %5356 = vmatprep.subr.msk.mxu1 %vm304_vm6, %v3066_v22 }
0x1209   :  { %5357 = vmatpush3.msk.msra.mxu1 %vm304_vm6, %v3066_v22  ;;  %v3396_v22 = vld [vmem:[%s6938_s2 + $0x3e8] sm:$0xff] }
0x120a   :  { %5359 = vmatmul.mubr.msk.f32.vlgmr.msra.gmra.mxu1 %vm3074_vm1, %v3023_v7  ;;  %5367 = vmatprep.subr.mxu1 %v6947_v43  ;;  %v3397_v7 = vld [vmem:[%s6938_s2 + $0x3f0] sm:$0xff] }
0x120b   :  { %5361 = vmatprep.mubr.msk.f32.mxu1 %vm3074_vm1, %v3024_v4  ;;  %5368 = vmatpush3.msra.mxu1 %v2195_v60  ;;  %v3409_v4 = vld [vmem:[%s6938_s2 + $0x450] sm:$0xff] }
0x120c   :  { %5369 = vmatprep.subr.mxu1 %v6947_v43  ;;  %v3211_v5 = vpop.permute.xlu1 %3210  ;;  %5405 = vmatprep.mubr.msk.f32.mxu0 %vm23_vm0, %v3397_v7 }
0x120d   :  { %5370 = vmatpush3.msra.mxu1 %v2194_v15 }
0x120e   :  { %5362 = vmatmul.mubr.msk.f32.gmra.mxu1 %vm3074_vm1, %v3025_v13  ;;  %5374 = vmatprep.subr.mxu1 %v2195_v60  ;;  %v3384_v13 = vsel %vm23_vm0, %v6153_v38, %v6157_v44  ;;  %v3434_v38 = vld [vmem:[%s6938_s2 + $0x518] sm:$0xff]  ;;  %v3435_v44 = vld [vmem:[%s6938_s2 + $0x520] sm:$0xff] }
0x120f   :  { %5364 = vmatprep.mubr.msk.f32.mxu1 %vm3074_vm1, %v3026_v63  ;;  %v3436_v63 = vld [vmem:[%s6938_s2 + $0x528] sm:$0xff] }
0x1210   :  { %v3216_v48 = vpop.permute.xlu1 %3215 }
0x1212   :  { %5365 = vmatmul.mubr.msk.f32.gmra.mxu1 %vm3074_vm1, %v3027_v42 }
0x1213   :  { %5371 = vmatprep.mubr.msk.f32.mxu1 %vm5549_vm10, %v6947_v43 }
0x1216   :  { %5372 = vmatmul.mubr.msk.f32.vlgmr.msra.gmra.mxu1 %vm23_vm0, %v6143_v35 }
0x1217   :  { %5375 = vmatpush3.msra.mxu1 %v2195_v60 }
0x1218   :  { %5376 = vmatprep.subr.mxu1 %v2194_v15 }
0x1219   :  { %5377 = vmatpush3.msra.mxu1 %v2194_v15 }
0x12ca   :  { %v5360_v28 = vpop.f32.mrf.mxu1 }
0x12cc   :  { %v3159_v17 = vpop.f32.mrf.mxu1 }
0x12ce   :  { %v5363_v18 = vpop.f32.mrf.mxu1 }
0x12cf   :  { %3192 = vrot.lane.b32.xlu0 %v5363_v18, %s5542_s17 }
0x12d0   :  { %v3169_v19 = vpop.f32.mrf.mxu1 }
0x12d2   :  { %v5366_v20 = vpop.f32.mrf.mxu1 }
0x12d3   :  { %3190 = vrot.lane.b32.xlu0 %v3169_v19, %s5542_s17 }
0x12d4   :  { %v3179_v46 = vpop.f32.mrf.mxu1 }
0x12d5   :  { %3200 = vrot.lane.b32.xlu1 %v3179_v46, %s5543_s18 }
0x12d6   :  { %v3299_v55 = vpop.f32.mrf.mxu1 }
0x12d7   :  { %3202 = vrot.lane.b32.xlu0 %v5366_v20, %s5543_s18 }
0x12d8   :  { %v5373_v45 = vpop.f32.mrf.mxu1 }
0x1341   :  { %v3193_v62 = vpop.permute.xlu0 %3192 }
0x1342   :  { %v3197_v16 = vadd.f32 %v5360_v28, %v3193_v62 }
0x1345   :  { %v3191_v24 = vpop.permute.xlu0 %3190 }
0x1346   :  { %v3196_v11 = vadd.f32 %v3191_v24, %v3159_v17 }
0x1347   :  { %v3201_v58 = vpop.permute.xlu1 %3200 }
0x1348   :  { %v3206_v23 = vadd.f32 %v3201_v58, %v3196_v11 }
0x1349   :  { %v3203_v26 = vpop.permute.xlu0 %3202 }
0x134a   :  { %v3218_v29 = vadd.f32 %v3211_v5, %v3206_v23  ;;  %v3207_v30 = vadd.f32 %v3203_v26, %v3197_v16 }
0x134c   :  { %v3219_v31 = vadd.f32 %v3216_v48, %v3207_v30  ;;  %3222 = vrot.lane.b32.xlu1 %v3218_v29, %s5543_s18 }
0x134e   :  { %3224 = vrot.lane.b32.xlu0 %v3219_v31, %s5543_s18 }
0x1350   :  { %3438 = vrot.lane.b32.xlu1 %v3299_v55, %s5553_s8 }
0x1354   :  { %3441 = vrot.lane.b32.xlu1 %v3299_v55, %s5546_s23 }
0x13be   :  { %v3223_v32 = vpop.permute.xlu1 %3222 }
0x13bf   :  { %v3228_v34 = vsel %vm703_vm3, %v3218_v29, %v3223_v32 }
0x13c0   :  { %v3225_v36 = vpop.permute.xlu0 %3224  ;;  %5378 = vmatprep.mubr.msk.f32.mxu1 %vm23_vm0, %v3228_v34 }
0x13c1   :  { %v3229_v40 = vsel %vm703_vm3, %v3219_v31, %v3225_v36 }
0x13c2   :  { %5379 = vmatmul.mubr.msk.f32.vlgmr.msra.gmra.mxu1 %vm23_vm0, %v3229_v40  ;;  %v3439_v39 = vpop.permute.xlu1 %3438  ;;  %v3398_v40 = vld [vmem:[%s6938_s2 + $0x3f8] sm:$0xff] }
0x13c3   :  { %v3444_v57 = vsel %vm696_vm13, 0.0, %v3439_v39  ;;  %5383 = vmatprep.mubr.msk.f32.mxu1 %vm703_vm3, %v3385_v37  ;;  %v3410_v39 = vld [vmem:[%s6938_s2 + $0x458] sm:$0xff] }
0x13c4   :  { %v3445_v0 = vsel %vm698_vm15, %v3444_v57, 0.0  ;;  %v3399_v57 = vld [vmem:[%s6938_s2 + $0x400] sm:$0xff] }
0x13c6   :  { %v3442_v49 = vpop.permute.xlu1 %3441 }
0x13c7   :  { %v3446_v53 = vsel %vm304_vm6, %v3445_v0, %v3442_v49  ;;  %v3411_v0 = vld [vmem:[%s6938_s2 + $0x460] sm:$0xff] }
0x13c8   :  { %5381 = vmatprep.subr.msk.mxu1 %vm701_vm2, %v3446_v53 }
0x13c9   :  { %5382 = vmatpush3.msk.msra.mxu1 %vm701_vm2, %v3446_v53 }
0x13ca   :  { %5384 = vmatmul.mubr.msk.f32.vlgmr.msra.gmra.mxu1 %vm703_vm3, %v3386_v52  ;;  %v3400_v52 = vld [vmem:[%s6938_s2 + $0x408] sm:$0xff] }
0x13cb   :  { %5386 = vmatprep.mubr.msk.f32.mxu1 %vm703_vm3, %v3387_v3  ;;  %v3412_v3 = vld [vmem:[%s6938_s2 + $0x468] sm:$0xff] }
0x13ce   :  { %5387 = vmatmul.mubr.msk.f32.gmra.mxu1 %vm703_vm3, %v3388_v59 }
0x13cf   :  { %5389 = vmatprep.mubr.msk.f32.mxu1 %vm703_vm3, %v3389_v47  ;;  %v3401_v47 = vld [vmem:[%s6938_s2 + $0x410] sm:$0xff] }
0x13d2   :  { %5390 = vmatmul.mubr.msk.f32.gmra.mxu1 %vm703_vm3, %v3390_v10 }
0x13d3   :  { %5392 = vmatprep.mubr.msk.f32.mxu1 %vm703_vm3, %v3391_v51  ;;  %v3413_v51 = vld [vmem:[%s6938_s2 + $0x470] sm:$0xff] }
0x13d6   :  { %5393 = vmatmul.mubr.msk.f32.gmra.mxu1 %vm703_vm3, %v3392_v25 }
0x13d7   :  { %5395 = vmatprep.mubr.msk.f32.mxu1 %vm703_vm3, %v3393_v50 }
0x13da   :  { %5396 = vmatmul.mubr.msk.f32.gmra.mxu1 %vm703_vm3, %v3394_v9  ;;  %v3402_v9 = vld [vmem:[%s6938_s2 + $0x418] sm:$0xff] }
0x13db   :  { %5398 = vmatprep.mubr.msk.f32.mxu1 %vm703_vm3, %v3395_v61 }
0x13de   :  { %5399 = vmatmul.mubr.msk.f32.gmra.mxu1 %vm703_vm3, %v3396_v22  ;;  %v3403_v22 = vld [vmem:[%s6938_s2 + $0x420] sm:$0xff] }
0x13df   :  { %5425 = vmatprep.mubr.msk.f32.mxu1 %vm703_vm3, %v3409_v4  ;;  %v3415_v4 = vld [vmem:[%s6938_s2 + $0x480] sm:$0xff] }
0x1482   :  { %v5380_v60 = vpop.f32.mrf.mxu1 }
0x1483   :  { %3659 = vrot.lane.b32.xlu1 %v5380_v60, %s5546_s23  ;;  %3653 = vrot.lane.b32.xlu0 %v5380_v60, %s5553_s8  ;;  %v3404_v60 = vld [vmem:[%s6938_s2 + $0x428] sm:$0xff] }
0x1484   :  { %v3375_v15 = vpop.f32.mrf.mxu1 }
0x1487   :  { %3877 = vrot.lane.b32.xlu1 %v3384_v13, %s5553_s8  ;;  %3651 = vrot.lane.b32.xlu0 %v3375_v15, %s5553_s8 }
0x148a   :  { %v6570_v42 = vpop.f32.mrf.mxu1 }
0x148b   :  { %3880 = vrot.lane.b32.xlu1 %v3384_v13, %s5546_s23  ;;  %3657 = vrot.lane.b32.xlu0 %v3375_v15, %s5546_s23  ;;  %v3405_v15 = vld [vmem:[%s6938_s2 + $0x430] sm:$0xff] }
0x148c   :  { %v6572_v28 = vpop.f32.mrf.mxu1  ;;  %v3417_v13 = vld [vmem:[%s6938_s2 + $0x490] sm:$0xff] }
0x148e   :  { %v6574_v17 = vpop.f32.mrf.mxu1 }
0x148f   :  { %4328 = vperm.xlu1 %5525, %v3436_v63   ;;  %4094 = vrot.lane.b32.xlu0 %v5641_v6, %s5553_s8  ;;  %v3406_v63 = vld [vmem:[%s6938_s2 + $0x438] sm:$0xff] }
0x1490   :  { %v6576_v6 = vpop.f32.mrf.mxu1 }
0x1492   :  { %v5391_v18 = vpop.f32.mrf.mxu1 }
0x1493   :  { %4318 = vperm.xlu1 %5525, %v3434_v38   ;;  %4092 = vrot.lane.b32.xlu0 %v5646_v8, %s5553_s8  ;;  %v3418_v38 = vld [vmem:[%s6938_s2 + $0x498] sm:$0xff] }
0x1494   :  { %v3570_v19 = vpop.f32.mrf.mxu1 }
0x1496   :  { %v5394_v20 = vpop.f32.mrf.mxu1 }
0x1497   :  { %4323 = vperm.xlu0 %5523, %v3435_v44   ;;  %3619 = vrot.lane.b32.xlu1 %v5394_v20, %s5542_s17  ;;  %v3407_v44 = vld [vmem:[%s6938_s2 + $0x440] sm:$0xff]  ;;  %v3420_v20 = vld [vmem:[%s6938_s2 + $0x4a8] sm:$0xff] }
0x1498   :  { %v3580_v8 = vpop.f32.mrf.mxu1 }
0x149a   :  { %v5397_v46 = vpop.f32.mrf.mxu1 }
0x149b   :  { %3615 = vrot.lane.b32.xlu0 %v5391_v18, %s5542_s17  ;;  %3617 = vrot.lane.b32.xlu1 %v3580_v8, %s5542_s17  ;;  %v3419_v18 = vld [vmem:[%s6938_s2 + $0x4a0] sm:$0xff]  ;;  %v3421_v8 = vld [vmem:[%s6938_s2 + $0x4b0] sm:$0xff] }
0x149c   :  { %v3590_v55 = vpop.f32.mrf.mxu1 }
0x149e   :  { %v5400_v45 = vpop.f32.mrf.mxu1 }
0x149f   :  { %3613 = vrot.lane.b32.xlu0 %v3570_v19, %s5542_s17  ;;  %3635 = vrot.lane.b32.xlu1 %v5397_v46, %s5543_s18  ;;  %v3408_v19 = vld [vmem:[%s6938_s2 + $0x448] sm:$0xff]  ;;  %v3422_v46 = vld [vmem:[%s6938_s2 + $0x4b8] sm:$0xff] }
0x14a0   :  { %v3600_v5 = vpop.f32.mrf.mxu1 }
0x14a3   :  { %3633 = vrot.lane.b32.xlu1 %v3590_v55, %s5543_s18  ;;  %3639 = vrot.lane.b32.xlu0 %v5400_v45, %s5543_s18  ;;  %v3423_v55 = vld [vmem:[%s6938_s2 + $0x4c0] sm:$0xff]  ;;  %v3424_v45 = vld [vmem:[%s6938_s2 + $0x4c8] sm:$0xff] }
0x14a7   :  { %3637 = vrot.lane.b32.xlu1 %v3600_v5, %s5543_s18  ;;  %v3425_v5 = vld [vmem:[%s6938_s2 + $0x4d0] sm:$0xff] }
0x14f5   :  { %v3654_v62 = vpop.permute.xlu0 %3653  ;;  %v3660_v48 = vpop.permute.xlu1 %3659 }
0x14f6   :  { %v3664_v24 = vsel %vm696_vm13, 0.0, %v3654_v62  ;;  %v3426_v62 = vld [vmem:[%s6938_s2 + $0x4d8] sm:$0xff] }
0x14f7   :  { %v3666_v11 = vsel %vm698_vm15, %v3664_v24, 0.0  ;;  %v3428_v24 = vld [vmem:[%s6938_s2 + $0x4e8] sm:$0xff] }
0x14f8   :  { %v3668_v58 = vsel %vm304_vm6, %v3666_v11, %v3660_v48  ;;  %v3427_v48 = vld [vmem:[%s6938_s2 + $0x4e0] sm:$0xff]  ;;  %v3429_v11 = vld [vmem:[%s6938_s2 + $0x4f0] sm:$0xff] }
0x14f9   :  { %v3652_v16 = vpop.permute.xlu0 %3651  ;;  %5401 = vmatprep.subr.msk.mxu0 %vm701_vm2, %v3668_v58  ;;  %v3878_v23 = vpop.permute.xlu1 %3877 }
0x14fa   :  { %v3663_v26 = vsel %vm696_vm13, 0.0, %v3652_v16  ;;  %v3883_v29 = vsel %vm696_vm13, 0.0, %v3878_v23  ;;  %5402 = vmatpush3.msk.msra.mxu0 %vm701_vm2, %v3668_v58  ;;  %v3430_v58 = vld [vmem:[%s6938_s2 + $0x4f8] sm:$0xff]  ;;  %v3431_v16 = vld [vmem:[%s6938_s2 + $0x500] sm:$0xff]  ;;  %v3432_v23 = vld [vmem:[%s6938_s2 + $0x508] sm:$0xff] }
0x14fb   :  { %v3665_v30 = vsel %vm698_vm15, %v3663_v26, 0.0  ;;  %v3884_v31 = vsel %vm698_vm15, %v3883_v29, 0.0 }
0x14fd   :  { %v3658_v32 = vpop.permute.xlu0 %3657  ;;  %v3881_v34 = vpop.permute.xlu1 %3880 }
0x14fe   :  { %v3667_v36 = vsel %vm304_vm6, %v3665_v30, %v3658_v32  ;;  %v3885_v37 = vsel %vm304_vm6, %v3884_v31, %v3881_v34 }
0x14ff   :  { %5403 = vmatprep.subr.msk.mxu0 %vm701_vm2, %v3667_v36  ;;  %5423 = vmatprep.subr.msk.mxu1 %vm701_vm2, %v3885_v37 }
0x1500   :  { %5404 = vmatpush3.msk.msra.mxu0 %vm701_vm2, %v3667_v36  ;;  %5424 = vmatpush3.msk.msra.mxu1 %vm701_vm2, %v3885_v37 }
0x1501   :  { %v4095_v49 = vpop.permute.xlu0 %4094  ;;  %5406 = vmatmul.mubr.msk.f32.vlgmr.msra.gmra.mxu0 %vm23_vm0, %v3398_v40  ;;  %5426 = vmatmul.mubr.msk.f32.vlgmr.msra.gmra.mxu1 %vm703_vm3, %v3410_v39 }
0x1502   :  { %v4099_v53 = vsel %vm696_vm13, 0.0, %v4095_v49  ;;  %5408 = vmatprep.mubr.msk.f32.mxu0 %vm23_vm0, %v3399_v57  ;;  %5428 = vmatprep.mubr.msk.f32.mxu1 %vm703_vm3, %v3411_v0 }
0x1503   :  { %v4101_v59 = vsel %vm698_vm15, %v4099_v53, 0.0  ;;  %5465 = vmatprep.subr.mxu1 %v6947_v43 }
0x1504   :  { %v4103_v10 = vsel %vm304_vm6, %v4101_v59, %v5662_v12  ;;  %v3414_v12 = vld [vmem:[%s6938_s2 + $0x478] sm:$0xff] }
0x1505   :  { %v4093_v25 = vpop.permute.xlu0 %4092  ;;  %5409 = vmatmul.mubr.msk.f32.gmra.mxu0 %vm23_vm0, %v3400_v52  ;;  %5429 = vmatmul.mubr.msk.f32.gmra.mxu1 %vm703_vm3, %v3412_v3 }
0x1506   :  { %v4098_v50 = vsel %vm696_vm13, 0.0, %v4093_v25  ;;  %5443 = vmatprep.subr.msk.mxu0 %vm701_vm2, %v4103_v10  ;;  %5411 = vmatprep.mubr.msk.f32.mxu0 %vm23_vm0, %v3401_v47 }
0x1507   :  { %v4100_v61 = vsel %vm698_vm15, %v4098_v50, 0.0  ;;  %5444 = vmatpush3.msk.msra.mxu0 %vm701_vm2, %v4103_v10  ;;  %5431 = vmatprep.mubr.msk.f32.mxu1 %vm703_vm3, %v3413_v51 }
0x1508   :  { %v4102_v7 = vsel %vm304_vm6, %v4100_v61, %v5666_v14  ;;  %v3416_v14 = vld [vmem:[%s6938_s2 + $0x488] sm:$0xff] }
0x1509   :  { %5412 = vmatmul.mubr.msk.f32.gmra.mxu0 %vm23_vm0, %v3402_v9  ;;  %5432 = vmatmul.mubr.msk.f32.gmra.mxu1 %vm703_vm3, %v3414_v12 }
0x150a   :  { %5445 = vmatprep.subr.msk.mxu0 %vm701_vm2, %v4102_v7  ;;  %5414 = vmatprep.mubr.msk.f32.mxu0 %vm23_vm0, %v3403_v22 }
0x150b   :  { %5446 = vmatpush3.msk.msra.mxu0 %vm701_vm2, %v4102_v7  ;;  %5434 = vmatprep.mubr.msk.f32.mxu1 %vm703_vm3, %v3415_v4 }
0x150c   :  { %5482 = vmatprep.subr.mxu0 %v6947_v43 }
0x150d   :  { %5415 = vmatmul.mubr.msk.f32.gmra.mxu0 %vm23_vm0, %v3404_v60  ;;  %5435 = vmatmul.mubr.msk.f32.gmra.mxu1 %vm703_vm3, %v3416_v14 }
0x150e   :  { %5417 = vmatprep.mubr.msk.f32.mxu0 %vm23_vm0, %v3405_v15  ;;  %5437 = vmatprep.mubr.msk.f32.mxu1 %vm703_vm3, %v3417_v13 }
0x1511   :  { %5418 = vmatmul.mubr.msk.f32.gmra.mxu0 %vm23_vm0, %v3406_v63  ;;  %5438 = vmatmul.mubr.msk.f32.gmra.mxu1 %vm703_vm3, %v3418_v38 }
0x1512   :  { %5420 = vmatprep.mubr.msk.f32.mxu0 %vm23_vm0, %v3407_v44  ;;  %5440 = vmatprep.mubr.msk.f32.mxu1 %vm703_vm3, %v3419_v18  ;;  %v3433_v18 = vld [vmem:[%s6938_s2 + $0x510] sm:$0xff] }
0x1515   :  { %5421 = vmatmul.mubr.msk.f32.gmra.mxu0 %vm23_vm0, %v3408_v19  ;;  %5441 = vmatmul.mubr.msk.f32.gmra.mxu1 %vm703_vm3, %v3420_v20  ;;  %v4329_v20 = vpop.permute.xlu1 %4328 }
0x1516   :  { %5447 = vmatprep.mubr.msk.f32.mxu0 %vm23_vm0, %v3421_v8  ;;  %5473 = vmatprep.mubr.msk.f32.mxu1 %vm5549_vm10, %v6947_v43 }
0x1519   :  { %5448 = vmatmul.mubr.msk.f32.vlgmr.msra.gmra.mxu0 %vm23_vm0, %v3422_v46  ;;  %v6808_v8 = vpop.permute.xlu1 %4318 }
0x151a   :  { %5483 = vmatpush3.msra.mxu0 %v5776_v2  ;;  %5450 = vmatprep.mubr.msk.f32.mxu0 %vm23_vm0, %v3423_v55 }
0x151b   :  { %5487 = vmatprep.subr.mxu0 %v6947_v43 }
0x151d   :  { %5451 = vmatmul.mubr.msk.f32.gmra.mxu0 %vm23_vm0, %v3424_v45  ;;  %v3620_v46 = vpop.permute.xlu1 %3619  ;;  %v6810_v45 = vpop.permute.xlu0 %4323 }
0x151e   :  { %5453 = vmatprep.mubr.msk.f32.mxu0 %vm23_vm0, %v3425_v5 }
0x1521   :  { %5454 = vmatmul.mubr.msk.f32.gmra.mxu0 %vm23_vm0, %v3426_v62  ;;  %v3618_v55 = vpop.permute.xlu1 %3617  ;;  %v3616_v62 = vpop.permute.xlu0 %3615 }
0x1522   :  { %5456 = vmatprep.mubr.msk.f32.mxu0 %vm23_vm0, %v3427_v48 }
0x1525   :  { %5457 = vmatmul.mubr.msk.f32.gmra.mxu0 %vm23_vm0, %v3428_v24  ;;  %v3636_v5 = vpop.permute.xlu1 %3635  ;;  %v3614_v24 = vpop.permute.xlu0 %3613 }
0x1526   :  { %5459 = vmatprep.mubr.msk.f32.mxu0 %vm23_vm0, %v3429_v11 }
0x1529   :  { %5460 = vmatmul.mubr.msk.f32.gmra.mxu0 %vm23_vm0, %v3430_v58  ;;  %v3634_v48 = vpop.permute.xlu1 %3633  ;;  %v3640_v11 = vpop.permute.xlu0 %3639 }
0x152a   :  { %5462 = vmatprep.mubr.msk.f32.mxu0 %vm23_vm0, %v3431_v16 }
0x152d   :  { %5463 = vmatmul.mubr.msk.f32.gmra.mxu0 %vm23_vm0, %v3432_v23  ;;  %v3638_v58 = vpop.permute.xlu1 %3637 }
0x152e   :  { %5484 = vmatprep.mubr.msk.f32.mxu0 %vm5549_vm10, %v6947_v43 }
0x15c1   :  { %v6757_v26 = vpop.f32.mrf.mxu0  ;;  %v6759_v29 = vpop.f32.mrf.mxu1 }
0x15c3   :  { %v6761_v30 = vpop.f32.mrf.mxu0  ;;  %v6763_v31 = vpop.f32.mrf.mxu1 }
0x15c5   :  { %v6765_v32 = vpop.f32.mrf.mxu0  ;;  %v6767_v34 = vpop.f32.mrf.mxu1 }
0x15c7   :  { %v6769_v36 = vpop.f32.mrf.mxu0  ;;  %v6771_v37 = vpop.f32.mrf.mxu1 }
0x15c9   :  { %v5413_v40 = vpop.f32.mrf.mxu0  ;;  %v5433_v39 = vpop.f32.mrf.mxu1 }
0x15ca   :  { %4054 = vrot.lane.b32.xlu0 %v5433_v39, %s5542_s17 }
0x15cb   :  { %v3793_v57 = vpop.f32.mrf.mxu0  ;;  %v4009_v0 = vpop.f32.mrf.mxu1 }
0x15cc   :  { %4052 = vrot.lane.b32.xlu1 %v4009_v0, %s5542_s17 }
0x15cd   :  { %v5416_v49 = vpop.f32.mrf.mxu0  ;;  %v5436_v53 = vpop.f32.mrf.mxu1 }
0x15cf   :  { %v3803_v52 = vpop.f32.mrf.mxu0  ;;  %v4019_v3 = vpop.f32.mrf.mxu1 }
0x15d0   :  { %4058 = vrot.lane.b32.xlu1 %v5436_v53, %s5542_s17  ;;  %4056 = vrot.lane.b32.xlu0 %v4019_v3, %s5542_s17 }
0x15d1   :  { %v5419_v59 = vpop.f32.mrf.mxu0  ;;  %v5439_v47 = vpop.f32.mrf.mxu1 }
0x15d3   :  { %v3813_v10 = vpop.f32.mrf.mxu0  ;;  %v4029_v51 = vpop.f32.mrf.mxu1 }
0x15d4   :  { %4074 = vrot.lane.b32.xlu0 %v5439_v47, %s5543_s18 }
0x15d5   :  { %v5422_v25 = vpop.f32.mrf.mxu0  ;;  %v5442_v50 = vpop.f32.mrf.mxu1 }
0x15d6   :  { %4078 = vrot.lane.b32.xlu1 %v5442_v50, %s5543_s18  ;;  %v3628_v50 = vadd.f32 %v6574_v17, %v3620_v46  ;;  %v3627_v17 = vadd.f32 %v3618_v55, %v6576_v6 }
0x15d7   :  { %v3823_v9 = vpop.f32.mrf.mxu0  ;;  %v4039_v12 = vpop.f32.mrf.mxu1 }
0x15d8   :  { %4072 = vrot.lane.b32.xlu0 %v4029_v51, %s5543_s18 }
0x15d9   :  { %v6780_v61 = vpop.f32.mrf.mxu0 }
0x15da   :  { %4076 = vrot.lane.b32.xlu1 %v4039_v12, %s5543_s18 }
0x15db   :  { %v6783_v22 = vpop.f32.mrf.mxu0 }
0x15dc   :  { %3838 = vrot.lane.b32.xlu0 %v5413_v40, %s5542_s17 }
0x15dd   :  { %v6786_v7 = vpop.f32.mrf.mxu0 }
0x15de   :  { %3840 = vrot.lane.b32.xlu1 %v3803_v52, %s5542_s17 }
0x15df   :  { %v6789_v4 = vpop.f32.mrf.mxu0 }
0x15e0   :  { %3836 = vrot.lane.b32.xlu0 %v3793_v57, %s5542_s17 }
0x15e1   :  { %v5455_v60 = vpop.f32.mrf.mxu0 }
0x15e2   :  { %3858 = vrot.lane.b32.xlu1 %v5419_v59, %s5543_s18 }
0x15e3   :  { %v4228_v14 = vpop.f32.mrf.mxu0 }
0x15e4   :  { %3842 = vrot.lane.b32.xlu0 %v5416_v49, %s5542_s17 }
0x15e5   :  { %v5458_v15 = vpop.f32.mrf.mxu0 }
0x15e6   :  { %3860 = vrot.lane.b32.xlu1 %v3823_v9, %s5543_s18 }
0x15e7   :  { %v4238_v13 = vpop.f32.mrf.mxu0 }
0x15e8   :  { %3856 = vrot.lane.b32.xlu0 %v3813_v10, %s5543_s18 }
0x15e9   :  { %v5461_v63 = vpop.f32.mrf.mxu0 }
0x15ea   :  { %4273 = vrot.lane.b32.xlu1 %v5455_v60, %s5542_s17 }
0x15eb   :  { %v4248_v38 = vpop.f32.mrf.mxu0 }
0x15ec   :  { %3862 = vrot.lane.b32.xlu0 %v5422_v25, %s5543_s18 }
0x15ed   :  { %v5464_v44 = vpop.f32.mrf.mxu0 }
0x15ee   :  { %4297 = vrot.lane.b32.xlu1 %v5464_v44, %s5543_s18 }
0x15ef   :  { %v4258_v19 = vpop.f32.mrf.mxu0 }
0x15f0   :  { %4277 = vrot.lane.b32.xlu0 %v5458_v15, %s5542_s17 }
0x15f2   :  { %4271 = vrot.lane.b32.xlu1 %v4228_v14, %s5542_s17  ;;  %v3648_v14 = vadd.f32 %v3640_v11, %v3628_v50 }
0x15f4   :  { %4275 = vrot.lane.b32.xlu0 %v4238_v13, %s5542_s17  ;;  %v3626_v13 = vadd.f32 %v6570_v42, %v3616_v62 }
0x15f6   :  { %4313 = vperm.xlu1 %5525, %v3433_v18  }
0x15f8   :  { %4293 = vrot.lane.b32.xlu0 %v5461_v63, %s5543_s18 }
0x15fc   :  { %4295 = vrot.lane.b32.xlu0 %v4258_v19, %s5543_s18 }
0x1600   :  { %4291 = vrot.lane.b32.xlu0 %v4248_v38, %s5543_s18 }
0x163c   :  { %v4055_v16 = vpop.permute.xlu0 %4054 }
0x163d   :  { %v4065_v42 = vadd.f32 %v6759_v29, %v4055_v16 }
0x163e   :  { %v4053_v23 = vpop.permute.xlu1 %4052 }
0x1642   :  { %v4057_v40 = vpop.permute.xlu0 %4056  ;;  %v4059_v39 = vpop.permute.xlu1 %4058 }
0x1643   :  { %v4067_v63 = vadd.f32 %v6767_v34, %v4059_v39  ;;  %v3625_v39 = vadd.f32 %v3614_v24, %v6572_v28 }
0x1646   :  { %v4075_v57 = vpop.permute.xlu0 %4074 }
0x1648   :  { %v4079_v0 = vpop.permute.xlu1 %4078 }
0x1649   :  { %v4087_v19 = vadd.f32 %v4079_v0, %v4067_v63  ;;  %v3647_v0 = vadd.f32 %v3638_v58, %v3627_v17  ;;  %v4064_v58 = vadd.f32 %v4053_v23, %v6763_v31  ;;  %v4362_v17 = vld [vmem:[%s6938_s2 + $0x548] sm:$0xff] }
0x164a   :  { %v4073_v49 = vpop.permute.xlu0 %4072 }
0x164c   :  { %v4077_v53 = vpop.permute.xlu1 %4076 }
0x164e   :  { %v3839_v52 = vpop.permute.xlu0 %3838 }
0x164f   :  { %v3849_v38 = vadd.f32 %v6757_v26, %v3839_v52  ;;  %v4085_v52 = vadd.f32 %v4075_v57, %v4065_v42  ;;  %v4084_v57 = vadd.f32 %v4073_v49, %v4064_v58  ;;  %v6951_v42 = vmov 0.0  }
0x1650   :  { %v3841_v3 = vpop.permute.xlu1 %3840 }
0x1652   :  { %v3837_v59 = vpop.permute.xlu0 %3836 }
0x1654   :  { %v3859_v47 = vpop.permute.xlu1 %3858 }
0x1655   :  { %v3869_v43 = vadd.f32 %v3859_v47, %v3849_v38 }
0x1656   :  { %v3843_v10 = vpop.permute.xlu0 %3842 }
0x1657   :  { %v3851_v9 = vadd.f32 %v6765_v32, %v3843_v10  ;;  %v3646_v32 = vadd.f32 %v3636_v5, %v3626_v13  ;;  %v3850_v10 = vadd.f32 %v3841_v3, %v6769_v36  ;;  %v4066_v5 = vadd.f32 %v4057_v40, %v6771_v37 }
0x1658   :  { %v3861_v51 = vpop.permute.xlu1 %3860 }
0x1659   :  { %v3873_v34 = vadd.f32 %v3869_v43, %v3646_v32  ;;  %v3870_v62 = vadd.f32 %v3861_v51, %v3850_v10  ;;  %v3645_v43 = vadd.f32 %v3634_v48, %v3625_v39  ;;  %v4086_v29 = vadd.f32 %v4077_v53, %v4066_v5 }
0x165a   :  { %v3857_v25 = vpop.permute.xlu0 %3856 }
0x165b   :  { %v3874_v3 = vadd.f32 %v3870_v62, %v3647_v0  ;;  %v4089_v47 = vadd.f32 %v4085_v52, %v3873_v34 }
0x165c   :  { %v4274_v12 = vpop.permute.xlu1 %4273 }
0x165d   :  { %v4284_v6 = vadd.f32 %v6780_v61, %v4274_v12  ;;  %v4090_v37 = vadd.f32 %v4086_v29, %v3874_v3  ;;  %v4361_v29 = vld [vmem:[%s6938_s2 + $0x540] sm:$0xff] }
0x165e   :  { %v3863_v60 = vpop.permute.xlu0 %3862 }
0x165f   :  { %v3871_v15 = vadd.f32 %v3863_v60, %v3851_v9 }
0x1660   :  { %v4298_v46 = vpop.permute.xlu1 %4297 }
0x1661   :  { %v3875_v44 = vadd.f32 %v3871_v15, %v3648_v14 }
0x1662   :  { %v4278_v18 = vpop.permute.xlu0 %4277 }
0x1663   :  { %v4286_v2 = vadd.f32 %v6786_v7, %v4278_v18  ;;  %v4091_v11 = vadd.f32 %v4087_v19, %v3875_v44  ;;  %v3848_v7 = vadd.f32 %v3837_v59, %v6761_v30 }
0x1664   :  { %v4272_v30 = vpop.permute.xlu1 %4271 }
0x1665   :  { %v4306_v50 = vadd.f32 %v4298_v46, %v4286_v2  ;;  %v3868_v2 = vadd.f32 %v3857_v25, %v3848_v7  ;;  %v4283_v59 = vadd.f32 %v4272_v30, %v6783_v22 }
0x1666   :  { %v4276_v9 = vpop.permute.xlu0 %4275 }
0x1667   :  { %v4310_v26 = vadd.f32 %v4306_v50, %v4091_v11  ;;  %v4285_v28 = vadd.f32 %v4276_v9, %v6789_v4  ;;  %v3872_v61 = vadd.f32 %v3868_v2, %v3645_v43  ;;  %v4360_v43 = vld [vmem:[%s6938_s2 + $0x538] sm:$0xff] }
0x1669   :  { %v4334_v55 = vadd.f32 %v4329_v20, %v4310_v26  ;;  %v4088_v4 = vadd.f32 %v4084_v57, %v3872_v61  ;;  %v4786_v57 = vsel %vm2030_vm5, 1.0, %v6951_v42 }
0x166a   :  { %v4294_v36 = vpop.permute.xlu0 %4293 }
0x166b   :  { %v4304_v60 = vadd.f32 %v4294_v36, %v4284_v6  ;;  %4345 = vrot.lane.b32.xlu1 %v4334_v55, %s5543_s18 }
0x166d   :  { %v4308_v24 = vadd.f32 %v4304_v60, %v4089_v47  ;;  %v4359_v47 = vld [vmem:[%s6938_s2 + $0x530] sm:$0xff] }
0x166e   :  { %v4296_v16 = vpop.permute.xlu0 %4295 }
0x166f   :  { %v4332_v20 = vadd.f32 %v6808_v8, %v4308_v24  ;;  %v4305_v40 = vadd.f32 %v4296_v16, %v4285_v28 }
0x1671   :  { %v4309_v51 = vadd.f32 %v4305_v40, %v4090_v37  ;;  %4341 = vrot.lane.b32.xlu1 %v4332_v20, %s5543_s18  ;;  %v4314_v31 = vpop.permute.xlu1 %4313  ;;  %v2130_v37 = vsub.f32 %v6076_v27, %v6143_v35 }
0x1672   :  { %v4292_v48 = vpop.permute.xlu0 %4291 }
0x1673   :  { %v4333_v53 = vadd.f32 %v6810_v45, %v4309_v51  ;;  %v4303_v25 = vadd.f32 %v4292_v48, %v4283_v59  ;;  %v2131_v59 = vmul.f32 %v2130_v37, %v2130_v37  ;;  %v2111_v51 = vsel %vm23_vm0, %v4786_v57, 0.0 }
0x1675   :  { %v4307_v12 = vadd.f32 %v4303_v25, %v4088_v4  ;;  %4343 = vrot.lane.b32.xlu0 %v4333_v53, %s5543_s18  ;;  %v2132_v48 = vsel %vm23_vm0, %v2131_v59, 0.0 }
0x1677   :  { %v4331_v23 = vadd.f32 %v4314_v31, %v4307_v12 }
0x1679   :  { %4339 = vrot.lane.b32.xlu0 %v4331_v23, %s5543_s18 }
0x16dd   :  { %v4346_v8 = vpop.permute.xlu1 %4345 }
0x16de   :  { %v4354_v49 = vsel %vm23_vm0, %v4334_v55, %v4346_v8  ;;  %v2116_v8 = vsub.f32 %v6063_v1, %v6139_v33 }
0x16df   :  { %v4358_v14 = vmax.f32 %v4354_v49, 0.0 }
0x16e1   :  { %4373 = vrot.lane.b32.xlu1 %v4358_v14, %s5553_s8 }
0x16e3   :  { %v4342_v22 = vpop.permute.xlu1 %4341 }
0x16e4   :  { %v4352_v15 = vsel %vm23_vm0, %v4332_v20, %v4342_v22  ;;  %v4778_v20 = vsel %vm1820_vm11, 1.0, %v6951_v42  ;;  %v2117_v22 = vmul.f32 %v2116_v8, %v2116_v8 }
0x16e5   :  { %v4356_v13 = vmax.f32 %v4352_v15, 0.0  ;;  %4385 = vrot.lane.b32.xlu1 %v4358_v14, %s5546_s23  ;;  %v1899_v40 = vsel %vm703_vm3, %v4778_v20, 0.0  ;;  %v4785_v14 = vsel %vm2029_vm12, 1.0, %v6951_v42 }
0x16e6   :  { %v2108_v15 = vsel %vm23_vm0, %v4785_v14, 0.0 }
0x16e7   :  { %v4344_v45 = vpop.permute.xlu0 %4343  ;;  %4369 = vrot.lane.b32.xlu0 %v4356_v13, %s5553_s8 }
0x16e8   :  { %v4353_v63 = vsel %vm23_vm0, %v4333_v53, %v4344_v45  ;;  %v4531_v53 = vld [vmem:[%s6938_s2 + $0x588] sm:$0xff] }
0x16e9   :  { %v4357_v38 = vmax.f32 %v4353_v63, 0.0  ;;  %5485 = vmatmul.mubr.msk.f32.vlgmr.msra.gmra.mxu0 %vm703_vm3, %v4531_v53 }
0x16ea   :  { %5489 = vmatprep.mubr.msk.f32.mxu0 %vm5549_vm10, %v6951_v42 }
0x16eb   :  { %v4340_v44 = vpop.permute.xlu0 %4339  ;;  %4383 = vrot.lane.b32.xlu1 %v4357_v38, %s5546_s23  ;;  %4371 = vrot.lane.b32.xlu0 %v4357_v38, %s5553_s8 }
0x16ec   :  { %v4351_v18 = vsel %vm23_vm0, %v4331_v23, %v4340_v44 }
0x16ed   :  { %v4355_v19 = vmax.f32 %v4351_v18, 0.0 }
0x16ef   :  { %4381 = vrot.lane.b32.xlu1 %v4356_v13, %s5546_s23  ;;  %4367 = vrot.lane.b32.xlu0 %v4355_v19, %s5553_s8  ;;  %v2118_v13 = vsel %vm703_vm3, %v2117_v22, 0.0 }
0x16f3   :  { %4508 = vperm.xlu1 %5525, %v4362_v17   ;;  %4379 = vrot.lane.b32.xlu0 %v4355_v19, %s5546_s23 }
0x1753   :  { %v4374_v46 = vpop.permute.xlu1 %4373 }
0x1754   :  { %v4394_v32 = vsel %vm696_vm13, 0.0, %v4374_v46 }
0x1755   :  { %v4398_v10 = vsel %vm698_vm15, %v4394_v32, 0.0 }
0x1757   :  { %v4386_v11 = vpop.permute.xlu1 %4385 }
0x1758   :  { %v4402_v50 = vsel %vm304_vm6, %v4398_v10, %v4386_v11 }
0x1759   :  { %v4370_v9 = vpop.permute.xlu0 %4369  ;;  %5466 = vmatpush3.msk.msra.mxu1 %vm701_vm2, %v4402_v50 }
0x175a   :  { %5467 = vmatprep.subr.mxu1 %v6951_v42  ;;  %v4392_v26 = vsel %vm696_vm13, 0.0, %v4370_v9 }
0x175b   :  { %v4396_v7 = vsel %vm698_vm15, %v4392_v26, 0.0 }
0x175d   :  { %v4372_v34 = vpop.permute.xlu0 %4371  ;;  %v4384_v62 = vpop.permute.xlu1 %4383 }
0x175e   :  { %v4393_v39 = vsel %vm696_vm13, 0.0, %v4372_v34 }
0x175f   :  { %v4397_v0 = vsel %vm698_vm15, %v4393_v39, 0.0 }
0x1760   :  { %v4401_v52 = vsel %vm304_vm6, %v4397_v0, %v4384_v62 }
0x1761   :  { %v4368_v6 = vpop.permute.xlu0 %4367  ;;  %5468 = vmatpush3.msk.msra.mxu1 %vm701_vm2, %v4401_v52  ;;  %v4382_v55 = vpop.permute.xlu1 %4381 }
0x1762   :  { %v4391_v5 = vsel %vm696_vm13, 0.0, %v4368_v6  ;;  %v4400_v36 = vsel %vm304_vm6, %v4396_v7, %v4382_v55  ;;  %5469 = vmatprep.subr.mxu1 %v6951_v42 }
0x1763   :  { %5470 = vmatpush3.msk.msra.mxu1 %vm701_vm2, %v4400_v36  ;;  %v4395_v3 = vsel %vm698_vm15, %v4391_v5, 0.0  ;;  %vm4699_vm15 = vcmask 48128  }
0x1764   :  { %5471 = vmatprep.subr.mxu1 %v6951_v42 }
0x1765   :  { %v4380_v2 = vpop.permute.xlu0 %4379 }
0x1766   :  { %v4399_v60 = vsel %vm304_vm6, %v4395_v3, %v4380_v2  ;;  %vm6952_vm6 = vcmp.eq.s32.totalorder %v6087_v41, %v6093_v54 }
0x1767   :  { %5472 = vmatpush3.msk.msra.mxu1 %vm701_vm2, %v4399_v60  ;;  %v4779_v23 = vsel %vm6952_vm6, 1.0, %v6951_v42  ;;  %vm6956_vm2 = vcmask 31744  }
0x1768   :  { %5474 = vmatmul.mubr.msk.f32.vlgmr.msra.gmra.mxu1 %vm3074_vm1, %v4359_v47  ;;  %v1902_v49 = vsel %vm703_vm3, %v4779_v23, 0.0 }
0x1769   :  { %5476 = vmatprep.mubr.msk.f32.mxu1 %vm5549_vm10, %v6951_v42 }
0x176c   :  { %5477 = vmatmul.mubr.msk.f32.gmra.mxu1 %vm3074_vm1, %v4360_v43 }
0x176d   :  { %5479 = vmatprep.mubr.msk.f32.mxu1 %vm5549_vm10, %v6951_v42  ;;  %vm6955_vm10 = vcmask 23552  }
0x176e   :  { %v4509_v27 = vpop.permute.xlu1 %4508 }
0x1770   :  { %5480 = vmatmul.mubr.msk.f32.gmra.mxu1 %vm3074_vm1, %v4361_v29 }
0x17a9   :  { %v4601_v1 = vpop.f32.mrf.mxu0 }
0x17ab   :  { %v5486_v33 = vpop.f32.mrf.mxu0 }
0x1828   :  { %v4482_v28 = vpop.f32.mrf.mxu1 }
0x182a   :  { %v5475_v24 = vpop.f32.mrf.mxu1 }
0x182c   :  { %v4487_v58 = vpop.f32.mrf.mxu1 }
0x182d   :  { %4497 = vrot.lane.b32.xlu0 %v4487_v58, %s5542_s17 }
0x182e   :  { %v5478_v30 = vpop.f32.mrf.mxu1 }
0x1830   :  { %v4492_v16 = vpop.f32.mrf.mxu1 }
0x1831   :  { %4502 = vrot.lane.b32.xlu1 %v4492_v16, %s5543_s18 }
0x1832   :  { %v5481_v61 = vpop.f32.mrf.mxu1 }
0x1855   :  { %1900 = vadd.xlane.f32.xlu1 %v1899_v40 }
0x1859   :  { %2112 = vadd.xlane.f32.xlu1 %v2111_v51 }
0x185d   :  { %2133 = vadd.xlane.f32.xlu1 %v2132_v48 }
0x189f   :  { %v4498_v35 = vpop.permute.xlu0 %4497 }
0x18a0   :  { %v4500_v4 = vadd.f32 %v4498_v35, %v4482_v28  ;;  %v6953_v28 = vld [vmem:[#allocation2_spill] sm:$0xff] }
0x18a3   :  { %v4503_v25 = vpop.permute.xlu1 %4502 }
0x18a4   :  { %v4505_v12 = vadd.f32 %v4503_v25, %v4500_v4 }
0x18a6   :  { %v4511_v31 = vadd.f32 %v4509_v27, %v4505_v12 }
0x18a8   :  { %4513 = vrot.lane.b32.xlu0 %v4511_v31, %s5543_s18 }
0x18c7   :  { %1903 = vadd.xlane.f32.xlu0 %v1902_v49 }
0x18cb   :  { %2109 = vadd.xlane.f32.xlu0 %v2108_v15 }
0x18cf   :  { %2119 = vadd.xlane.f32.xlu0 %v2118_v13 }
0x18de   :  { %v1901_v45 = vpop.xlane.xlu1 %1900 }
0x18df   :  { %v1905_v63 = vmul.f32 0.125, %v1901_v45 }
0x18e1   :  { %v2145_v21 = vadd.f32 1e-10, %v1905_v63 }
0x18e2   :  { %v2113_v38 = vpop.xlane.xlu1 %2112 }
0x18e3   :  { %v2115_v56 = vmul.f32 0.0625, %v2113_v38  ;;  %5526 = vlog2.f32 %v2145_v21 }
0x18e5   :  { %v2170_v18 = vadd.f32 1e-10, %v2115_v56 }
0x18e6   :  { %v2134_v44 = vpop.xlane.xlu1 %2133 }
0x18e7   :  { %v2135_v19 = vrot.slane %v2134_v44, 4  ;;  %5528 = vlog2.f32 %v2170_v18 }
0x18e9   :  { %v2136_v10 = vadd.f32 %v2135_v19, %v2134_v44 }
0x18eb   :  { %v2137_v42 = vrot.slane %v2136_v10, 2 }
0x18ed   :  { %v2138_v0 = vadd.f32 %v2137_v42, %v2136_v10 }
0x18ef   :  { %v2139_v5 = vrot.slane %v2138_v0, 1 }
0x18f0   :  { %v5527_v39 = vpop.eup %5526 }
0x18f1   :  { %v2148_v7 = vmul.f32 0.6931472, %v5527_v39  ;;  %v2140_v29 = vadd.f32 %v2139_v5, %v2138_v0 }
0x18f3   :  { %v2151_v2 = vmul.f32 %v2148_v7, %v1905_v63 }
0x18f4   :  { %v5529_v55 = vpop.eup %5528 }
0x18f5   :  { %v2174_v47 = vmul.f32 0.6931472, %v5529_v55  ;;  %v2153_v16 = vsel %vm696_vm13, %v2151_v2, 0.0 }
0x18f7   :  { %v2176_v61 = vmul.f32 %v2174_v47, %v2115_v56 }
0x18f9   :  { %v2178_v51 = vsel %vm696_vm13, %v2176_v61, 0.0 }
0x191a   :  { %v4514_v41 = vpop.permute.xlu0 %4513 }
0x191b   :  { %v4516_v54 = vsel %vm23_vm0, %v4511_v31, %v4514_v41  ;;  %vm6954_vm0 = vcmask 15360  }
0x191c   :  { %5488 = vmatpush3.msra.mxu0 %v4516_v54  ;;  %v4517_v24 = vsub.f32 %v6953_v28, %v4516_v54 }
0x191d   :  { %5490 = vmatmul.mubr.msk.f32.vlgmr.msra.gmra.mxu0 %vm703_vm3, %v4531_v53  ;;  %vm6957_vm3 = vcmask 39936  }
0x191e   :  { %v4518_v57 = vmul.f32 %v4517_v24, %v4517_v24 }
0x1920   :  { %v4519_v27 = vsel %vm3074_vm1, %v4518_v57, 0.0 }
0x1950   :  { %v1904_v17 = vpop.xlane.xlu0 %1903 }
0x1951   :  { %v1906_v46 = vmul.f32 0.125, %v1904_v17 }
0x1953   :  { %v2146_v32 = vadd.f32 1e-10, %v1906_v46 }
0x1954   :  { %v2110_v11 = vpop.xlane.xlu0 %2109 }
0x1955   :  { %5530 = vlog2.f32 %v2146_v32  ;;  %v2114_v50 = vmul.f32 0.0625, %v2110_v11 }
0x1957   :  { %v2169_v9 = vadd.f32 1e-10, %v2114_v50 }
0x1958   :  { %v2120_v34 = vpop.xlane.xlu0 %2119 }
0x1959   :  { %5532 = vlog2.f32 %v2169_v9  ;;  %v2121_v62 = vrot.slane %v2120_v34, 4 }
0x195b   :  { %v2122_v26 = vadd.f32 %v2121_v62, %v2120_v34 }
0x195d   :  { %v2123_v52 = vrot.slane %v2122_v26, 2 }
0x195f   :  { %v2124_v6 = vadd.f32 %v2123_v52, %v2122_v26 }
0x1961   :  { %v2125_v36 = vrot.slane %v2124_v6, 1 }
0x1962   :  { %v5531_v3 = vpop.eup %5530 }
0x1963   :  { %v2150_v60 = vmul.f32 0.6931472, %v5531_v3  ;;  %v2126_v43 = vadd.f32 %v2125_v36, %v2124_v6 }
0x1965   :  { %v2152_v58 = vmul.f32 %v2150_v60, %v1906_v46  ;;  %5492 = vpush %v2126_v43 }
0x1966   :  { %v5533_v30 = vpop.eup %5532  ;;  %5494 = vpush %v2140_v29 }
0x1967   :  { %v2154_v20 = vsel %vm696_vm13, %v2152_v58, 0.0  ;;  %v2172_v37 = vmul.f32 0.6931472, %v5533_v30 }
0x1968   :  { %v2155_v40 = vadd.f32 %v2154_v20, %v2153_v16 }
0x1969   :  { %v2175_v59 = vmul.f32 %v2172_v37, %v2114_v50 }
0x196a   :  { %2156 = vadd.xlane.f32.xlu0 %v2155_v40 }
0x196b   :  { %v2177_v48 = vsel %vm696_vm13, %v2175_v59, 0.0 }
0x196c   :  { %v2179_v53 = vadd.f32 %v2178_v51, %v2177_v48 }
0x196e   :  { %4520 = vadd.xlane.f32.xlu0 %v4519_v27  ;;  %2180 = vadd.xlane.f32.xlu1 %v2179_v53 }
0x1996   :  { %s5493_s2 = spop %5492 }
0x1997   :  { %s5495_s18 = spop %5494  ;;  %v2128_v0 = vstv %s5493_s2 }
0x1998   :  { %v2142_v52 = vstv %s5495_s18  ;;  %v2129_v55 = vmul.f32 0.015625, %v2128_v0 }
0x1999   :  { %v2143_v5 = vmul.f32 0.0078125, %v2142_v52 }
0x199b   :  { %v2144_v47 = vadd.f32 %v2143_v5, %v2129_v55 }
0x199d   :  { %v4690_v29 = vmul.f32 0.25, %v2144_v47 }
0x19dd   :  { %v4671_v35 = vpop.f32.mrf.mxu0 }
0x19de   :  { %v4675_v4 = vsub.f32 %v4601_v1, %v4671_v35 }
0x19df   :  { %v5491_v25 = vpop.f32.mrf.mxu0 }
0x19e0   :  { %v4676_v12 = vmul.f32 %v4675_v4, %v4675_v4 }
0x19e2   :  { %v4677_v31 = vsel %vm3074_vm1, %v4676_v12, 0.0 }
0x19e3   :  { %4678 = vadd.xlane.f32.xlu1 %v4677_v31 }
0x19f3   :  { %v2157_v23 = vpop.xlane.xlu0 %2156 }
0x19f4   :  { %v2158_v8 = vrot.slane %v2157_v23, 4 }
0x19f6   :  { %v2159_v49 = vadd.f32 %v2158_v8, %v2157_v23 }
0x19f7   :  { %v4521_v14 = vpop.xlane.xlu0 %4520  ;;  %v2181_v22 = vpop.xlane.xlu1 %2180 }
0x19f8   :  { %v2160_v15 = vrot.slane %v2159_v49, 2  ;;  %v4522_v13 = vrot.slane %v4521_v14, 4  ;;  %v2182_v41 = vrot.slane %v2181_v22, 4 }
0x19fa   :  { %v4523_v54 = vadd.f32 %v4522_v13, %v4521_v14  ;;  %v2183_v33 = vadd.f32 %v2182_v41, %v2181_v22  ;;  %v2161_v45 = vadd.f32 %v2160_v15, %v2159_v49 }
0x19fc   :  { %v4524_v63 = vrot.slane %v4523_v54, 2  ;;  %v2184_v38 = vrot.slane %v2183_v33, 2  ;;  %v2162_v21 = vrot.slane %v2161_v45, 1 }
0x19fe   :  { %v4525_v1 = vadd.f32 %v4524_v63, %v4523_v54  ;;  %v2163_v56 = vadd.f32 %v2162_v21, %v2161_v45  ;;  %v2185_v44 = vadd.f32 %v2184_v38, %v2183_v33 }
0x1a00   :  { %5496 = vpush %v2163_v56  ;;  %v2186_v18 = vrot.slane %v2185_v44, 1  ;;  %v4526_v19 = vrot.slane %v4525_v1, 1 }
0x1a02   :  { %v2187_v17 = vadd.f32 %v2186_v18, %v2185_v44  ;;  %v4527_v46 = vadd.f32 %v4526_v19, %v4525_v1 }
0x1a04   :  { %5498 = vpush %v2187_v17 }
0x1a05   :  { %5500 = vpush %v4527_v46 }
0x1a31   :  { %s5497_s28 = spop %5496 }
0x1a32   :  { %v2165_v62 = vstv %s5497_s28 }
0x1a33   :  { %v2166_v39 = vsub.f32 0.0, %v2165_v62 }
0x1a35   :  { %s5499_s29 = spop %5498  ;;  %v2167_v36 = vmul.f32 1.442695, %v2166_v39 }
0x1a36   :  { %v2189_v26 = vstv %s5499_s29  ;;  %s5501_s30 = spop %5500 }
0x1a37   :  { %v2190_v7 = vsub.f32 0.0, %v2189_v26  ;;  %v4529_v6 = vstv %s5501_s30  ;;  %5534 = vpow2.f32 %v2167_v36 }
0x1a38   :  { %v4530_v2 = vmul.f32 0.00390625, %v4529_v6 }
0x1a39   :  { %v2191_v3 = vmul.f32 1.442695, %v2190_v7 }
0x1a3a   :  { %v4689_v60 = vadd.f32 %v4530_v2, %v2144_v47 }
0x1a3b   :  { %5536 = vpow2.f32 %v2191_v3 }
0x1a3c   :  { %v4691_v24 = vadd.f32 %v4690_v29, %v4689_v60 }
0x1a44   :  { %v5535_v37 = vpop.eup %5534 }
0x1a48   :  { %v5537_v57 = vpop.eup %5536 }
0x1a6c   :  { %v4679_v32 = vpop.xlane.xlu1 %4678 }
0x1a6d   :  { %v4680_v10 = vrot.slane %v4679_v32, 4 }
0x1a6f   :  { %v4681_v11 = vadd.f32 %v4680_v10, %v4679_v32 }
0x1a71   :  { %v4682_v50 = vrot.slane %v4681_v11, 2 }
0x1a73   :  { %v4683_v9 = vadd.f32 %v4682_v50, %v4681_v11 }
0x1a75   :  { %v4684_v42 = vrot.slane %v4683_v9, 1 }
0x1a77   :  { %v4685_v34 = vadd.f32 %v4684_v42, %v4683_v9 }
0x1a79   :  { %5502 = vpush %v4685_v34 }
0x1aaa   :  { %s5503_s16 = spop %5502 }
0x1aab   :  { %v4687_v43 = vstv %s5503_s16 }
0x1aac   :  { %v4688_v28 = vmul.f32 0.00390625, %v4687_v43 }
0x1aae   :  { %v4692_v58 = vmul.f32 0.1, %v4688_v28 }
0x1ab0   :  { %v4693_v30 = vadd.f32 %v4692_v58, %v4691_v24 }
0x1ab2   :  { %v4694_v16 = vsel %vm696_vm13, %v4693_v30, %v4530_v2 }
0x1ab3   :  { %v4695_v61 = vsel %vm6954_vm0, %v4694_v16, %v4688_v28 }
0x1ab4   :  { %v4696_v20 = vsel %vm6955_vm10, %v4695_v61, %v2144_v47 }
0x1ab5   :  { %v4697_v40 = vsel %vm6956_vm2, %v4696_v20, %v2144_v47 }
0x1ab6   :  { %v4698_v59 = vsel %vm6957_vm3, %v4697_v40, %v5535_v37 }
0x1ab7   :  { %v4700_v51 = vsel %vm4699_vm15, %v4698_v59, %v5537_v57 }
0x1ab8   :  { %v4701_v48 = vsel %vm6958_vm9, %v4700_v51, 0.0 }
0x1ab9   :  { %4703 = vst.msk [vmem:[%s6940_s3] sm:$0x1] %vm4702_vm8, %v4701_v48 }

</bundles_post_ra>
